<compile_context>
chip_gen: v6e
topology: v6e:2x2x1
jax: 0.10.0
libtpu: 0.0.40
codegen_flags: <defaults>
</compile_context>

<pallas_src>
import jax
import jax.numpy as jnp
from jax import lax
from jax.experimental import pallas as pl
from jax.experimental.pallas import tpu as pltpu

CH = 32                # conv output channels
TAPS = 9               # 3x3 taps
POOL = 196             # 14*14 pooled positions per image
POOL_PAD = 256         # 196 padded up to a multiple of 128 (lane aligned)
NWIN = 4               # 2x2 pool-window offsets
FEAT = CH * POOL_PAD   # 8192 flat (zero-padded) features per image


def fused_cnn_kernel(p_ref, wc_ref, bc_ref, w1_ref, b1_ref, w2_ref, b2_ref,
                     y_ref, flat_ref):
    # p_ref : (B, 9, 1024) lane-dense im2col patches, lane = d*256 + pool_pos
    # wc_ref: (32, 9) conv weight;  bc_ref: (32, 1) conv bias
    # w1_ref: (8192, 10) fc1 weight permuted/zero-padded to the flat layout
    # b1_ref: (1, 10);  w2_ref: (10, 6);  b2_ref: (1, 6)
    # y_ref : (B, 16) = [fc1 | fc2];  flat_ref: VMEM scratch (B, 8192)
    B = p_ref.shape[0]
    wc = wc_ref[...]
    bc = bc_ref[...]
    for b in range(B):                      # static unroll over the batch tile
        # conv for all 4 pool-window offsets in one MXU pass: (32,9)@(9,1024)
        z = jnp.dot(wc, p_ref[b], preferred_element_type=jnp.float32)
        # maxpool 2x2 = max over the four 256-lane chunks (128-aligned slices)
        m = jnp.maximum(jnp.maximum(z[:, 0:256], z[:, 256:512]),
                        jnp.maximum(z[:, 512:768], z[:, 768:1024]))
        # bias + ReLU once, after the max (bias const per window, ReLU monotone)
        h = jnp.maximum(m + bc, 0.0)        # (32, 256); lanes >=196 are junk,
                                            # killed later by zero rows of w1.
        # channel-major flatten into VMEM (the only relayout; never hits HBM)
        for c in range(CH):
            flat_ref[b:b + 1, c * POOL_PAD:(c + 1) * POOL_PAD] = h[c:c + 1, :]
    # fused MLP on the whole batch tile; features stay resident in VMEM
    y1 = jnp.dot(flat_ref[...], w1_ref[...],
                 preferred_element_type=jnp.float32) + b1_ref[...]
    y2 = jnp.dot(y1, w2_ref[...],
                 preferred_element_type=jnp.float32) + b2_ref[...]
    y_ref[:, 0:10] = y1
    y_ref[:, 10:16] = y2


def im2col_lane_dense(x):
    """x: (N, 1, 28, 28) f32 -> (N, 9, 1024) lane-dense patches.

    patches[n, t, d*256 + (ph*14+pw)] = x_pad[n, 2*ph+di+ki, 2*pw+dj+kj]
    with t = ki*3+kj and d = di*2+dj; lanes 196..255 of each chunk are zero.
    """
    N = x.shape[0]
    xp = jnp.pad(x[:, 0], ((0, 0), (1, 1), (1, 1)))                  # (N,30,30)
    taps = jnp.stack([xp[:, ki:ki + 28, kj:kj + 28]
                      for ki in range(3) for kj in range(3)], axis=1)  # (N,9,28,28)
    r = taps.reshape(N, TAPS, 14, 2, 14, 2)      # (n, t, ph, di, pw, dj)
    r = r.transpose(0, 1, 3, 5, 2, 4)            # (n, t, di, dj, ph, pw)
    r = r.reshape(N, TAPS, NWIN, POOL)
    r = jnp.pad(r, ((0, 0), (0, 0), (0, 0), (0, POOL_PAD - POOL)))
    return r.reshape(N, TAPS, NWIN * POOL_PAD)   # (N, 9, 1024)


def prepare_params(params):
    """One-time host-side weight re-layout (no per-call transposes)."""
    conv_w, conv_b, fc1_w, fc1_b, fc2_w, fc2_b = params
    wc = conv_w.reshape(CH, TAPS)                       # (32, 9), tap = ki*3+kj
    bc = conv_b.reshape(CH, 1)
    # fc1 columns permuted from PyTorch (c, h, w) flatten to our (c*256 + pos)
    # flat layout, with zero rows for the 196->256 lane padding.
    w1p = fc1_w.reshape(10, CH, POOL).transpose(1, 2, 0)   # (32, 196, 10)
    w1p = jnp.pad(w1p, ((0, 0), (0, POOL_PAD - POOL), (0, 0)))
    w1 = w1p.reshape(FEAT, 10)                             # (8192, 10)
    b1 = fc1_b.reshape(1, 10)
    w2 = fc2_w.T                                            # (10, 6)
    b2 = fc2_b.reshape(1, 6)
    return wc, bc, w1, b1, w2, b2


def simple_cnn_forward(x, prepped):
    wc, bc, w1, b1, w2, b2 = prepped
    N = x.shape[0]
    # Batch tile: full batch when small, otherwise a multiple of 8 so the
    # (B, 16) output block satisfies the (8, 128) tiling rule; the last
    # (possibly partial) tile relies on Pallas OOB masking.
    B = N if N <= 8 else 8
    patches = im2col_lane_dense(x)                          # (N, 9, 1024)

    y_all = pl.pallas_call(
        fused_cnn_kernel,
        out_shape=jax.ShapeDtypeStruct((N, 16), jnp.float32),
        grid=(pl.cdiv(N, B),),
        in_specs=[
            pl.BlockSpec((B, TAPS, NWIN * POOL_PAD), lambda i: (i, 0, 0)),
            pl.BlockSpec((CH, TAPS), lambda i: (0, 0)),
            pl.BlockSpec((CH, 1), lambda i: (0, 0)),
            pl.BlockSpec((FEAT, 10), lambda i: (0, 0)),
            pl.BlockSpec((1, 10), lambda i: (0, 0)),
            pl.BlockSpec((10, 6), lambda i: (0, 0)),
            pl.BlockSpec((1, 6), lambda i: (0, 0)),
        ],
        out_specs=pl.BlockSpec((B, 16), lambda i: (i, 0)),
        scratch_shapes=[pltpu.VMEM((B, FEAT), jnp.float32)],
        compiler_params=pltpu.CompilerParams(
            dimension_semantics=("parallel",),
            vmem_limit_bytes=32 * 1024 * 1024),
    )(patches, wc, bc, w1, b1, w2, b2)

    return y_all[:, 0:10], y_all[:, 10:16]


def reference_forward(x, params):
    """Pure-JAX reference mirroring the PyTorch forward exactly."""
    conv_w, conv_b, fc1_w, fc1_b, fc2_w, fc2_b = params
    y = lax.conv_general_dilated(x, conv_w, window_strides=(1, 1),
                                 padding="SAME",
                                 dimension_numbers=("NCHW", "OIHW", "NCHW"))
    y = y + conv_b.reshape(1, CH, 1, 1)
    y = jnp.maximum(y, 0.0)
    y = lax.reduce_window(y, -jnp.inf, lax.max,
                          (1, 1, 2, 2), (1, 1, 2, 2), "VALID")
    flat = y.reshape(x.shape[0], CH * 14 * 14)
    y1 = flat @ fc1_w.T + fc1_b
    y2 = y1 @ fc2_w.T + fc2_b
    return y1, y2


if __name__ == "__main__":
    key = jax.random.PRNGKey(0)
    kx, k1, k2, k3, k4, k5, k6 = jax.random.split(key, 7)

    # Deterministic synthetic parameters (shapes from SimpleCNN.__init__).
    conv_w = jax.random.normal(k1, (32, 1, 3, 3), jnp.float32) * 0.1
    conv_b = jax.random.normal(k2, (32,), jnp.float32) * 0.1
    fc1_w = jax.random.normal(k3, (10, 32 * 14 * 14), jnp.float32) * 0.02
    fc1_b = jax.random.normal(k4, (10,), jnp.float32) * 0.1
    fc2_w = jax.random.normal(k5, (6, 10), jnp.float32) * 0.1
    fc2_b = jax.random.normal(k6, (6,), jnp.float32) * 0.1
    params = (conv_w, conv_b, fc1_w, fc1_b, fc2_w, fc2_b)

    prepped = prepare_params(params)          # one-time weight re-layout
    fwd = jax.jit(simple_cnn_forward)

    # Primary small-shape check (single tile, B = N).
    N = 2
    x = jax.random.normal(kx, (N, 1, 28, 28), jnp.float32)
    y1, y2 = fwd(x, prepped)
    jax.block_until_ready((y1, y2))
    r1, r2 = reference_forward(x, params)
    assert y1.shape == (N, 10) and y2.shape == (N, 6)
    assert y1.dtype == jnp.float32 and y2.dtype == jnp.float32
    assert jnp.allclose(y1, r1, atol=2e-3, rtol=2e-3)
    assert jnp.allclose(y2, r2, atol=2e-3, rtol=2e-3)

    # Batched-path check: B=8, grid=3, partial last tile (the perf-relevant path).
    N2 = 18
    x2 = jax.random.normal(kx, (N2, 1, 28, 28), jnp.float32)
    y1b, y2b = fwd(x2, prepped)
    jax.block_until_ready((y1b, y2b))
    r1b, r2b = reference_forward(x2, params)
    assert jnp.allclose(y1b, r1b, atol=2e-3, rtol=2e-3)
    assert jnp.allclose(y2b, r2b, atol=2e-3, rtol=2e-3)

    print("KERNEL_OK")
</pallas_src>

<mosaic_0001>
module attributes {stable_mosaic.version = 11 : i64} {
  func.func @fused_cnn_kernel(%arg0: i32, %arg1: memref<2x9x1024xf32, #tpu.memory_space<vmem>>, %arg2: memref<32x9xf32, #tpu.memory_space<vmem>>, %arg3: memref<32x1xf32, #tpu.memory_space<vmem>>, %arg4: memref<8192x10xf32, #tpu.memory_space<vmem>>, %arg5: memref<1x10xf32, #tpu.memory_space<vmem>>, %arg6: memref<10x6xf32, #tpu.memory_space<vmem>>, %arg7: memref<1x6xf32, #tpu.memory_space<vmem>>, %arg8: memref<2x16xf32, #tpu.memory_space<vmem>>, %arg9: memref<2x8192xf32, #tpu.memory_space<vmem>>) attributes {dimension_semantics = [#tpu.dimension_semantics<parallel>], iteration_bounds = array<i64: 1>, scalar_prefetch = 0 : i64, scratch_operands = 1 : i64, tpu.core_type = #tpu.core_type<tc>, window_params = [{transform_indices = @transform_0, window_bounds = array<i64: 2, 9, 1024>}, {pipeline_mode = #tpu.pipeline_mode<synchronous>, transform_indices = @transform_1, window_bounds = array<i64: 32, 9>}, {pipeline_mode = #tpu.pipeline_mode<synchronous>, transform_indices = @transform_2, window_bounds = array<i64: 32, 1>}, {pipeline_mode = #tpu.pipeline_mode<synchronous>, transform_indices = @transform_3, window_bounds = array<i64: 8192, 10>}, {pipeline_mode = #tpu.pipeline_mode<synchronous>, transform_indices = @transform_4, window_bounds = array<i64: 1, 10>}, {pipeline_mode = #tpu.pipeline_mode<synchronous>, transform_indices = @transform_5, window_bounds = array<i64: 10, 6>}, {pipeline_mode = #tpu.pipeline_mode<synchronous>, transform_indices = @transform_6, window_bounds = array<i64: 1, 6>}, {transform_indices = @transform_7, window_bounds = array<i64: 2, 16>}]} {
    %c0 = arith.constant 0 : index
    %c0_0 = arith.constant 0 : index
    %0 = vector.load %arg2[%c0, %c0_0] : memref<32x9xf32, #tpu.memory_space<vmem>>, vector<32x9xf32>
    %c0_1 = arith.constant 0 : index
    %c0_2 = arith.constant 0 : index
    %1 = vector.load %arg3[%c0_1, %c0_2] : memref<32x1xf32, #tpu.memory_space<vmem>>, vector<32x1xf32>
    %c0_3 = arith.constant 0 : index
    %c0_4 = arith.constant 0 : index
    %c0_5 = arith.constant 0 : index
    %2 = vector.load %arg1[%c0_3, %c0_4, %c0_5] : memref<2x9x1024xf32, #tpu.memory_space<vmem>>, vector<1x9x1024xf32>
    %3 = vector.shape_cast %2 : vector<1x9x1024xf32> to vector<9x1024xf32>
    %cst = arith.constant dense<0.000000e+00> : vector<32x1024xf32>
    %4 = tpu.matmul %0, %3, %cst {dimension_numbers = #tpu.dot_dimension_numbers<[1], [0], [0], [1], [0, 0, 1, 1], [], []>} : vector<32x9xf32>, vector<9x1024xf32>, vector<32x1024xf32> -> vector<32x1024xf32>
    %5 = vector.extract_strided_slice %4 {offsets = [0, 0], sizes = [32, 256], strides = [1, 1]} : vector<32x1024xf32> to vector<32x256xf32>
    %6 = vector.extract_strided_slice %4 {offsets = [0, 256], sizes = [32, 256], strides = [1, 1]} : vector<32x1024xf32> to vector<32x256xf32>
    %7 = arith.maximumf %5, %6 : vector<32x256xf32>
    %8 = vector.extract_strided_slice %4 {offsets = [0, 512], sizes = [32, 256], strides = [1, 1]} : vector<32x1024xf32> to vector<32x256xf32>
    %9 = vector.extract_strided_slice %4 {offsets = [0, 768], sizes = [32, 256], strides = [1, 1]} : vector<32x1024xf32> to vector<32x256xf32>
    %10 = arith.maximumf %8, %9 : vector<32x256xf32>
    %11 = arith.maximumf %7, %10 : vector<32x256xf32>
    %12 = vector.broadcast %1 : vector<32x1xf32> to vector<32x256xf32>
    %13 = arith.addf %11, %12 : vector<32x256xf32>
    %cst_6 = arith.constant 0.000000e+00 : f32
    %14 = vector.broadcast %cst_6 : f32 to vector<32x256xf32>
    %15 = arith.maximumf %13, %14 : vector<32x256xf32>
    %16 = vector.extract_strided_slice %15 {offsets = [0, 0], sizes = [1, 256], strides = [1, 1]} : vector<32x256xf32> to vector<1x256xf32>
    %c0_7 = arith.constant 0 : index
    %c0_8 = arith.constant 0 : index
    %17 = vector.load %arg9[%c0_7, %c0_8] : memref<2x8192xf32, #tpu.memory_space<vmem>>, vector<1x256xf32>
    tpu.vector_store %arg9[%c0_7, %c0_8], %16 {strides = array<i32>} : memref<2x8192xf32, #tpu.memory_space<vmem>>, vector<1x256xf32>,
    %18 = vector.extract_strided_slice %15 {offsets = [1, 0], sizes = [1, 256], strides = [1, 1]} : vector<32x256xf32> to vector<1x256xf32>
    %c0_9 = arith.constant 0 : index
    %c256 = arith.constant 256 : index
    %19 = vector.load %arg9[%c0_9, %c256] : memref<2x8192xf32, #tpu.memory_space<vmem>>, vector<1x256xf32>
    tpu.vector_store %arg9[%c0_9, %c256], %18 {strides = array<i32>} : memref<2x8192xf32, #tpu.memory_space<vmem>>, vector<1x256xf32>,
    %20 = vector.extract_strided_slice %15 {offsets = [2, 0], sizes = [1, 256], strides = [1, 1]} : vector<32x256xf32> to vector<1x256xf32>
    %c0_10 = arith.constant 0 : index
    %c512 = arith.constant 512 : index
    %21 = vector.load %arg9[%c0_10, %c512] : memref<2x8192xf32, #tpu.memory_space<vmem>>, vector<1x256xf32>
    tpu.vector_store %arg9[%c0_10, %c512], %20 {strides = array<i32>} : memref<2x8192xf32, #tpu.memory_space<vmem>>, vector<1x256xf32>,
    %22 = vector.extract_strided_slice %15 {offsets = [3, 0], sizes = [1, 256], strides = [1, 1]} : vector<32x256xf32> to vector<1x256xf32>
    %c0_11 = arith.constant 0 : index
    %c768 = arith.constant 768 : index
    %23 = vector.load %arg9[%c0_11, %c768] : memref<2x8192xf32, #tpu.memory_space<vmem>>, vector<1x256xf32>
    tpu.vector_store %arg9[%c0_11, %c768], %22 {strides = array<i32>} : memref<2x8192xf32, #tpu.memory_space<vmem>>, vector<1x256xf32>,
    %24 = vector.extract_strided_slice %15 {offsets = [4, 0], sizes = [1, 256], strides = [1, 1]} : vector<32x256xf32> to vector<1x256xf32>
    %c0_12 = arith.constant 0 : index
    %c1024 = arith.constant 1024 : index
    %25 = vector.load %arg9[%c0_12, %c1024] : memref<2x8192xf32, #tpu.memory_space<vmem>>, vector<1x256xf32>
    tpu.vector_store %arg9[%c0_12, %c1024], %24 {strides = array<i32>} : memref<2x8192xf32, #tpu.memory_space<vmem>>, vector<1x256xf32>,
    %26 = vector.extract_strided_slice %15 {offsets = [5, 0], sizes = [1, 256], strides = [1, 1]} : vector<32x256xf32> to vector<1x256xf32>
    %c0_13 = arith.constant 0 : index
    %c1280 = arith.constant 1280 : index
    %27 = vector.load %arg9[%c0_13, %c1280] : memref<2x8192xf32, #tpu.memory_space<vmem>>, vector<1x256xf32>
    tpu.vector_store %arg9[%c0_13, %c1280], %26 {strides = array<i32>} : memref<2x8192xf32, #tpu.memory_space<vmem>>, vector<1x256xf32>,
    %28 = vector.extract_strided_slice %15 {offsets = [6, 0], sizes = [1, 256], strides = [1, 1]} : vector<32x256xf32> to vector<1x256xf32>
    %c0_14 = arith.constant 0 : index
    %c1536 = arith.constant 1536 : index
    %29 = vector.load %arg9[%c0_14, %c1536] : memref<2x8192xf32, #tpu.memory_space<vmem>>, vector<1x256xf32>
    tpu.vector_store %arg9[%c0_14, %c1536], %28 {strides = array<i32>} : memref<2x8192xf32, #tpu.memory_space<vmem>>, vector<1x256xf32>,
    %30 = vector.extract_strided_slice %15 {offsets = [7, 0], sizes = [1, 256], strides = [1, 1]} : vector<32x256xf32> to vector<1x256xf32>
    %c0_15 = arith.constant 0 : index
    %c1792 = arith.constant 1792 : index
    %31 = vector.load %arg9[%c0_15, %c1792] : memref<2x8192xf32, #tpu.memory_space<vmem>>, vector<1x256xf32>
    tpu.vector_store %arg9[%c0_15, %c1792], %30 {strides = array<i32>} : memref<2x8192xf32, #tpu.memory_space<vmem>>, vector<1x256xf32>,
    %32 = vector.extract_strided_slice %15 {offsets = [8, 0], sizes = [1, 256], strides = [1, 1]} : vector<32x256xf32> to vector<1x256xf32>
    %c0_16 = arith.constant 0 : index
    %c2048 = arith.constant 2048 : index
    %33 = vector.load %arg9[%c0_16, %c2048] : memref<2x8192xf32, #tpu.memory_space<vmem>>, vector<1x256xf32>
    tpu.vector_store %arg9[%c0_16, %c2048], %32 {strides = array<i32>} : memref<2x8192xf32, #tpu.memory_space<vmem>>, vector<1x256xf32>,
    %34 = vector.extract_strided_slice %15 {offsets = [9, 0], sizes = [1, 256], strides = [1, 1]} : vector<32x256xf32> to vector<1x256xf32>
    %c0_17 = arith.constant 0 : index
    %c2304 = arith.constant 2304 : index
    %35 = vector.load %arg9[%c0_17, %c2304] : memref<2x8192xf32, #tpu.memory_space<vmem>>, vector<1x256xf32>
    tpu.vector_store %arg9[%c0_17, %c2304], %34 {strides = array<i32>} : memref<2x8192xf32, #tpu.memory_space<vmem>>, vector<1x256xf32>,
    %36 = vector.extract_strided_slice %15 {offsets = [10, 0], sizes = [1, 256], strides = [1, 1]} : vector<32x256xf32> to vector<1x256xf32>
    %c0_18 = arith.constant 0 : index
    %c2560 = arith.constant 2560 : index
    %37 = vector.load %arg9[%c0_18, %c2560] : memref<2x8192xf32, #tpu.memory_space<vmem>>, vector<1x256xf32>
    tpu.vector_store %arg9[%c0_18, %c2560], %36 {strides = array<i32>} : memref<2x8192xf32, #tpu.memory_space<vmem>>, vector<1x256xf32>,
    %38 = vector.extract_strided_slice %15 {offsets = [11, 0], sizes = [1, 256], strides = [1, 1]} : vector<32x256xf32> to vector<1x256xf32>
    %c0_19 = arith.constant 0 : index
    %c2816 = arith.constant 2816 : index
    %39 = vector.load %arg9[%c0_19, %c2816] : memref<2x8192xf32, #tpu.memory_space<vmem>>, vector<1x256xf32>
    tpu.vector_store %arg9[%c0_19, %c2816], %38 {strides = array<i32>} : memref<2x8192xf32, #tpu.memory_space<vmem>>, vector<1x256xf32>,
    %40 = vector.extract_strided_slice %15 {offsets = [12, 0], sizes = [1, 256], strides = [1, 1]} : vector<32x256xf32> to vector<1x256xf32>
    %c0_20 = arith.constant 0 : index
    %c3072 = arith.constant 3072 : index
    %41 = vector.load %arg9[%c0_20, %c3072] : memref<2x8192xf32, #tpu.memory_space<vmem>>, vector<1x256xf32>
    tpu.vector_store %arg9[%c0_20, %c3072], %40 {strides = array<i32>} : memref<2x8192xf32, #tpu.memory_space<vmem>>, vector<1x256xf32>,
    %42 = vector.extract_strided_slice %15 {offsets = [13, 0], sizes = [1, 256], strides = [1, 1]} : vector<32x256xf32> to vector<1x256xf32>
    %c0_21 = arith.constant 0 : index
    %c3328 = arith.constant 3328 : index
    %43 = vector.load %arg9[%c0_21, %c3328] : memref<2x8192xf32, #tpu.memory_space<vmem>>, vector<1x256xf32>
    tpu.vector_store %arg9[%c0_21, %c3328], %42 {strides = array<i32>} : memref<2x8192xf32, #tpu.memory_space<vmem>>, vector<1x256xf32>,
    %44 = vector.extract_strided_slice %15 {offsets = [14, 0], sizes = [1, 256], strides = [1, 1]} : vector<32x256xf32> to vector<1x256xf32>
    %c0_22 = arith.constant 0 : index
    %c3584 = arith.constant 3584 : index
    %45 = vector.load %arg9[%c0_22, %c3584] : memref<2x8192xf32, #tpu.memory_space<vmem>>, vector<1x256xf32>
    tpu.vector_store %arg9[%c0_22, %c3584], %44 {strides = array<i32>} : memref<2x8192xf32, #tpu.memory_space<vmem>>, vector<1x256xf32>,
    %46 = vector.extract_strided_slice %15 {offsets = [15, 0], sizes = [1, 256], strides = [1, 1]} : vector<32x256xf32> to vector<1x256xf32>
    %c0_23 = arith.constant 0 : index
    %c3840 = arith.constant 3840 : index
    %47 = vector.load %arg9[%c0_23, %c3840] : memref<2x8192xf32, #tpu.memory_space<vmem>>, vector<1x256xf32>
    tpu.vector_store %arg9[%c0_23, %c3840], %46 {strides = array<i32>} : memref<2x8192xf32, #tpu.memory_space<vmem>>, vector<1x256xf32>,
    %48 = vector.extract_strided_slice %15 {offsets = [16, 0], sizes = [1, 256], strides = [1, 1]} : vector<32x256xf32> to vector<1x256xf32>
    %c0_24 = arith.constant 0 : index
    %c4096 = arith.constant 4096 : index
    %49 = vector.load %arg9[%c0_24, %c4096] : memref<2x8192xf32, #tpu.memory_space<vmem>>, vector<1x256xf32>
    tpu.vector_store %arg9[%c0_24, %c4096], %48 {strides = array<i32>} : memref<2x8192xf32, #tpu.memory_space<vmem>>, vector<1x256xf32>,
    %50 = vector.extract_strided_slice %15 {offsets = [17, 0], sizes = [1, 256], strides = [1, 1]} : vector<32x256xf32> to vector<1x256xf32>
    %c0_25 = arith.constant 0 : index
    %c4352 = arith.constant 4352 : index
    %51 = vector.load %arg9[%c0_25, %c4352] : memref<2x8192xf32, #tpu.memory_space<vmem>>, vector<1x256xf32>
    tpu.vector_store %arg9[%c0_25, %c4352], %50 {strides = array<i32>} : memref<2x8192xf32, #tpu.memory_space<vmem>>, vector<1x256xf32>,
    %52 = vector.extract_strided_slice %15 {offsets = [18, 0], sizes = [1, 256], strides = [1, 1]} : vector<32x256xf32> to vector<1x256xf32>
    %c0_26 = arith.constant 0 : index
    %c4608 = arith.constant 4608 : index
    %53 = vector.load %arg9[%c0_26, %c4608] : memref<2x8192xf32, #tpu.memory_space<vmem>>, vector<1x256xf32>
    tpu.vector_store %arg9[%c0_26, %c4608], %52 {strides = array<i32>} : memref<2x8192xf32, #tpu.memory_space<vmem>>, vector<1x256xf32>,
    %54 = vector.extract_strided_slice %15 {offsets = [19, 0], sizes = [1, 256], strides = [1, 1]} : vector<32x256xf32> to vector<1x256xf32>
    %c0_27 = arith.constant 0 : index
    %c4864 = arith.constant 4864 : index
    %55 = vector.load %arg9[%c0_27, %c4864] : memref<2x8192xf32, #tpu.memory_space<vmem>>, vector<1x256xf32>
    tpu.vector_store %arg9[%c0_27, %c4864], %54 {strides = array<i32>} : memref<2x8192xf32, #tpu.memory_space<vmem>>, vector<1x256xf32>,
    %56 = vector.extract_strided_slice %15 {offsets = [20, 0], sizes = [1, 256], strides = [1, 1]} : vector<32x256xf32> to vector<1x256xf32>
    %c0_28 = arith.constant 0 : index
    %c5120 = arith.constant 5120 : index
    %57 = vector.load %arg9[%c0_28, %c5120] : memref<2x8192xf32, #tpu.memory_space<vmem>>, vector<1x256xf32>
    tpu.vector_store %arg9[%c0_28, %c5120], %56 {strides = array<i32>} : memref<2x8192xf32, #tpu.memory_space<vmem>>, vector<1x256xf32>,
    %58 = vector.extract_strided_slice %15 {offsets = [21, 0], sizes = [1, 256], strides = [1, 1]} : vector<32x256xf32> to vector<1x256xf32>
    %c0_29 = arith.constant 0 : index
    %c5376 = arith.constant 5376 : index
    %59 = vector.load %arg9[%c0_29, %c5376] : memref<2x8192xf32, #tpu.memory_space<vmem>>, vector<1x256xf32>
    tpu.vector_store %arg9[%c0_29, %c5376], %58 {strides = array<i32>} : memref<2x8192xf32, #tpu.memory_space<vmem>>, vector<1x256xf32>,
    %60 = vector.extract_strided_slice %15 {offsets = [22, 0], sizes = [1, 256], strides = [1, 1]} : vector<32x256xf32> to vector<1x256xf32>
    %c0_30 = arith.constant 0 : index
    %c5632 = arith.constant 5632 : index
    %61 = vector.load %arg9[%c0_30, %c5632] : memref<2x8192xf32, #tpu.memory_space<vmem>>, vector<1x256xf32>
    tpu.vector_store %arg9[%c0_30, %c5632], %60 {strides = array<i32>} : memref<2x8192xf32, #tpu.memory_space<vmem>>, vector<1x256xf32>,
    %62 = vector.extract_strided_slice %15 {offsets = [23, 0], sizes = [1, 256], strides = [1, 1]} : vector<32x256xf32> to vector<1x256xf32>
    %c0_31 = arith.constant 0 : index
    %c5888 = arith.constant 5888 : index
    %63 = vector.load %arg9[%c0_31, %c5888] : memref<2x8192xf32, #tpu.memory_space<vmem>>, vector<1x256xf32>
    tpu.vector_store %arg9[%c0_31, %c5888], %62 {strides = array<i32>} : memref<2x8192xf32, #tpu.memory_space<vmem>>, vector<1x256xf32>,
    %64 = vector.extract_strided_slice %15 {offsets = [24, 0], sizes = [1, 256], strides = [1, 1]} : vector<32x256xf32> to vector<1x256xf32>
    %c0_32 = arith.constant 0 : index
    %c6144 = arith.constant 6144 : index
    %65 = vector.load %arg9[%c0_32, %c6144] : memref<2x8192xf32, #tpu.memory_space<vmem>>, vector<1x256xf32>
    tpu.vector_store %arg9[%c0_32, %c6144], %64 {strides = array<i32>} : memref<2x8192xf32, #tpu.memory_space<vmem>>, vector<1x256xf32>,
    %66 = vector.extract_strided_slice %15 {offsets = [25, 0], sizes = [1, 256], strides = [1, 1]} : vector<32x256xf32> to vector<1x256xf32>
    %c0_33 = arith.constant 0 : index
    %c6400 = arith.constant 6400 : index
    %67 = vector.load %arg9[%c0_33, %c6400] : memref<2x8192xf32, #tpu.memory_space<vmem>>, vector<1x256xf32>
    tpu.vector_store %arg9[%c0_33, %c6400], %66 {strides = array<i32>} : memref<2x8192xf32, #tpu.memory_space<vmem>>, vector<1x256xf32>,
    %68 = vector.extract_strided_slice %15 {offsets = [26, 0], sizes = [1, 256], strides = [1, 1]} : vector<32x256xf32> to vector<1x256xf32>
    %c0_34 = arith.constant 0 : index
    %c6656 = arith.constant 6656 : index
    %69 = vector.load %arg9[%c0_34, %c6656] : memref<2x8192xf32, #tpu.memory_space<vmem>>, vector<1x256xf32>
    tpu.vector_store %arg9[%c0_34, %c6656], %68 {strides = array<i32>} : memref<2x8192xf32, #tpu.memory_space<vmem>>, vector<1x256xf32>,
    %70 = vector.extract_strided_slice %15 {offsets = [27, 0], sizes = [1, 256], strides = [1, 1]} : vector<32x256xf32> to vector<1x256xf32>
    %c0_35 = arith.constant 0 : index
    %c6912 = arith.constant 6912 : index
    %71 = vector.load %arg9[%c0_35, %c6912] : memref<2x8192xf32, #tpu.memory_space<vmem>>, vector<1x256xf32>
    tpu.vector_store %arg9[%c0_35, %c6912], %70 {strides = array<i32>} : memref<2x8192xf32, #tpu.memory_space<vmem>>, vector<1x256xf32>,
    %72 = vector.extract_strided_slice %15 {offsets = [28, 0], sizes = [1, 256], strides = [1, 1]} : vector<32x256xf32> to vector<1x256xf32>
    %c0_36 = arith.constant 0 : index
    %c7168 = arith.constant 7168 : index
    %73 = vector.load %arg9[%c0_36, %c7168] : memref<2x8192xf32, #tpu.memory_space<vmem>>, vector<1x256xf32>
    tpu.vector_store %arg9[%c0_36, %c7168], %72 {strides = array<i32>} : memref<2x8192xf32, #tpu.memory_space<vmem>>, vector<1x256xf32>,
    %74 = vector.extract_strided_slice %15 {offsets = [29, 0], sizes = [1, 256], strides = [1, 1]} : vector<32x256xf32> to vector<1x256xf32>
    %c0_37 = arith.constant 0 : index
    %c7424 = arith.constant 7424 : index
    %75 = vector.load %arg9[%c0_37, %c7424] : memref<2x8192xf32, #tpu.memory_space<vmem>>, vector<1x256xf32>
    tpu.vector_store %arg9[%c0_37, %c7424], %74 {strides = array<i32>} : memref<2x8192xf32, #tpu.memory_space<vmem>>, vector<1x256xf32>,
    %76 = vector.extract_strided_slice %15 {offsets = [30, 0], sizes = [1, 256], strides = [1, 1]} : vector<32x256xf32> to vector<1x256xf32>
    %c0_38 = arith.constant 0 : index
    %c7680 = arith.constant 7680 : index
    %77 = vector.load %arg9[%c0_38, %c7680] : memref<2x8192xf32, #tpu.memory_space<vmem>>, vector<1x256xf32>
    tpu.vector_store %arg9[%c0_38, %c7680], %76 {strides = array<i32>} : memref<2x8192xf32, #tpu.memory_space<vmem>>, vector<1x256xf32>,
    %78 = vector.extract_strided_slice %15 {offsets = [31, 0], sizes = [1, 256], strides = [1, 1]} : vector<32x256xf32> to vector<1x256xf32>
    %c0_39 = arith.constant 0 : index
    %c7936 = arith.constant 7936 : index
    %79 = vector.load %arg9[%c0_39, %c7936] : memref<2x8192xf32, #tpu.memory_space<vmem>>, vector<1x256xf32>
    tpu.vector_store %arg9[%c0_39, %c7936], %78 {strides = array<i32>} : memref<2x8192xf32, #tpu.memory_space<vmem>>, vector<1x256xf32>,
    %c1 = arith.constant 1 : index
    %c0_40 = arith.constant 0 : index
    %c0_41 = arith.constant 0 : index
    %80 = vector.load %arg1[%c1, %c0_40, %c0_41] : memref<2x9x1024xf32, #tpu.memory_space<vmem>>, vector<1x9x1024xf32>
    %81 = vector.shape_cast %80 : vector<1x9x1024xf32> to vector<9x1024xf32>
    %cst_42 = arith.constant dense<0.000000e+00> : vector<32x1024xf32>
    %82 = tpu.matmul %0, %81, %cst_42 {dimension_numbers = #tpu.dot_dimension_numbers<[1], [0], [0], [1], [0, 0, 1, 1], [], []>} : vector<32x9xf32>, vector<9x1024xf32>, vector<32x1024xf32> -> vector<32x1024xf32>
    %83 = vector.extract_strided_slice %82 {offsets = [0, 0], sizes = [32, 256], strides = [1, 1]} : vector<32x1024xf32> to vector<32x256xf32>
    %84 = vector.extract_strided_slice %82 {offsets = [0, 256], sizes = [32, 256], strides = [1, 1]} : vector<32x1024xf32> to vector<32x256xf32>
    %85 = arith.maximumf %83, %84 : vector<32x256xf32>
    %86 = vector.extract_strided_slice %82 {offsets = [0, 512], sizes = [32, 256], strides = [1, 1]} : vector<32x1024xf32> to vector<32x256xf32>
    %87 = vector.extract_strided_slice %82 {offsets = [0, 768], sizes = [32, 256], strides = [1, 1]} : vector<32x1024xf32> to vector<32x256xf32>
    %88 = arith.maximumf %86, %87 : vector<32x256xf32>
    %89 = arith.maximumf %85, %88 : vector<32x256xf32>
    %90 = vector.broadcast %1 : vector<32x1xf32> to vector<32x256xf32>
    %91 = arith.addf %89, %90 : vector<32x256xf32>
    %cst_43 = arith.constant 0.000000e+00 : f32
    %92 = vector.broadcast %cst_43 : f32 to vector<32x256xf32>
    %93 = arith.maximumf %91, %92 : vector<32x256xf32>
    %94 = vector.extract_strided_slice %93 {offsets = [0, 0], sizes = [1, 256], strides = [1, 1]} : vector<32x256xf32> to vector<1x256xf32>
    %c1_44 = arith.constant 1 : index
    %c0_45 = arith.constant 0 : index
    %95 = vector.load %arg9[%c1_44, %c0_45] : memref<2x8192xf32, #tpu.memory_space<vmem>>, vector<1x256xf32>
    tpu.vector_store %arg9[%c1_44, %c0_45], %94 {strides = array<i32>} : memref<2x8192xf32, #tpu.memory_space<vmem>>, vector<1x256xf32>,
    %96 = vector.extract_strided_slice %93 {offsets = [1, 0], sizes = [1, 256], strides = [1, 1]} : vector<32x256xf32> to vector<1x256xf32>
    %c1_46 = arith.constant 1 : index
    %c256_47 = arith.constant 256 : index
    %97 = vector.load %arg9[%c1_46, %c256_47] : memref<2x8192xf32, #tpu.memory_space<vmem>>, vector<1x256xf32>
    tpu.vector_store %arg9[%c1_46, %c256_47], %96 {strides = array<i32>} : memref<2x8192xf32, #tpu.memory_space<vmem>>, vector<1x256xf32>,
    %98 = vector.extract_strided_slice %93 {offsets = [2, 0], sizes = [1, 256], strides = [1, 1]} : vector<32x256xf32> to vector<1x256xf32>
    %c1_48 = arith.constant 1 : index
    %c512_49 = arith.constant 512 : index
    %99 = vector.load %arg9[%c1_48, %c512_49] : memref<2x8192xf32, #tpu.memory_space<vmem>>, vector<1x256xf32>
    tpu.vector_store %arg9[%c1_48, %c512_49], %98 {strides = array<i32>} : memref<2x8192xf32, #tpu.memory_space<vmem>>, vector<1x256xf32>,
    %100 = vector.extract_strided_slice %93 {offsets = [3, 0], sizes = [1, 256], strides = [1, 1]} : vector<32x256xf32> to vector<1x256xf32>
    %c1_50 = arith.constant 1 : index
    %c768_51 = arith.constant 768 : index
    %101 = vector.load %arg9[%c1_50, %c768_51] : memref<2x8192xf32, #tpu.memory_space<vmem>>, vector<1x256xf32>
    tpu.vector_store %arg9[%c1_50, %c768_51], %100 {strides = array<i32>} : memref<2x8192xf32, #tpu.memory_space<vmem>>, vector<1x256xf32>,
    %102 = vector.extract_strided_slice %93 {offsets = [4, 0], sizes = [1, 256], strides = [1, 1]} : vector<32x256xf32> to vector<1x256xf32>
    %c1_52 = arith.constant 1 : index
    %c1024_53 = arith.constant 1024 : index
    %103 = vector.load %arg9[%c1_52, %c1024_53] : memref<2x8192xf32, #tpu.memory_space<vmem>>, vector<1x256xf32>
    tpu.vector_store %arg9[%c1_52, %c1024_53], %102 {strides = array<i32>} : memref<2x8192xf32, #tpu.memory_space<vmem>>, vector<1x256xf32>,
    %104 = vector.extract_strided_slice %93 {offsets = [5, 0], sizes = [1, 256], strides = [1, 1]} : vector<32x256xf32> to vector<1x256xf32>
    %c1_54 = arith.constant 1 : index
    %c1280_55 = arith.constant 1280 : index
    %105 = vector.load %arg9[%c1_54, %c1280_55] : memref<2x8192xf32, #tpu.memory_space<vmem>>, vector<1x256xf32>
    tpu.vector_store %arg9[%c1_54, %c1280_55], %104 {strides = array<i32>} : memref<2x8192xf32, #tpu.memory_space<vmem>>, vector<1x256xf32>,
    %106 = vector.extract_strided_slice %93 {offsets = [6, 0], sizes = [1, 256], strides = [1, 1]} : vector<32x256xf32> to vector<1x256xf32>
    %c1_56 = arith.constant 1 : index
    %c1536_57 = arith.constant 1536 : index
    %107 = vector.load %arg9[%c1_56, %c1536_57] : memref<2x8192xf32, #tpu.memory_space<vmem>>, vector<1x256xf32>
    tpu.vector_store %arg9[%c1_56, %c1536_57], %106 {strides = array<i32>} : memref<2x8192xf32, #tpu.memory_space<vmem>>, vector<1x256xf32>,
    %108 = vector.extract_strided_slice %93 {offsets = [7, 0], sizes = [1, 256], strides = [1, 1]} : vector<32x256xf32> to vector<1x256xf32>
    %c1_58 = arith.constant 1 : index
    %c1792_59 = arith.constant 1792 : index
    %109 = vector.load %arg9[%c1_58, %c1792_59] : memref<2x8192xf32, #tpu.memory_space<vmem>>, vector<1x256xf32>
    tpu.vector_store %arg9[%c1_58, %c1792_59], %108 {strides = array<i32>} : memref<2x8192xf32, #tpu.memory_space<vmem>>, vector<1x256xf32>,
    %110 = vector.extract_strided_slice %93 {offsets = [8, 0], sizes = [1, 256], strides = [1, 1]} : vector<32x256xf32> to vector<1x256xf32>
    %c1_60 = arith.constant 1 : index
    %c2048_61 = arith.constant 2048 : index
    %111 = vector.load %arg9[%c1_60, %c2048_61] : memref<2x8192xf32, #tpu.memory_space<vmem>>, vector<1x256xf32>
    tpu.vector_store %arg9[%c1_60, %c2048_61], %110 {strides = array<i32>} : memref<2x8192xf32, #tpu.memory_space<vmem>>, vector<1x256xf32>,
    %112 = vector.extract_strided_slice %93 {offsets = [9, 0], sizes = [1, 256], strides = [1, 1]} : vector<32x256xf32> to vector<1x256xf32>
    %c1_62 = arith.constant 1 : index
    %c2304_63 = arith.constant 2304 : index
    %113 = vector.load %arg9[%c1_62, %c2304_63] : memref<2x8192xf32, #tpu.memory_space<vmem>>, vector<1x256xf32>
    tpu.vector_store %arg9[%c1_62, %c2304_63], %112 {strides = array<i32>} : memref<2x8192xf32, #tpu.memory_space<vmem>>, vector<1x256xf32>,
    %114 = vector.extract_strided_slice %93 {offsets = [10, 0], sizes = [1, 256], strides = [1, 1]} : vector<32x256xf32> to vector<1x256xf32>
    %c1_64 = arith.constant 1 : index
    %c2560_65 = arith.constant 2560 : index
    %115 = vector.load %arg9[%c1_64, %c2560_65] : memref<2x8192xf32, #tpu.memory_space<vmem>>, vector<1x256xf32>
    tpu.vector_store %arg9[%c1_64, %c2560_65], %114 {strides = array<i32>} : memref<2x8192xf32, #tpu.memory_space<vmem>>, vector<1x256xf32>,
    %116 = vector.extract_strided_slice %93 {offsets = [11, 0], sizes = [1, 256], strides = [1, 1]} : vector<32x256xf32> to vector<1x256xf32>
    %c1_66 = arith.constant 1 : index
    %c2816_67 = arith.constant 2816 : index
    %117 = vector.load %arg9[%c1_66, %c2816_67] : memref<2x8192xf32, #tpu.memory_space<vmem>>, vector<1x256xf32>
    tpu.vector_store %arg9[%c1_66, %c2816_67], %116 {strides = array<i32>} : memref<2x8192xf32, #tpu.memory_space<vmem>>, vector<1x256xf32>,
    %118 = vector.extract_strided_slice %93 {offsets = [12, 0], sizes = [1, 256], strides = [1, 1]} : vector<32x256xf32> to vector<1x256xf32>
    %c1_68 = arith.constant 1 : index
    %c3072_69 = arith.constant 3072 : index
    %119 = vector.load %arg9[%c1_68, %c3072_69] : memref<2x8192xf32, #tpu.memory_space<vmem>>, vector<1x256xf32>
    tpu.vector_store %arg9[%c1_68, %c3072_69], %118 {strides = array<i32>} : memref<2x8192xf32, #tpu.memory_space<vmem>>, vector<1x256xf32>,
    %120 = vector.extract_strided_slice %93 {offsets = [13, 0], sizes = [1, 256], strides = [1, 1]} : vector<32x256xf32> to vector<1x256xf32>
    %c1_70 = arith.constant 1 : index
    %c3328_71 = arith.constant 3328 : index
    %121 = vector.load %arg9[%c1_70, %c3328_71] : memref<2x8192xf32, #tpu.memory_space<vmem>>, vector<1x256xf32>
    tpu.vector_store %arg9[%c1_70, %c3328_71], %120 {strides = array<i32>} : memref<2x8192xf32, #tpu.memory_space<vmem>>, vector<1x256xf32>,
    %122 = vector.extract_strided_slice %93 {offsets = [14, 0], sizes = [1, 256], strides = [1, 1]} : vector<32x256xf32> to vector<1x256xf32>
    %c1_72 = arith.constant 1 : index
    %c3584_73 = arith.constant 3584 : index
    %123 = vector.load %arg9[%c1_72, %c3584_73] : memref<2x8192xf32, #tpu.memory_space<vmem>>, vector<1x256xf32>
    tpu.vector_store %arg9[%c1_72, %c3584_73], %122 {strides = array<i32>} : memref<2x8192xf32, #tpu.memory_space<vmem>>, vector<1x256xf32>,
    %124 = vector.extract_strided_slice %93 {offsets = [15, 0], sizes = [1, 256], strides = [1, 1]} : vector<32x256xf32> to vector<1x256xf32>
    %c1_74 = arith.constant 1 : index
    %c3840_75 = arith.constant 3840 : index
    %125 = vector.load %arg9[%c1_74, %c3840_75] : memref<2x8192xf32, #tpu.memory_space<vmem>>, vector<1x256xf32>
    tpu.vector_store %arg9[%c1_74, %c3840_75], %124 {strides = array<i32>} : memref<2x8192xf32, #tpu.memory_space<vmem>>, vector<1x256xf32>,
    %126 = vector.extract_strided_slice %93 {offsets = [16, 0], sizes = [1, 256], strides = [1, 1]} : vector<32x256xf32> to vector<1x256xf32>
    %c1_76 = arith.constant 1 : index
    %c4096_77 = arith.constant 4096 : index
    %127 = vector.load %arg9[%c1_76, %c4096_77] : memref<2x8192xf32, #tpu.memory_space<vmem>>, vector<1x256xf32>
    tpu.vector_store %arg9[%c1_76, %c4096_77], %126 {strides = array<i32>} : memref<2x8192xf32, #tpu.memory_space<vmem>>, vector<1x256xf32>,
    %128 = vector.extract_strided_slice %93 {offsets = [17, 0], sizes = [1, 256], strides = [1, 1]} : vector<32x256xf32> to vector<1x256xf32>
    %c1_78 = arith.constant 1 : index
    %c4352_79 = arith.constant 4352 : index
    %129 = vector.load %arg9[%c1_78, %c4352_79] : memref<2x8192xf32, #tpu.memory_space<vmem>>, vector<1x256xf32>
    tpu.vector_store %arg9[%c1_78, %c4352_79], %128 {strides = array<i32>} : memref<2x8192xf32, #tpu.memory_space<vmem>>, vector<1x256xf32>,
    %130 = vector.extract_strided_slice %93 {offsets = [18, 0], sizes = [1, 256], strides = [1, 1]} : vector<32x256xf32> to vector<1x256xf32>
    %c1_80 = arith.constant 1 : index
    %c4608_81 = arith.constant 4608 : index
    %131 = vector.load %arg9[%c1_80, %c4608_81] : memref<2x8192xf32, #tpu.memory_space<vmem>>, vector<1x256xf32>
    tpu.vector_store %arg9[%c1_80, %c4608_81], %130 {strides = array<i32>} : memref<2x8192xf32, #tpu.memory_space<vmem>>, vector<1x256xf32>,
    %132 = vector.extract_strided_slice %93 {offsets = [19, 0], sizes = [1, 256], strides = [1, 1]} : vector<32x256xf32> to vector<1x256xf32>
    %c1_82 = arith.constant 1 : index
    %c4864_83 = arith.constant 4864 : index
    %133 = vector.load %arg9[%c1_82, %c4864_83] : memref<2x8192xf32, #tpu.memory_space<vmem>>, vector<1x256xf32>
    tpu.vector_store %arg9[%c1_82, %c4864_83], %132 {strides = array<i32>} : memref<2x8192xf32, #tpu.memory_space<vmem>>, vector<1x256xf32>,
    %134 = vector.extract_strided_slice %93 {offsets = [20, 0], sizes = [1, 256], strides = [1, 1]} : vector<32x256xf32> to vector<1x256xf32>
    %c1_84 = arith.constant 1 : index
    %c5120_85 = arith.constant 5120 : index
    %135 = vector.load %arg9[%c1_84, %c5120_85] : memref<2x8192xf32, #tpu.memory_space<vmem>>, vector<1x256xf32>
    tpu.vector_store %arg9[%c1_84, %c5120_85], %134 {strides = array<i32>} : memref<2x8192xf32, #tpu.memory_space<vmem>>, vector<1x256xf32>,
    %136 = vector.extract_strided_slice %93 {offsets = [21, 0], sizes = [1, 256], strides = [1, 1]} : vector<32x256xf32> to vector<1x256xf32>
    %c1_86 = arith.constant 1 : index
    %c5376_87 = arith.constant 5376 : index
    %137 = vector.load %arg9[%c1_86, %c5376_87] : memref<2x8192xf32, #tpu.memory_space<vmem>>, vector<1x256xf32>
    tpu.vector_store %arg9[%c1_86, %c5376_87], %136 {strides = array<i32>} : memref<2x8192xf32, #tpu.memory_space<vmem>>, vector<1x256xf32>,
    %138 = vector.extract_strided_slice %93 {offsets = [22, 0], sizes = [1, 256], strides = [1, 1]} : vector<32x256xf32> to vector<1x256xf32>
    %c1_88 = arith.constant 1 : index
    %c5632_89 = arith.constant 5632 : index
    %139 = vector.load %arg9[%c1_88, %c5632_89] : memref<2x8192xf32, #tpu.memory_space<vmem>>, vector<1x256xf32>
    tpu.vector_store %arg9[%c1_88, %c5632_89], %138 {strides = array<i32>} : memref<2x8192xf32, #tpu.memory_space<vmem>>, vector<1x256xf32>,
    %140 = vector.extract_strided_slice %93 {offsets = [23, 0], sizes = [1, 256], strides = [1, 1]} : vector<32x256xf32> to vector<1x256xf32>
    %c1_90 = arith.constant 1 : index
    %c5888_91 = arith.constant 5888 : index
    %141 = vector.load %arg9[%c1_90, %c5888_91] : memref<2x8192xf32, #tpu.memory_space<vmem>>, vector<1x256xf32>
    tpu.vector_store %arg9[%c1_90, %c5888_91], %140 {strides = array<i32>} : memref<2x8192xf32, #tpu.memory_space<vmem>>, vector<1x256xf32>,
    %142 = vector.extract_strided_slice %93 {offsets = [24, 0], sizes = [1, 256], strides = [1, 1]} : vector<32x256xf32> to vector<1x256xf32>
    %c1_92 = arith.constant 1 : index
    %c6144_93 = arith.constant 6144 : index
    %143 = vector.load %arg9[%c1_92, %c6144_93] : memref<2x8192xf32, #tpu.memory_space<vmem>>, vector<1x256xf32>
    tpu.vector_store %arg9[%c1_92, %c6144_93], %142 {strides = array<i32>} : memref<2x8192xf32, #tpu.memory_space<vmem>>, vector<1x256xf32>,
    %144 = vector.extract_strided_slice %93 {offsets = [25, 0], sizes = [1, 256], strides = [1, 1]} : vector<32x256xf32> to vector<1x256xf32>
    %c1_94 = arith.constant 1 : index
    %c6400_95 = arith.constant 6400 : index
    %145 = vector.load %arg9[%c1_94, %c6400_95] : memref<2x8192xf32, #tpu.memory_space<vmem>>, vector<1x256xf32>
    tpu.vector_store %arg9[%c1_94, %c6400_95], %144 {strides = array<i32>} : memref<2x8192xf32, #tpu.memory_space<vmem>>, vector<1x256xf32>,
    %146 = vector.extract_strided_slice %93 {offsets = [26, 0], sizes = [1, 256], strides = [1, 1]} : vector<32x256xf32> to vector<1x256xf32>
    %c1_96 = arith.constant 1 : index
    %c6656_97 = arith.constant 6656 : index
    %147 = vector.load %arg9[%c1_96, %c6656_97] : memref<2x8192xf32, #tpu.memory_space<vmem>>, vector<1x256xf32>
    tpu.vector_store %arg9[%c1_96, %c6656_97], %146 {strides = array<i32>} : memref<2x8192xf32, #tpu.memory_space<vmem>>, vector<1x256xf32>,
    %148 = vector.extract_strided_slice %93 {offsets = [27, 0], sizes = [1, 256], strides = [1, 1]} : vector<32x256xf32> to vector<1x256xf32>
    %c1_98 = arith.constant 1 : index
    %c6912_99 = arith.constant 6912 : index
    %149 = vector.load %arg9[%c1_98, %c6912_99] : memref<2x8192xf32, #tpu.memory_space<vmem>>, vector<1x256xf32>
    tpu.vector_store %arg9[%c1_98, %c6912_99], %148 {strides = array<i32>} : memref<2x8192xf32, #tpu.memory_space<vmem>>, vector<1x256xf32>,
    %150 = vector.extract_strided_slice %93 {offsets = [28, 0], sizes = [1, 256], strides = [1, 1]} : vector<32x256xf32> to vector<1x256xf32>
    %c1_100 = arith.constant 1 : index
    %c7168_101 = arith.constant 7168 : index
    %151 = vector.load %arg9[%c1_100, %c7168_101] : memref<2x8192xf32, #tpu.memory_space<vmem>>, vector<1x256xf32>
    tpu.vector_store %arg9[%c1_100, %c7168_101], %150 {strides = array<i32>} : memref<2x8192xf32, #tpu.memory_space<vmem>>, vector<1x256xf32>,
    %152 = vector.extract_strided_slice %93 {offsets = [29, 0], sizes = [1, 256], strides = [1, 1]} : vector<32x256xf32> to vector<1x256xf32>
    %c1_102 = arith.constant 1 : index
    %c7424_103 = arith.constant 7424 : index
    %153 = vector.load %arg9[%c1_102, %c7424_103] : memref<2x8192xf32, #tpu.memory_space<vmem>>, vector<1x256xf32>
    tpu.vector_store %arg9[%c1_102, %c7424_103], %152 {strides = array<i32>} : memref<2x8192xf32, #tpu.memory_space<vmem>>, vector<1x256xf32>,
    %154 = vector.extract_strided_slice %93 {offsets = [30, 0], sizes = [1, 256], strides = [1, 1]} : vector<32x256xf32> to vector<1x256xf32>
    %c1_104 = arith.constant 1 : index
    %c7680_105 = arith.constant 7680 : index
    %155 = vector.load %arg9[%c1_104, %c7680_105] : memref<2x8192xf32, #tpu.memory_space<vmem>>, vector<1x256xf32>
    tpu.vector_store %arg9[%c1_104, %c7680_105], %154 {strides = array<i32>} : memref<2x8192xf32, #tpu.memory_space<vmem>>, vector<1x256xf32>,
    %156 = vector.extract_strided_slice %93 {offsets = [31, 0], sizes = [1, 256], strides = [1, 1]} : vector<32x256xf32> to vector<1x256xf32>
    %c1_106 = arith.constant 1 : index
    %c7936_107 = arith.constant 7936 : index
    %157 = vector.load %arg9[%c1_106, %c7936_107] : memref<2x8192xf32, #tpu.memory_space<vmem>>, vector<1x256xf32>
    tpu.vector_store %arg9[%c1_106, %c7936_107], %156 {strides = array<i32>} : memref<2x8192xf32, #tpu.memory_space<vmem>>, vector<1x256xf32>,
    %c0_108 = arith.constant 0 : index
    %c0_109 = arith.constant 0 : index
    %158 = vector.load %arg9[%c0_108, %c0_109] : memref<2x8192xf32, #tpu.memory_space<vmem>>, vector<2x8192xf32>
    %c0_110 = arith.constant 0 : index
    %c0_111 = arith.constant 0 : index
    %159 = vector.load %arg4[%c0_110, %c0_111] : memref<8192x10xf32, #tpu.memory_space<vmem>>, vector<8192x10xf32>
    %cst_112 = arith.constant dense<0.000000e+00> : vector<2x10xf32>
    %160 = tpu.matmul %158, %159, %cst_112 {dimension_numbers = #tpu.dot_dimension_numbers<[1], [0], [0], [1], [0, 0, 1, 1], [], []>} : vector<2x8192xf32>, vector<8192x10xf32>, vector<2x10xf32> -> vector<2x10xf32>
    %c0_113 = arith.constant 0 : index
    %c0_114 = arith.constant 0 : index
    %161 = vector.load %arg5[%c0_113, %c0_114] : memref<1x10xf32, #tpu.memory_space<vmem>>, vector<1x10xf32>
    %162 = vector.broadcast %161 : vector<1x10xf32> to vector<2x10xf32>
    %163 = arith.addf %160, %162 : vector<2x10xf32>
    %c0_115 = arith.constant 0 : index
    %c0_116 = arith.constant 0 : index
    %164 = vector.load %arg6[%c0_115, %c0_116] : memref<10x6xf32, #tpu.memory_space<vmem>>, vector<10x6xf32>
    %cst_117 = arith.constant dense<0.000000e+00> : vector<2x6xf32>
    %165 = tpu.matmul %163, %164, %cst_117 {dimension_numbers = #tpu.dot_dimension_numbers<[1], [0], [0], [1], [0, 0, 1, 1], [], []>} : vector<2x10xf32>, vector<10x6xf32>, vector<2x6xf32> -> vector<2x6xf32>
    %c0_118 = arith.constant 0 : index
    %c0_119 = arith.constant 0 : index
    %166 = vector.load %arg7[%c0_118, %c0_119] : memref<1x6xf32, #tpu.memory_space<vmem>>, vector<1x6xf32>
    %167 = vector.broadcast %166 : vector<1x6xf32> to vector<2x6xf32>
    %168 = arith.addf %165, %167 : vector<2x6xf32>
    %c0_120 = arith.constant 0 : index
    %c0_121 = arith.constant 0 : index
    %169 = vector.load %arg8[%c0_120, %c0_121] : memref<2x16xf32, #tpu.memory_space<vmem>>, vector<2x10xf32>
    tpu.vector_store %arg8[%c0_120, %c0_121], %163 {strides = array<i32>} : memref<2x16xf32, #tpu.memory_space<vmem>>, vector<2x10xf32>,
    %c0_122 = arith.constant 0 : index
    %c10 = arith.constant 10 : index
    %170 = vector.load %arg8[%c0_122, %c10] : memref<2x16xf32, #tpu.memory_space<vmem>>, vector<2x6xf32>
    tpu.vector_store %arg8[%c0_122, %c10], %168 {strides = array<i32>} : memref<2x16xf32, #tpu.memory_space<vmem>>, vector<2x6xf32>,
    return
  }
  func.func @transform_0(%arg0: i32) -> (i32, i32, i32) {
    %c0_i32 = arith.constant 0 : i32
    %c0_i32_0 = arith.constant 0 : i32
    %c0_i32_1 = arith.constant 0 : i32
    return %arg0, %c0_i32, %c0_i32_0 : i32, i32, i32
  }
  func.func @transform_1(%arg0: i32) -> (i32, i32) {
    %c0_i32 = arith.constant 0 : i32
    %c0_i32_0 = arith.constant 0 : i32
    %c0_i32_1 = arith.constant 0 : i32
    return %c0_i32, %c0_i32_0 : i32, i32
  }
  func.func @transform_2(%arg0: i32) -> (i32, i32) {
    %c0_i32 = arith.constant 0 : i32
    %c0_i32_0 = arith.constant 0 : i32
    %c0_i32_1 = arith.constant 0 : i32
    return %c0_i32, %c0_i32_0 : i32, i32
  }
  func.func @transform_3(%arg0: i32) -> (i32, i32) {
    %c0_i32 = arith.constant 0 : i32
    %c0_i32_0 = arith.constant 0 : i32
    %c0_i32_1 = arith.constant 0 : i32
    return %c0_i32, %c0_i32_0 : i32, i32
  }
  func.func @transform_4(%arg0: i32) -> (i32, i32) {
    %c0_i32 = arith.constant 0 : i32
    %c0_i32_0 = arith.constant 0 : i32
    %c0_i32_1 = arith.constant 0 : i32
    return %c0_i32, %c0_i32_0 : i32, i32
  }
  func.func @transform_5(%arg0: i32) -> (i32, i32) {
    %c0_i32 = arith.constant 0 : i32
    %c0_i32_0 = arith.constant 0 : i32
    %c0_i32_1 = arith.constant 0 : i32
    return %c0_i32, %c0_i32_0 : i32, i32
  }
  func.func @transform_6(%arg0: i32) -> (i32, i32) {
    %c0_i32 = arith.constant 0 : i32
    %c0_i32_0 = arith.constant 0 : i32
    %c0_i32_1 = arith.constant 0 : i32
    return %c0_i32, %c0_i32_0 : i32, i32
  }
  func.func @transform_7(%arg0: i32) -> (i32, i32) {
    %c0_i32 = arith.constant 0 : i32
    %c0_i32_0 = arith.constant 0 : i32
    return %arg0, %c0_i32 : i32, i32
  }
}

</mosaic_0001>

<bundles_post_ra>
// kernel: simple_cnn_forward.1
= control target key start
LH: loop header
LB: loop body
LE: loop exit
PB: predicated region body
PF: predicated region fallthrough
CT: control target
= control target key end

     0   :  { %vm63_vm0 = vcmask 1040384   ;;  %v6512_v3 = vmov 0.0   ;;  %vm50_vm1 = vcmask 72704   ;;  %v6513_v23 = vmov 0   ;;  %s6517_s9 = smov 10   ;;  %s10348_s0 = inlined_call_operand.vmem [shape: f32[2,9,1024], index: 0, kind: input, shape index: {}]   ;;  %s10349_s1 = inlined_call_operand.vmem [shape: f32[32,9], index: 1, kind: input, shape index: {}]   ;;  %s10350_s2 = inlined_call_operand.vmem [shape: f32[32,1], index: 2, kind: input, shape index: {}]   ;;  %s10351_s3 = inlined_call_operand.vmem [shape: f32[8192,10], index: 3, kind: input, shape index: {}]   ;;  %s10352_s5 = inlined_call_operand.vmem [shape: f32[10,6], index: 5, kind: input, shape index: {}]   ;;  %s10353_s4 = inlined_call_operand.vmem [shape: f32[1,10], index: 4, kind: input, shape index: {}]   ;;  %s10354_s7 = inlined_call_operand.vmem [shape: f32[2,16], index: 7, kind: output, shape index: {}]   ;;  %s10355_s6 = inlined_call_operand.vmem [shape: f32[1,6], index: 6, kind: input, shape index: {}]  }
   0x1   :  { %v43_v0 = vld [vmem:[%s10348_s0 + $0x48] sm:$0x1]  ;;  %v45_v1 = vld [vmem:[%s10348_s0 + $0x58] sm:$0x1]  ;;  %v42_v2 = vld [vmem:[%s10348_s0 + $0x40] sm:$0x1]  ;;  %152 = vmatprep.mubr.f32.mxu0 %v6512_v3  ;;  %241 = vmatprep.mubr.f32.mxu1 %v6512_v3 }
   0x2   :  { %5290 = vmatprep.subr.msk.mxu0 %vm63_vm0, %v43_v0  ;;  %5296 = vmatprep.subr.msk.mxu1 %vm63_vm0, %v45_v1  ;;  %v44_v4 = vld [vmem:[%s10348_s0 + $0x50] sm:$0x1]  ;;  %v35_v5 = vld [vmem:[%s10348_s0 + $0x8] sm:$0xff]  ;;  %v37_v6 = vld [vmem:[%s10348_s0 + $0x18] sm:$0xff]  ;;  %vm5204_vm3 = vcmask 1041408   ;;  %vm6516_vm4 = vmmov 0  }
   0x3   :  { %5291 = vmatpush1.msk.msra.mxu0 %vm63_vm0, %v42_v2  ;;  %5297 = vmatpush1.msk.msra.mxu1 %vm63_vm0, %v44_v4  ;;  %v34_v7 = vld [vmem:[%s10348_s0] sm:$0xff]  ;;  %v36_v8 = vld [vmem:[%s10348_s0 + $0x10] sm:$0xff]  ;;  %v47_v10 = vld [vmem:[%s10348_s0 + $0x68] sm:$0x1]  ;;  %vm5278_vm5 = vcmask 74752   ;;  %vm5200_vm6 = vcmask 80896  }
   0x4   :  { %v6591_v9 = vld [vmem:[%s10349_s1] sm:$0xff]  ;;  %118 = vmatprep.subr.mxu0 %v35_v5  ;;  %207 = vmatprep.subr.mxu1 %v37_v6  ;;  %v49_v11 = vld [vmem:[%s10348_s0 + $0x78] sm:$0x1]  ;;  %v48_v13 = vld [vmem:[%s10348_s0 + $0x70] sm:$0x1]  ;;  %vm5284_vm7 = vcmask 123984  }
   0x5   :  { %119 = vmatpush1.msra.mxu0 %v34_v7  ;;  %208 = vmatpush1.msra.mxu1 %v36_v8  ;;  %v46_v12 = vld [vmem:[%s10348_s0 + $0x60] sm:$0x1]  ;;  %v6614_v14 = vld [vmem:[%s10349_s1 + $0x8] sm:$0xff]  ;;  %v41_v16 = vld [vmem:[%s10348_s0 + $0x38] sm:$0xff] }
   0x6   :  { %5292 = vmatmul.mubr.msk.f32.vlgmr.msra.gmra.mxu0 %vm50_vm1, %v6591_v9  ;;  %5298 = vmatmul.mubr.msk.f32.vlgmr.msra.gmra.mxu1 %vm50_vm1, %v6591_v9  ;;  %v39_v15 = vld [vmem:[%s10348_s0 + $0x28] sm:$0xff]  ;;  %v38_v17 = vld [vmem:[%s10348_s0 + $0x20] sm:$0xff]  ;;  %v40_v18 = vld [vmem:[%s10348_s0 + $0x30] sm:$0xff] }
   0x7   :  { %5302 = vmatprep.subr.msk.mxu0 %vm63_vm0, %v47_v10  ;;  %5308 = vmatprep.subr.msk.mxu1 %vm63_vm0, %v49_v11  ;;  %v6641_v19 = vld [vmem:[%s10349_s1 + $0x10] sm:$0xff]  ;;  %v5323_v20 = vld [vmem:[%s10348_s0 + $0xc8] sm:$0x1]  ;;  %v5325_v21 = vld [vmem:[%s10348_s0 + $0xd8] sm:$0x1] }
   0x8   :  { %5303 = vmatpush1.msk.msra.mxu0 %vm63_vm0, %v46_v12  ;;  %5309 = vmatpush1.msk.msra.mxu1 %vm63_vm0, %v48_v13  ;;  %v6658_v22 = vld [vmem:[%s10349_s1 + $0x18] sm:$0xff]  ;;  %v30_v24 = vld [vmem:[%s10350_s2] sm:$0xff]  ;;  %v32_v25 = vld [vmem:[%s10350_s2 + $0x10] sm:$0xff] }
   0x9   :  { %158 = vmatprep.mubr.f32.mxu0 %v6512_v3  ;;  %247 = vmatprep.mubr.f32.mxu1 %v6512_v3  ;;  %v5322_v26 = vld [vmem:[%s10348_s0 + $0xc0] sm:$0x1]  ;;  %v5324_v27 = vld [vmem:[%s10348_s0 + $0xd0] sm:$0x1]  ;;  %v5315_v28 = vld [vmem:[%s10348_s0 + $0x88] sm:$0xff] }
   0xa   :  { %5293 = vmatmul.mubr.msk.f32.gmra.mxu0 %vm50_vm1, %v6614_v14  ;;  %5299 = vmatmul.mubr.msk.f32.gmra.mxu1 %vm50_vm1, %v6614_v14  ;;  %v5317_v29 = vld [vmem:[%s10348_s0 + $0x98] sm:$0xff]  ;;  %v5314_v30 = vld [vmem:[%s10348_s0 + $0x80] sm:$0xff]  ;;  %v5316_v31 = vld [vmem:[%s10348_s0 + $0x90] sm:$0xff] }
   0xb   :  { %164 = vmatprep.mubr.f32.mxu0 %v6512_v3  ;;  %253 = vmatprep.mubr.f32.mxu1 %v6512_v3  ;;  %v5327_v32 = vld [vmem:[%s10348_s0 + $0xe8] sm:$0x1]  ;;  %v5329_v33 = vld [vmem:[%s10348_s0 + $0xf8] sm:$0x1]  ;;  %v5326_v36 = vld [vmem:[%s10348_s0 + $0xe0] sm:$0x1] }
   0xc   :  { %296 = vmatprep.subr.mxu0 %v39_v15  ;;  %385 = vmatprep.subr.mxu1 %v41_v16  ;;  %v31_v34 = vld [vmem:[%s10350_s2 + $0x8] sm:$0xff]  ;;  %v33_v35 = vld [vmem:[%s10350_s2 + $0x18] sm:$0xff]  ;;  %v5328_v37 = vld [vmem:[%s10348_s0 + $0xf0] sm:$0x1] }
   0xd   :  { %297 = vmatpush1.msra.mxu0 %v38_v17  ;;  %386 = vmatpush1.msra.mxu1 %v40_v18  ;;  %v5319_v38 = vld [vmem:[%s10348_s0 + $0xa8] sm:$0xff]  ;;  %v5321_v39 = vld [vmem:[%s10348_s0 + $0xb8] sm:$0xff]  ;;  %v5318_v40 = vld [vmem:[%s10348_s0 + $0xa0] sm:$0xff] }
   0xe   :  { %5294 = vmatmul.mubr.msk.f32.gmra.mxu0 %vm50_vm1, %v6641_v19  ;;  %5300 = vmatmul.mubr.msk.f32.gmra.mxu1 %vm50_vm1, %v6641_v19  ;;  %v5320_v41 = vld [vmem:[%s10348_s0 + $0xb0] sm:$0xff]  ;;  %v1599_v42 = vld [vmem:[%s10351_s3 + $0xf8] sm:$0xff]  ;;  %v1597_v48 = vld [vmem:[%s10351_s3 + $0xe8] sm:$0xff] }
   0xf   :  { %170 = vmatprep.mubr.f32.mxu0 %v6512_v3  ;;  %259 = vmatprep.mubr.f32.mxu1 %v6512_v3  ;;  %v1583_v43 = vld [vmem:[%s10351_s3 + $0x78] sm:$0xff]  ;;  %v1598_v44 = vld [vmem:[%s10351_s3 + $0xf0] sm:$0xff]  ;;  %v1581_v50 = vld [vmem:[%s10351_s3 + $0x68] sm:$0xff] }
  0x10   :  { %5330 = vmatprep.subr.msk.mxu0 %vm63_vm0, %v5323_v20  ;;  %5336 = vmatprep.subr.msk.mxu1 %vm63_vm0, %v5325_v21  ;;  %v1631_v45 = vld [vmem:[%s10351_s3 + $0x1f8] sm:$0xff]  ;;  %v1582_v46 = vld [vmem:[%s10351_s3 + $0x70] sm:$0xff]  ;;  %v1596_v52 = vld [vmem:[%s10351_s3 + $0xe0] sm:$0xff] }
  0x11   :  { %6494 = vset.pattern.permute.xlu0 %v6513_v23  ;;  %6495 = vset.pattern.permute.xlu1 %v6513_v23  ;;  %v1615_v47 = vld [vmem:[%s10351_s3 + $0x178] sm:$0xff]  ;;  %v1630_v49 = vld [vmem:[%s10351_s3 + $0x1f0] sm:$0xff]  ;;  %v1629_v53 = vld [vmem:[%s10351_s3 + $0x1e8] sm:$0xff] }
  0x12   :  { %5295 = vmatmul.mubr.msk.f32.gmra.mxu0 %vm50_vm1, %v6658_v22  ;;  %5301 = vmatmul.mubr.msk.f32.gmra.mxu1 %vm50_vm1, %v6658_v22  ;;  %v1614_v51 = vld [vmem:[%s10351_s3 + $0x170] sm:$0xff]  ;;  %v1580_v54 = vld [vmem:[%s10351_s3 + $0x60] sm:$0xff]  ;;  %v1613_v55 = vld [vmem:[%s10351_s3 + $0x168] sm:$0xff] }
  0x13   :  { %330 = vmatprep.mubr.f32.mxu0 %v6512_v3  ;;  %419 = vmatprep.mubr.f32.mxu1 %v6512_v3  ;;  %v1595_v56 = vld [vmem:[%s10351_s3 + $0xd8] sm:$0xff]  ;;  %v1628_v57 = vld [vmem:[%s10351_s3 + $0x1e0] sm:$0xff]  ;;  %v1594_v60 = vld [vmem:[%s10351_s3 + $0xd0] sm:$0xff] }
  0x14   :  { %470 = vperm.xlu0 %6494, %v30_v24   ;;  %480 = vperm.xlu1 %6495, %v32_v25   ;;  %v1579_v58 = vld [vmem:[%s10351_s3 + $0x58] sm:$0xff]  ;;  %v1612_v59 = vld [vmem:[%s10351_s3 + $0x160] sm:$0xff]  ;;  %v1578_v62 = vld [vmem:[%s10351_s3 + $0x50] sm:$0xff] }
  0x15   :  { %v1627_v61 = vld [vmem:[%s10351_s3 + $0x1d8] sm:$0xff]  ;;  %v1593_v0 = vld [vmem:[%s10351_s3 + $0xc8] sm:$0xff]  ;;  %v1626_v1 = vld [vmem:[%s10351_s3 + $0x1d0] sm:$0xff] }
  0x16   :  { %5304 = vmatmul.mubr.msk.f32.vlgmr.msra.gmra.mxu0 %vm50_vm1, %v6591_v9  ;;  %5310 = vmatmul.mubr.msk.f32.vlgmr.msra.gmra.mxu1 %vm50_vm1, %v6591_v9  ;;  %v1611_v63 = vld [vmem:[%s10351_s3 + $0x158] sm:$0xff]  ;;  %v1577_v2 = vld [vmem:[%s10351_s3 + $0x48] sm:$0xff]  ;;  %v1610_v4 = vld [vmem:[%s10351_s3 + $0x150] sm:$0xff] }
  0x17   :  { %5331 = vmatpush1.msk.msra.mxu0 %vm63_vm0, %v5322_v26  ;;  %5337 = vmatpush1.msk.msra.mxu1 %vm63_vm0, %v5324_v27  ;;  %v1592_v5 = vld [vmem:[%s10351_s3 + $0xc0] sm:$0xff]  ;;  %v1625_v6 = vld [vmem:[%s10351_s3 + $0x1c8] sm:$0xff]  ;;  %v1575_v11 = vld [vmem:[%s10351_s3 + $0x38] sm:$0xff] }
  0x18   :  { %336 = vmatprep.mubr.f32.mxu0 %v6512_v3  ;;  %425 = vmatprep.mubr.f32.mxu1 %v6512_v3  ;;  %v1576_v7 = vld [vmem:[%s10351_s3 + $0x40] sm:$0xff]  ;;  %v1609_v8 = vld [vmem:[%s10351_s3 + $0x148] sm:$0xff]  ;;  %v1590_v13 = vld [vmem:[%s10351_s3 + $0xb0] sm:$0xff] }
  0x19   :  { %882 = vmatprep.subr.mxu0 %v5315_v28  ;;  %971 = vmatprep.subr.mxu1 %v5317_v29  ;;  %v1624_v10 = vld [vmem:[%s10351_s3 + $0x1c0] sm:$0xff]  ;;  %v1574_v15 = vld [vmem:[%s10351_s3 + $0x30] sm:$0xff]  ;;  %v1607_v16 = vld [vmem:[%s10351_s3 + $0x138] sm:$0xff] }
  0x1a   :  { %5305 = vmatmul.mubr.msk.f32.gmra.mxu0 %vm50_vm1, %v6614_v14  ;;  %5311 = vmatmul.mubr.msk.f32.gmra.mxu1 %vm50_vm1, %v6614_v14  ;;  %v1608_v12 = vld [vmem:[%s10351_s3 + $0x140] sm:$0xff]  ;;  %v1589_v17 = vld [vmem:[%s10351_s3 + $0xa8] sm:$0xff]  ;;  %v1622_v18 = vld [vmem:[%s10351_s3 + $0x1b0] sm:$0xff] }
  0x1b   :  { %342 = vmatprep.mubr.f32.mxu0 %v6512_v3  ;;  %431 = vmatprep.mubr.f32.mxu1 %v6512_v3  ;;  %v1606_v20 = vld [vmem:[%s10351_s3 + $0x130] sm:$0xff]  ;;  %v1588_v21 = vld [vmem:[%s10351_s3 + $0xa0] sm:$0xff]  ;;  %v1605_v24 = vld [vmem:[%s10351_s3 + $0x128] sm:$0xff] }
  0x1c   :  { %883 = vmatpush1.msra.mxu0 %v5314_v30  ;;  %972 = vmatpush1.msra.mxu1 %v5316_v31  ;;  %v1572_v23 = vld [vmem:[%s10351_s3 + $0x20] sm:$0xff]  ;;  %v1587_v25 = vld [vmem:[%s10351_s3 + $0x98] sm:$0xff]  ;;  %v1586_v29 = vld [vmem:[%s10351_s3 + $0x90] sm:$0xff] }
  0x1d   :  { %5342 = vmatprep.subr.msk.mxu0 %vm63_vm0, %v5327_v32  ;;  %5348 = vmatprep.subr.msk.mxu1 %vm63_vm0, %v5329_v33  ;;  %v1620_v26 = vld [vmem:[%s10351_s3 + $0x1a0] sm:$0xff]  ;;  %v1571_v27 = vld [vmem:[%s10351_s3 + $0x18] sm:$0xff]  ;;  %v1570_v31 = vld [vmem:[%s10351_s3 + $0x10] sm:$0xff] }
  0x1e   :  { %5306 = vmatmul.mubr.msk.f32.gmra.mxu0 %vm50_vm1, %v6641_v19  ;;  %5312 = vmatmul.mubr.msk.f32.gmra.mxu1 %vm50_vm1, %v6641_v19  ;;  %v1604_v28 = vld [vmem:[%s10351_s3 + $0x120] sm:$0xff]  ;;  %v1619_v30 = vld [vmem:[%s10351_s3 + $0x198] sm:$0xff]  ;;  %v1585_v33 = vld [vmem:[%s10351_s3 + $0x88] sm:$0xff] }
  0x1f   :  { %348 = vmatprep.mubr.f32.mxu0 %v6512_v3  ;;  %437 = vmatprep.mubr.f32.mxu1 %v6512_v3  ;;  %v1603_v32 = vld [vmem:[%s10351_s3 + $0x118] sm:$0xff] }
  0x20   :  { %475 = vperm.xlu0 %6494, %v31_v34   ;;  %485 = vperm.xlu1 %6495, %v33_v35   ;;  %v1618_v34 = vld [vmem:[%s10351_s3 + $0x190] sm:$0xff]  ;;  %v1569_v35 = vld [vmem:[%s10351_s3 + $0x8] sm:$0xff] }
  0x22   :  { %5307 = vmatmul.mubr.msk.f32.gmra.mxu0 %vm50_vm1, %v6658_v22  ;;  %5313 = vmatmul.mubr.msk.f32.gmra.mxu1 %vm50_vm1, %v6658_v22 }
  0x23   :  { %916 = vmatprep.mubr.f32.mxu0 %v6512_v3  ;;  %1005 = vmatprep.mubr.f32.mxu1 %v6512_v3 }
  0x26   :  { %5332 = vmatmul.mubr.msk.f32.vlgmr.msra.gmra.mxu0 %vm50_vm1, %v6591_v9  ;;  %5338 = vmatmul.mubr.msk.f32.vlgmr.msra.gmra.mxu1 %vm50_vm1, %v6591_v9 }
  0x27   :  { %5343 = vmatpush1.msk.msra.mxu0 %vm63_vm0, %v5326_v36  ;;  %5349 = vmatpush1.msk.msra.mxu1 %vm63_vm0, %v5328_v37  ;;  %v1602_v36 = vld [vmem:[%s10351_s3 + $0x110] sm:$0xff]  ;;  %v1584_v37 = vld [vmem:[%s10351_s3 + $0x80] sm:$0xff] }
  0x28   :  { %922 = vmatprep.mubr.f32.mxu0 %v6512_v3  ;;  %1011 = vmatprep.mubr.f32.mxu1 %v6512_v3 }
  0x29   :  { %1060 = vmatprep.subr.mxu0 %v5319_v38  ;;  %1149 = vmatprep.subr.mxu1 %v5321_v39  ;;  %v1617_v38 = vld [vmem:[%s10351_s3 + $0x188] sm:$0xff]  ;;  %v1568_v39 = vld [vmem:[%s10351_s3] sm:$0xff] }
  0x2a   :  { %5333 = vmatmul.mubr.msk.f32.gmra.mxu0 %vm50_vm1, %v6614_v14  ;;  %5339 = vmatmul.mubr.msk.f32.gmra.mxu1 %vm50_vm1, %v6614_v14 }
  0x2b   :  { %928 = vmatprep.mubr.f32.mxu0 %v6512_v3  ;;  %1017 = vmatprep.mubr.f32.mxu1 %v6512_v3 }
  0x2c   :  { %1061 = vmatpush1.msra.mxu0 %v5318_v40  ;;  %1150 = vmatpush1.msra.mxu1 %v5320_v41  ;;  %v1601_v40 = vld [vmem:[%s10351_s3 + $0x108] sm:$0xff]  ;;  %v1616_v41 = vld [vmem:[%s10351_s3 + $0x180] sm:$0xff] }
  0x2d   :  { %5358 = vmatprep.subr.mxu0 %v1599_v42  ;;  %5393 = vmatprep.subr.mxu1 %v1631_v45  ;;  %v1663_v42 = vld [vmem:[%s10351_s3 + $0x2f8] sm:$0xff] }
  0x2e   :  { %5334 = vmatmul.mubr.msk.f32.gmra.mxu0 %vm50_vm1, %v6641_v19  ;;  %5340 = vmatmul.mubr.msk.f32.gmra.mxu1 %vm50_vm1, %v6641_v19 }
  0x2f   :  { %934 = vmatprep.mubr.f32.mxu0 %v6512_v3  ;;  %1023 = vmatprep.mubr.f32.mxu1 %v6512_v3 }
  0x32   :  { %5335 = vmatmul.mubr.msk.f32.gmra.mxu0 %vm50_vm1, %v6658_v22  ;;  %5341 = vmatmul.mubr.msk.f32.gmra.mxu1 %vm50_vm1, %v6658_v22 }
  0x33   :  { %1094 = vmatprep.mubr.f32.mxu0 %v6512_v3  ;;  %1183 = vmatprep.mubr.f32.mxu1 %v6512_v3 }
  0x36   :  { %5344 = vmatmul.mubr.msk.f32.vlgmr.msra.gmra.mxu0 %vm50_vm1, %v6591_v9  ;;  %5350 = vmatmul.mubr.msk.f32.vlgmr.msra.gmra.mxu1 %vm50_vm1, %v6591_v9  ;;  %v1591_v9 = vld [vmem:[%s10351_s3 + $0xb8] sm:$0xff] }
  0x37   :  { %1100 = vmatprep.mubr.f32.mxu0 %v6512_v3  ;;  %1189 = vmatprep.mubr.f32.mxu1 %v6512_v3 }
  0x38   :  { %5359 = vmatpush3.msra.mxu0 %v1583_v43  ;;  %5394 = vmatpush3.msra.mxu1 %v1615_v47  ;;  %v1600_v43 = vld [vmem:[%s10351_s3 + $0x100] sm:$0xff] }
  0x39   :  { %5360 = vmatprep.subr.mxu0 %v1598_v44  ;;  %5395 = vmatprep.subr.mxu1 %v1630_v49  ;;  %v1695_v44 = vld [vmem:[%s10351_s3 + $0x3f8] sm:$0xff] }
  0x3a   :  { %5345 = vmatmul.mubr.msk.f32.gmra.mxu0 %vm50_vm1, %v6614_v14  ;;  %5351 = vmatmul.mubr.msk.f32.gmra.mxu1 %vm50_vm1, %v6614_v14  ;;  %v1623_v14 = vld [vmem:[%s10351_s3 + $0x1b8] sm:$0xff] }
  0x3b   :  { %1106 = vmatprep.mubr.f32.mxu0 %v6512_v3  ;;  %1195 = vmatprep.mubr.f32.mxu1 %v6512_v3 }
  0x3c   :  { %5361 = vmatpush3.msra.mxu0 %v1582_v46  ;;  %5396 = vmatpush3.msra.mxu1 %v1614_v51 }
  0x3d   :  { %5362 = vmatprep.subr.mxu0 %v1597_v48  ;;  %5397 = vmatprep.subr.mxu1 %v1629_v53 }
  0x3e   :  { %5346 = vmatmul.mubr.msk.f32.gmra.mxu0 %vm50_vm1, %v6641_v19  ;;  %5352 = vmatmul.mubr.msk.f32.gmra.mxu1 %vm50_vm1, %v6641_v19  ;;  %v1573_v19 = vld [vmem:[%s10351_s3 + $0x28] sm:$0xff] }
  0x3f   :  { %1112 = vmatprep.mubr.f32.mxu0 %v6512_v3  ;;  %1201 = vmatprep.mubr.f32.mxu1 %v6512_v3 }
  0x40   :  { %5363 = vmatpush3.msra.mxu0 %v1581_v50  ;;  %5398 = vmatpush3.msra.mxu1 %v1613_v55 }
  0x41   :  { %5364 = vmatprep.subr.mxu0 %v1596_v52  ;;  %5399 = vmatprep.subr.mxu1 %v1628_v57 }
  0x42   :  { %5347 = vmatmul.mubr.msk.f32.gmra.mxu0 %vm50_vm1, %v6658_v22  ;;  %5353 = vmatmul.mubr.msk.f32.gmra.mxu1 %vm50_vm1, %v6658_v22  ;;  %v1621_v22 = vld [vmem:[%s10351_s3 + $0x1a8] sm:$0xff] }
  0x43   :  { %5365 = vmatpush3.msra.mxu0 %v1580_v54  ;;  %5400 = vmatpush3.msra.mxu1 %v1612_v59 }
  0x44   :  { %5366 = vmatprep.subr.mxu0 %v1595_v56  ;;  %5401 = vmatprep.subr.mxu1 %v1627_v61 }
  0x45   :  { %5367 = vmatpush3.msra.mxu0 %v1579_v58  ;;  %5402 = vmatpush3.msra.mxu1 %v1611_v63  ;;  %v6514_v63 = vmov 1966171168  }
  0x46   :  { %5368 = vmatprep.subr.mxu0 %v1594_v60  ;;  %5403 = vmatprep.subr.mxu1 %v1626_v1  ;;  %v510_v1 = vlaneseq }
  0x47   :  { %5369 = vmatpush3.msra.mxu0 %v1578_v62  ;;  %5404 = vmatpush3.msra.mxu1 %v1610_v4 }
  0x48   :  { %5370 = vmatprep.subr.mxu0 %v1593_v0  ;;  %5405 = vmatprep.subr.mxu1 %v1625_v6  ;;  %v508_v0 = vunpack.c.l.s4 %v6514_v63  ;;  %vm7019_vm2 = vcmp.lt.s32.totalorder %v510_v1, 256 }
  0x49   :  { %5371 = vmatpush3.msra.mxu0 %v1577_v2  ;;  %5406 = vmatpush3.msra.mxu1 %v1609_v8 }
  0x4a   :  { %5372 = vmatprep.subr.mxu0 %v1592_v5  ;;  %5407 = vmatprep.subr.mxu1 %v1624_v10 }
  0x4b   :  { %5373 = vmatpush3.msra.mxu0 %v1576_v7  ;;  %5408 = vmatpush3.msra.mxu1 %v1608_v12  ;;  %v7006_v12 = vshrl.u32 %v510_v1, 7 }
  0x4c   :  { %5374 = vmatprep.subr.mxu0 %v1591_v9  ;;  %5409 = vmatprep.subr.mxu1 %v1623_v14 }
  0x4d   :  { %5375 = vmatpush3.msra.mxu0 %v1575_v11  ;;  %5410 = vmatpush3.msra.mxu1 %v1607_v16  ;;  %v509_v11 = vunpack.c.0.s8 %v508_v0 }
  0x4e   :  { %5376 = vmatprep.subr.mxu0 %v1590_v13  ;;  %5411 = vmatprep.subr.mxu1 %v1622_v18 }
  0x4f   :  { %5377 = vmatpush3.msra.mxu0 %v1574_v15  ;;  %5412 = vmatpush3.msra.mxu1 %v1606_v20 }
  0x50   :  { %5378 = vmatprep.subr.mxu0 %v1589_v17  ;;  %5413 = vmatprep.subr.mxu1 %v1621_v22 }
  0x51   :  { %5379 = vmatpush3.msra.mxu0 %v1573_v19  ;;  %5414 = vmatpush3.msra.mxu1 %v1605_v24 }
  0x52   :  { %5380 = vmatprep.subr.mxu0 %v1588_v21  ;;  %5415 = vmatprep.subr.mxu1 %v1620_v26  ;;  %v7013_v26 = vsub.s32 %v509_v11, %v7006_v12 }
  0x53   :  { %5381 = vmatpush3.msra.mxu0 %v1572_v23  ;;  %5416 = vmatpush3.msra.mxu1 %v1604_v28 }
  0x54   :  { %5382 = vmatprep.subr.mxu0 %v1587_v25  ;;  %5417 = vmatprep.subr.mxu1 %v1619_v30 }
  0x55   :  { %5383 = vmatpush3.msra.mxu0 %v1571_v27  ;;  %5418 = vmatpush3.msra.mxu1 %v1603_v32 }
  0x56   :  { %5384 = vmatprep.subr.mxu0 %v1586_v29  ;;  %5419 = vmatprep.subr.mxu1 %v1618_v34 }
  0x57   :  { %5385 = vmatpush3.msra.mxu0 %v1570_v31  ;;  %5420 = vmatpush3.msra.mxu1 %v1602_v36 }
  0x58   :  { %5386 = vmatprep.subr.mxu0 %v1585_v33  ;;  %5421 = vmatprep.subr.mxu1 %v1617_v38 }
  0x59   :  { %5387 = vmatpush3.msra.mxu0 %v1569_v35  ;;  %5422 = vmatpush3.msra.mxu1 %v1601_v40 }
  0x5a   :  { %5388 = vmatprep.subr.mxu0 %v1584_v37  ;;  %5423 = vmatprep.subr.mxu1 %v1616_v41 }
  0x5b   :  { %5389 = vmatpush3.msra.mxu0 %v1568_v39  ;;  %5424 = vmatpush3.msra.mxu1 %v1600_v43 }
  0x5c   :  { %5428 = vmatprep.subr.mxu0 %v1663_v42  ;;  %5463 = vmatprep.subr.mxu1 %v1695_v44  ;;  %v1659_v42 = vld [vmem:[%s10351_s3 + $0x2d8] sm:$0xff] }
  0x8f   :  { %v7004_v5 = vpop.permute.xlu0 %470  ;;  %v7017_v40 = vpop.permute.xlu1 %480 }
  0x9b   :  { %v7010_v25 = vpop.permute.xlu0 %475 }
  0xc6   :  { %v154_v45 = vpop.f32.mrf.mxu0  ;;  %v243_v46 = vpop.f32.mrf.mxu1 }
  0xc7   :  { %v444_v2 = vmax.f32 %v154_v45, %v243_v46 }
  0xc8   :  { %v156_v47 = vpop.f32.mrf.mxu0  ;;  %v245_v48 = vpop.f32.mrf.mxu1 }
  0xc9   :  { %v445_v8 = vmax.f32 %v156_v47, %v245_v48 }
  0xca   :  { %v160_v49 = vpop.f32.mrf.mxu0  ;;  %v249_v50 = vpop.f32.mrf.mxu1 }
  0xcb   :  { %v446_v15 = vmax.f32 %v160_v49, %v249_v50 }
  0xcc   :  { %v162_v51 = vpop.f32.mrf.mxu0  ;;  %v251_v52 = vpop.f32.mrf.mxu1 }
  0xcd   :  { %v447_v21 = vmax.f32 %v162_v51, %v251_v52 }
  0xce   :  { %v166_v53 = vpop.f32.mrf.mxu0  ;;  %v255_v54 = vpop.f32.mrf.mxu1 }
  0xcf   :  { %v448_v33 = vmax.f32 %v166_v53, %v255_v54 }
  0xd0   :  { %v168_v55 = vpop.f32.mrf.mxu0  ;;  %v257_v56 = vpop.f32.mrf.mxu1 }
  0xd1   :  { %v449_v41 = vmax.f32 %v168_v55, %v257_v56 }
  0xd2   :  { %v6996_v57 = vpop.f32.mrf.mxu0  ;;  %v6998_v58 = vpop.f32.mrf.mxu1 }
  0xd3   :  { %v450_v47 = vmax.f32 %v6996_v57, %v6998_v58 }
  0xd4   :  { %v7000_v59 = vpop.f32.mrf.mxu0  ;;  %v7002_v60 = vpop.f32.mrf.mxu1 }
  0xd5   :  { %v451_v57 = vmax.f32 %v7000_v59, %v7002_v60  ;;  %v7043_v60 = vpop.permute.xlu1 %485 }
  0xd6   :  { %v332_v61 = vpop.f32.mrf.mxu0  ;;  %v421_v62 = vpop.f32.mrf.mxu1 }
  0xd7   :  { %v452_v4 = vmax.f32 %v332_v61, %v421_v62 }
  0xd8   :  { %v334_v6 = vpop.f32.mrf.mxu0  ;;  %v423_v7 = vpop.f32.mrf.mxu1 }
  0xd9   :  { %v460_v9 = vmax.f32 %v444_v2, %v452_v4  ;;  %v453_v10 = vmax.f32 %v334_v6, %v423_v7 }
  0xda   :  { %v338_v13 = vpop.f32.mrf.mxu0  ;;  %v427_v14 = vpop.f32.mrf.mxu1 }
  0xdb   :  { %v461_v16 = vmax.f32 %v445_v8, %v453_v10  ;;  %v488_v17 = vadd.f32 %v7004_v5, %v460_v9  ;;  %v454_v18 = vmax.f32 %v338_v13, %v427_v14 }
  0xdc   :  { %v340_v19 = vpop.f32.mrf.mxu0  ;;  %v429_v20 = vpop.f32.mrf.mxu1 }
  0xdd   :  { %v489_v22 = vadd.f32 %v7004_v5, %v461_v16  ;;  %v462_v23 = vmax.f32 %v446_v15, %v454_v18  ;;  %v455_v24 = vmax.f32 %v340_v19, %v429_v20  ;;  %v496_v29 = vmax.f32 %v488_v17, 0.0 }
  0xde   :  { %v344_v27 = vpop.f32.mrf.mxu0  ;;  %v433_v28 = vpop.f32.mrf.mxu1 }
  0xdf   :  { %v497_v30 = vmax.f32 %v489_v22, 0.0  ;;  %v463_v31 = vmax.f32 %v447_v21, %v455_v24  ;;  %v456_v32 = vmax.f32 %v344_v27, %v433_v28  ;;  %v490_v34 = vadd.f32 %v7010_v25, %v462_v23 }
  0xe0   :  { %v346_v35 = vpop.f32.mrf.mxu0  ;;  %v435_v36 = vpop.f32.mrf.mxu1 }
  0xe1   :  { %v506_v37 = vcombine.low %v496_v29, %v497_v30  ;;  %v546_v38 = vcombine.high %v496_v29, %v497_v30  ;;  %v491_v39 = vadd.f32 %v7010_v25, %v463_v31  ;;  %v464_v43 = vmax.f32 %v448_v33, %v456_v32 }
  0xe2   :  { %v457_v44 = vmax.f32 %v346_v35, %v435_v36  ;;  %v350_v45 = vpop.f32.mrf.mxu0  ;;  %v439_v46 = vpop.f32.mrf.mxu1  ;;  %v498_v51 = vmax.f32 %v490_v34, 0.0 }
  0xe3   :  { %v513_v48 = vrot.slane %v506_v37, %v7013_v26  ;;  %v553_v49 = vrot.slane %v546_v38, %v7013_v26  ;;  %v499_v50 = vmax.f32 %v491_v39, 0.0  ;;  %v492_v53 = vadd.f32 %v7017_v40, %v464_v43 }
  0xe4   :  { %v465_v52 = vmax.f32 %v449_v41, %v457_v44  ;;  %v458_v54 = vmax.f32 %v350_v45, %v439_v46  ;;  %v352_v55 = vpop.f32.mrf.mxu0  ;;  %v441_v56 = vpop.f32.mrf.mxu1 }
  0xe5   :  { %v520_v61 = vrot.slane %v513_v48, %v7013_v26  ;;  %v527_v62 = vcombine.high %v513_v48, %v513_v48  ;;  %v560_v63 = vrot.slane %v553_v49, %v7013_v26  ;;  %v564_v0 = vcombine.high %v553_v49, %v553_v49 }
  0xe6   :  { %v585_v58 = vcombine.low %v498_v51, %v499_v50  ;;  %v622_v1 = vcombine.high %v498_v51, %v499_v50  ;;  %v493_v2 = vadd.f32 %v7017_v40, %v465_v52  ;;  %v7033_v4 = vpop.f32.mrf.mxu0  ;;  %v7035_v6 = vpop.f32.mrf.mxu1  ;;  %v466_v14 = vmax.f32 %v450_v47, %v458_v54 }
  0xe7   :  { %526 = vst.msk [vmem:[#allocation2] ss:$2 sm:$0x3] %vm7019_vm2, %v520_v61  ;;  %v534_v7 = vrot.slane %v527_v62, %v7013_v26  ;;  %v538_v8 = vcombine.high %v520_v61, %v520_v61  ;;  %563 = vst.msk [vmem:[#allocation2 + $0x10] ss:$2 sm:$0x3] %vm7019_vm2, %v560_v63  ;;  %v571_v9 = vrot.slane %v564_v0, %v7013_v26 }
  0xe8   :  { %v575_v59 = vcombine.high %v560_v63, %v560_v63  ;;  %v592_v10 = vrot.slane %v585_v58, %v7013_v26  ;;  %v629_v11 = vrot.slane %v622_v1, %v7013_v26  ;;  %v501_v13 = vmax.f32 %v493_v2, 0.0  ;;  %v7047_v15 = vpop.f32.mrf.mxu0  ;;  %v7049_v16 = vpop.f32.mrf.mxu1 }
  0xe9   :  { %537 = vst.msk [vmem:[#allocation2 + $0x4] ss:$2 sm:$0x3] %vm7019_vm2, %v534_v7  ;;  %541 = vst.msk [vmem:[#allocation2 + $0x8] ss:$2 sm:$0x3] %vm7019_vm2, %v538_v8  ;;  %v542_v17 = vcombine.high %v534_v7, %v534_v7  ;;  %v579_v18 = vcombine.high %v571_v9, %v571_v9  ;;  %v459_v20 = vmax.f32 %v352_v55, %v441_v56 }
  0xea   :  { %574 = vst.msk [vmem:[#allocation2 + $0x14] ss:$2 sm:$0x3] %vm7019_vm2, %v571_v9  ;;  %578 = vst.msk [vmem:[#allocation2 + $0x18] ss:$2 sm:$0x3] %vm7019_vm2, %v575_v59  ;;  %v599_v21 = vrot.slane %v592_v10, %v7013_v26  ;;  %v603_v22 = vcombine.high %v592_v10, %v592_v10  ;;  %v636_v23 = vrot.slane %v629_v11, %v7013_v26  ;;  %v7061_v27 = vpop.f32.mrf.mxu0  ;;  %v7063_v28 = vpop.f32.mrf.mxu1 }
  0xeb   :  { %v500_v19 = vmax.f32 %v492_v53, 0.0  ;;  %v640_v24 = vcombine.high %v629_v11, %v629_v11  ;;  %545 = vst.msk [vmem:[#allocation2 + $0xc] ss:$2 sm:$0x3] %vm7019_vm2, %v542_v17  ;;  %v467_v31 = vmax.f32 %v451_v57, %v459_v20  ;;  %v494_v32 = vadd.f32 %v7043_v60, %v466_v14 }
  0xec   :  { %582 = vst.msk [vmem:[#allocation2 + $0x1c] ss:$2 sm:$0x3] %vm7019_vm2, %v579_v18  ;;  %602 = vst.msk [vmem:[#allocation2 + $0x20] ss:$2 sm:$0x3] %vm7019_vm2, %v599_v21  ;;  %v610_v33 = vrot.slane %v603_v22, %v7013_v26  ;;  %v614_v34 = vcombine.high %v599_v21, %v599_v21  ;;  %v651_v36 = vcombine.high %v636_v23, %v636_v23  ;;  %v7076_v37 = vpop.f32.mrf.mxu0  ;;  %v7078_v38 = vpop.f32.mrf.mxu1 }
  0xed   :  { %v661_v29 = vcombine.low %v500_v19, %v501_v13  ;;  %v698_v30 = vcombine.high %v500_v19, %v501_v13  ;;  %639 = vst.msk [vmem:[#allocation2 + $0x30] ss:$2 sm:$0x3] %vm7019_vm2, %v636_v23  ;;  %v647_v35 = vrot.slane %v640_v24, %v7013_v26  ;;  %v495_v43 = vadd.f32 %v7043_v60, %v467_v31 }
  0xee   :  { %613 = vst.msk [vmem:[#allocation2 + $0x24] ss:$2 sm:$0x3] %vm7019_vm2, %v610_v33  ;;  %617 = vst.msk [vmem:[#allocation2 + $0x28] ss:$2 sm:$0x3] %vm7019_vm2, %v614_v34  ;;  %v618_v44 = vcombine.high %v610_v33, %v610_v33  ;;  %v7091_v46 = vpop.f32.mrf.mxu0  ;;  %v7093_v47 = vpop.f32.mrf.mxu1  ;;  %v1208_v20 = vmax.f32 %v7033_v4, %v7035_v6 }
  0xef   :  { %v668_v39 = vrot.slane %v661_v29, %v7013_v26  ;;  %v705_v41 = vrot.slane %v698_v30, %v7013_v26  ;;  %650 = vst.msk [vmem:[#allocation2 + $0x34] ss:$2 sm:$0x3] %vm7019_vm2, %v647_v35  ;;  %654 = vst.msk [vmem:[#allocation2 + $0x38] ss:$2 sm:$0x3] %vm7019_vm2, %v651_v36  ;;  %v655_v45 = vcombine.high %v647_v35, %v647_v35 }
  0xf0   :  { %621 = vst.msk [vmem:[#allocation2 + $0x2c] ss:$2 sm:$0x3] %vm7019_vm2, %v618_v44  ;;  %v502_v52 = vmax.f32 %v494_v32, 0.0  ;;  %v503_v53 = vmax.f32 %v495_v43, 0.0  ;;  %v7101_v54 = vpop.f32.mrf.mxu0  ;;  %v7103_v55 = vpop.f32.mrf.mxu1  ;;  %v1209_v32 = vmax.f32 %v7047_v15, %v7049_v16  ;;  %v1210_v15 = vmax.f32 %v7061_v27, %v7063_v28 }
  0xf1   :  { %v675_v48 = vrot.slane %v668_v39, %v7013_v26  ;;  %v679_v49 = vcombine.high %v668_v39, %v668_v39  ;;  %v712_v50 = vrot.slane %v705_v41, %v7013_v26  ;;  %v716_v51 = vcombine.high %v705_v41, %v705_v41  ;;  %658 = vst.msk [vmem:[#allocation2 + $0x3c] ss:$2 sm:$0x3] %vm7019_vm2, %v655_v45 }
  0xf2   :  { %v737_v0 = vcombine.low %v502_v52, %v503_v53  ;;  %v774_v57 = vcombine.high %v502_v52, %v503_v53  ;;  %v7111_v58 = vpop.f32.mrf.mxu0  ;;  %v7113_v1 = vpop.f32.mrf.mxu1  ;;  %v1211_v45 = vmax.f32 %v7076_v37, %v7078_v38 }
  0xf3   :  { %678 = vst.msk [vmem:[#allocation2 + $0x40] ss:$2 sm:$0x3] %vm7019_vm2, %v675_v48  ;;  %v686_v56 = vrot.slane %v679_v49, %v7013_v26  ;;  %v690_v61 = vcombine.high %v675_v48, %v675_v48  ;;  %715 = vst.msk [vmem:[#allocation2 + $0x50] ss:$2 sm:$0x3] %vm7019_vm2, %v712_v50  ;;  %v723_v62 = vrot.slane %v716_v51, %v7013_v26 }
  0xf4   :  { %v727_v63 = vcombine.high %v712_v50, %v712_v50  ;;  %v744_v8 = vrot.slane %v737_v0, %v7013_v26  ;;  %v781_v9 = vrot.slane %v774_v57, %v7013_v26  ;;  %v7125_v59 = vpop.f32.mrf.mxu0  ;;  %v7127_v10 = vpop.f32.mrf.mxu1  ;;  %v6515_v51 = vmov 1983009808  }
  0xf5   :  { %689 = vst.msk [vmem:[#allocation2 + $0x44] ss:$2 sm:$0x3] %vm7019_vm2, %v686_v56  ;;  %693 = vst.msk [vmem:[#allocation2 + $0x48] ss:$2 sm:$0x3] %vm7019_vm2, %v690_v61  ;;  %v694_v2 = vcombine.high %v686_v56, %v686_v56  ;;  %v731_v7 = vcombine.high %v723_v62, %v723_v62  ;;  %v7163_v52 = vunpack.c.l.s4 %v6515_v51 }
  0xf6   :  { %726 = vst.msk [vmem:[#allocation2 + $0x54] ss:$2 sm:$0x3] %vm7019_vm2, %v723_v62  ;;  %730 = vst.msk [vmem:[#allocation2 + $0x58] ss:$2 sm:$0x3] %vm7019_vm2, %v727_v63  ;;  %v751_v11 = vrot.slane %v744_v8, %v7013_v26  ;;  %v755_v13 = vcombine.high %v744_v8, %v744_v8  ;;  %v788_v14 = vrot.slane %v781_v9, %v7013_v26  ;;  %v1096_v18 = vpop.f32.mrf.mxu0  ;;  %v1185_v19 = vpop.f32.mrf.mxu1 }
  0xf7   :  { %697 = vst.msk [vmem:[#allocation2 + $0x4c] ss:$2 sm:$0x3] %vm7019_vm2, %v694_v2  ;;  %734 = vst.msk [vmem:[#allocation2 + $0x5c] ss:$2 sm:$0x3] %vm7019_vm2, %v731_v7  ;;  %v792_v17 = vcombine.high %v781_v9, %v781_v9  ;;  %v1216_v21 = vmax.f32 %v1096_v18, %v1185_v19  ;;  %v1212_v63 = vmax.f32 %v7091_v46, %v7093_v47 }
  0xf8   :  { %754 = vst.msk [vmem:[#allocation2 + $0x60] ss:$2 sm:$0x3] %vm7019_vm2, %v751_v11  ;;  %v762_v22 = vrot.slane %v755_v13, %v7013_v26  ;;  %v766_v23 = vcombine.high %v751_v11, %v751_v11  ;;  %791 = vst.msk [vmem:[#allocation2 + $0x70] ss:$2 sm:$0x3] %vm7019_vm2, %v788_v14  ;;  %v803_v29 = vcombine.high %v788_v14, %v788_v14  ;;  %v1098_v30 = vpop.f32.mrf.mxu0  ;;  %v1187_v31 = vpop.f32.mrf.mxu1  ;;  %v2618_v14 = vunpack.c.0.s8 %v7163_v52 }
  0xf9   :  { %v799_v24 = vrot.slane %v792_v17, %v7013_v26  ;;  %v1224_v33 = vmax.f32 %v1208_v20, %v1216_v21  ;;  %v1217_v4 = vmax.f32 %v1098_v30, %v1187_v31  ;;  %v1213_v7 = vmax.f32 %v7101_v54, %v7103_v55 }
  0xfa   :  { %765 = vst.msk [vmem:[#allocation2 + $0x64] ss:$2 sm:$0x3] %vm7019_vm2, %v762_v22  ;;  %769 = vst.msk [vmem:[#allocation2 + $0x68] ss:$2 sm:$0x3] %vm7019_vm2, %v766_v23  ;;  %v770_v6 = vcombine.high %v762_v22, %v762_v22  ;;  %v1102_v35 = vpop.f32.mrf.mxu0  ;;  %v1191_v36 = vpop.f32.mrf.mxu1  ;;  %v1214_v46 = vmax.f32 %v7111_v58, %v7113_v1 }
  0xfb   :  { %802 = vst.msk [vmem:[#allocation2 + $0x74] ss:$2 sm:$0x3] %vm7019_vm2, %v799_v24  ;;  %806 = vst.msk [vmem:[#allocation2 + $0x78] ss:$2 sm:$0x3] %vm7019_vm2, %v803_v29  ;;  %v807_v34 = vcombine.high %v799_v24, %v799_v24  ;;  %v1232_v16 = vadd.f32 %v1224_v33, %v7004_v5  ;;  %v1225_v39 = vmax.f32 %v1209_v32, %v1217_v4 }
  0xfc   :  { %v1218_v41 = vmax.f32 %v1102_v35, %v1191_v36  ;;  %773 = vst.msk [vmem:[#allocation2 + $0x6c] ss:$2 sm:$0x3] %vm7019_vm2, %v770_v6  ;;  %v1104_v43 = vpop.f32.mrf.mxu0  ;;  %v1193_v44 = vpop.f32.mrf.mxu1  ;;  %v1215_v24 = vmax.f32 %v7125_v59, %v7127_v10 }
  0xfd   :  { %810 = vst.msk [vmem:[#allocation2 + $0x7c] ss:$2 sm:$0x3] %vm7019_vm2, %v807_v34  ;;  %v1233_v48 = vadd.f32 %v1225_v39, %v7004_v5  ;;  %v1219_v50 = vmax.f32 %v1104_v43, %v1193_v44  ;;  %v1240_v53 = vmax.f32 %v1232_v16, 0.0 }
  0xfe   :  { %v1226_v49 = vmax.f32 %v1210_v15, %v1218_v41  ;;  %v1108_v27 = vpop.f32.mrf.mxu0  ;;  %v1197_v28 = vpop.f32.mrf.mxu1 }
  0xff   :  { %v1241_v56 = vmax.f32 %v1233_v48, 0.0  ;;  %v1227_v61 = vmax.f32 %v1211_v45, %v1219_v50  ;;  %v1220_v62 = vmax.f32 %v1108_v27, %v1197_v28 }
 0x100   :  { %v1234_v0 = vadd.f32 %v1226_v49, %v7010_v25  ;;  %v1110_v57 = vpop.f32.mrf.mxu0  ;;  %v1199_v37 = vpop.f32.mrf.mxu1 }
 0x101   :  { %v1250_v38 = vcombine.low %v1240_v53, %v1241_v56  ;;  %v1287_v5 = vcombine.high %v1240_v53, %v1241_v56  ;;  %v1235_v2 = vadd.f32 %v1227_v61, %v7010_v25  ;;  %v1228_v8 = vmax.f32 %v1212_v63, %v1220_v62 }
 0x102   :  { %v1221_v9 = vmax.f32 %v1110_v57, %v1199_v37  ;;  %v1114_v11 = vpop.f32.mrf.mxu0  ;;  %v1203_v13 = vpop.f32.mrf.mxu1  ;;  %v1242_v19 = vmax.f32 %v1234_v0, 0.0  ;;  %v7223_v0 = vsub.s32 %v2618_v14, %v7006_v12 }
 0x103   :  { %v1257_v47 = vrot.slane %v1250_v38, %v7013_v26  ;;  %v1294_v17 = vrot.slane %v1287_v5, %v7013_v26  ;;  %v1243_v18 = vmax.f32 %v1235_v2, 0.0  ;;  %v1236_v25 = vadd.f32 %v1228_v8, %v7017_v40 }
 0x104   :  { %v1229_v20 = vmax.f32 %v1213_v7, %v1221_v9  ;;  %v1222_v21 = vmax.f32 %v1114_v11, %v1203_v13  ;;  %v1116_v30 = vpop.f32.mrf.mxu0  ;;  %v1205_v31 = vpop.f32.mrf.mxu1 }
 0x105   :  { %v1264_v54 = vrot.slane %v1257_v47, %v7013_v26  ;;  %v1268_v55 = vcombine.high %v1257_v47, %v1257_v47  ;;  %v1301_v22 = vrot.slane %v1294_v17, %v7013_v26  ;;  %v1305_v23 = vcombine.high %v1294_v17, %v1294_v17 }
 0x106   :  { %v1326_v58 = vcombine.low %v1242_v19, %v1243_v18  ;;  %v1363_v1 = vcombine.high %v1242_v19, %v1243_v18  ;;  %v1237_v29 = vadd.f32 %v1229_v20, %v7017_v40  ;;  %v1230_v40 = vmax.f32 %v1214_v46, %v1222_v21 }
 0x107   :  { %1267 = vst.msk [vmem:[#allocation2 + $0x1] ss:$2 sm:$0x3] %vm7019_vm2, %v1264_v54  ;;  %v1275_v32 = vrot.slane %v1268_v55, %v7013_v26  ;;  %v1279_v33 = vcombine.high %v1264_v54, %v1264_v54  ;;  %1304 = vst.msk [vmem:[#allocation2 + $0x11] ss:$2 sm:$0x3] %vm7019_vm2, %v1301_v22  ;;  %v1312_v4 = vrot.slane %v1305_v23, %v7013_v26 }
 0x108   :  { %v1316_v6 = vcombine.high %v1301_v22, %v1301_v22  ;;  %v1333_v59 = vrot.slane %v1326_v58, %v7013_v26  ;;  %v1370_v10 = vrot.slane %v1363_v1, %v7013_v26  ;;  %v1245_v34 = vmax.f32 %v1237_v29, 0.0  ;;  %v1647_v23 = vld [vmem:[%s10351_s3 + $0x278] sm:$0xff] }
 0x109   :  { %1278 = vst.msk [vmem:[#allocation2 + $0x5] ss:$2 sm:$0x3] %vm7019_vm2, %v1275_v32  ;;  %1282 = vst.msk [vmem:[#allocation2 + $0x9] ss:$2 sm:$0x3] %vm7019_vm2, %v1279_v33  ;;  %v1283_v35 = vcombine.high %v1275_v32, %v1275_v32  ;;  %v1320_v36 = vcombine.high %v1312_v4, %v1312_v4  ;;  %v1223_v16 = vmax.f32 %v1116_v30, %v1205_v31 }
 0x10a   :  { %1315 = vst.msk [vmem:[#allocation2 + $0x15] ss:$2 sm:$0x3] %vm7019_vm2, %v1312_v4  ;;  %1319 = vst.msk [vmem:[#allocation2 + $0x19] ss:$2 sm:$0x3] %vm7019_vm2, %v1316_v6  ;;  %v1340_v39 = vrot.slane %v1333_v59, %v7013_v26  ;;  %v1344_v41 = vcombine.high %v1333_v59, %v1333_v59  ;;  %v1377_v43 = vrot.slane %v1370_v10, %v7013_v26 }
 0x10b   :  { %v1244_v15 = vmax.f32 %v1236_v25, 0.0  ;;  %v1381_v44 = vcombine.high %v1370_v10, %v1370_v10  ;;  %1286 = vst.msk [vmem:[#allocation2 + $0xd] ss:$2 sm:$0x3] %vm7019_vm2, %v1283_v35  ;;  %v1238_v49 = vadd.f32 %v1230_v40, %v7043_v60  ;;  %v1231_v50 = vmax.f32 %v1215_v24, %v1223_v16  ;;  %v1662_v32 = vld [vmem:[%s10351_s3 + $0x2f0] sm:$0xff]  ;;  %v1679_v40 = vld [vmem:[%s10351_s3 + $0x378] sm:$0xff] }
 0x10c   :  { %1323 = vst.msk [vmem:[#allocation2 + $0x1d] ss:$2 sm:$0x3] %vm7019_vm2, %v1320_v36  ;;  %1343 = vst.msk [vmem:[#allocation2 + $0x21] ss:$2 sm:$0x3] %vm7019_vm2, %v1340_v39  ;;  %v1351_v27 = vrot.slane %v1344_v41, %v7013_v26  ;;  %v1355_v28 = vcombine.high %v1340_v39, %v1340_v39  ;;  %v1392_v52 = vcombine.high %v1377_v43, %v1377_v43 }
 0x10d   :  { %v1402_v45 = vcombine.low %v1244_v15, %v1245_v34  ;;  %v1439_v48 = vcombine.high %v1244_v15, %v1245_v34  ;;  %1380 = vst.msk [vmem:[#allocation2 + $0x31] ss:$2 sm:$0x3] %vm7019_vm2, %v1377_v43  ;;  %v1388_v51 = vrot.slane %v1381_v44, %v7013_v26  ;;  %v1239_v61 = vadd.f32 %v1231_v50, %v7043_v60  ;;  %v1646_v34 = vld [vmem:[%s10351_s3 + $0x270] sm:$0xff]  ;;  %v1661_v35 = vld [vmem:[%s10351_s3 + $0x2e8] sm:$0xff]  ;;  %v1660_v43 = vld [vmem:[%s10351_s3 + $0x2e0] sm:$0xff] }
 0x10e   :  { %1354 = vst.msk [vmem:[#allocation2 + $0x25] ss:$2 sm:$0x3] %vm7019_vm2, %v1351_v27  ;;  %1358 = vst.msk [vmem:[#allocation2 + $0x29] ss:$2 sm:$0x3] %vm7019_vm2, %v1355_v28  ;;  %v1359_v62 = vcombine.high %v1351_v27, %v1351_v27 }
 0x10f   :  { %v1409_v53 = vrot.slane %v1402_v45, %v7013_v26  ;;  %v1446_v56 = vrot.slane %v1439_v48, %v7013_v26  ;;  %1391 = vst.msk [vmem:[#allocation2 + $0x35] ss:$2 sm:$0x3] %vm7019_vm2, %v1388_v51  ;;  %1395 = vst.msk [vmem:[#allocation2 + $0x39] ss:$2 sm:$0x3] %vm7019_vm2, %v1392_v52  ;;  %v1396_v63 = vcombine.high %v1388_v51, %v1388_v51 }
 0x110   :  { %1362 = vst.msk [vmem:[#allocation2 + $0x2d] ss:$2 sm:$0x3] %vm7019_vm2, %v1359_v62  ;;  %v1246_v5 = vmax.f32 %v1238_v49, 0.0  ;;  %v1247_v2 = vmax.f32 %v1239_v61, 0.0  ;;  %v1552_v7 = vld [vmem:[#allocation2] sm:$0xff] }
 0x111   :  { %v1416_v57 = vrot.slane %v1409_v53, %v7013_v26  ;;  %v1420_v60 = vcombine.high %v1409_v53, %v1409_v53  ;;  %v1453_v37 = vrot.slane %v1446_v56, %v7013_v26  ;;  %v1457_v38 = vcombine.high %v1446_v56, %v1446_v56  ;;  %1399 = vst.msk [vmem:[#allocation2 + $0x3d] ss:$2 sm:$0x3] %vm7019_vm2, %v1396_v63  ;;  %v1645_v39 = vld [vmem:[%s10351_s3 + $0x268] sm:$0xff]  ;;  %v1678_v41 = vld [vmem:[%s10351_s3 + $0x370] sm:$0xff]  ;;  %v1644_v45 = vld [vmem:[%s10351_s3 + $0x260] sm:$0xff] }
 0x112   :  { %v1478_v13 = vcombine.low %v1246_v5, %v1247_v2  ;;  %v1515_v14 = vcombine.high %v1246_v5, %v1247_v2  ;;  %v2622_v46 = vrot.slane %v1552_v7, %v7223_v0  ;;  %v2615_v47 = vcombine.high %v1552_v7, %v1552_v7  ;;  %v1553_v17 = vld [vmem:[#allocation2 + $0x8] sm:$0xff]  ;;  %v1692_v49 = vld [vmem:[%s10351_s3 + $0x3e0] sm:$0xff]  ;;  %v1643_v50 = vld [vmem:[%s10351_s3 + $0x258] sm:$0xff] }
 0x113   :  { %1419 = vst.msk [vmem:[#allocation2 + $0x41] ss:$2 sm:$0x3] %vm7019_vm2, %v1416_v57  ;;  %v1427_v12 = vrot.slane %v1420_v60, %v7013_v26  ;;  %v1431_v8 = vcombine.high %v1416_v57, %v1416_v57  ;;  %1456 = vst.msk [vmem:[#allocation2 + $0x51] ss:$2 sm:$0x3] %vm7019_vm2, %v1453_v37  ;;  %v1464_v9 = vrot.slane %v1457_v38, %v7013_v26 }
 0x114   :  { %v1468_v11 = vcombine.high %v1453_v37, %v1453_v37  ;;  %v7247_v25 = vrot.slane %v1553_v17, %v7223_v0  ;;  %v2632_v20 = vcombine.high %v1553_v17, %v1553_v17  ;;  %v1485_v21 = vrot.slane %v1478_v13, %v7013_v26  ;;  %v1693_v44 = vld [vmem:[%s10351_s3 + $0x3e8] sm:$0xff]  ;;  %v1676_v27 = vld [vmem:[%s10351_s3 + $0x360] sm:$0xff]  ;;  %v1658_v28 = vld [vmem:[%s10351_s3 + $0x2d0] sm:$0xff] }
 0x115   :  { %1430 = vst.msk [vmem:[#allocation2 + $0x45] ss:$2 sm:$0x3] %vm7019_vm2, %v1427_v12  ;;  %1434 = vst.msk [vmem:[#allocation2 + $0x49] ss:$2 sm:$0x3] %vm7019_vm2, %v1431_v8  ;;  %v1435_v18 = vcombine.high %v1427_v12, %v1427_v12  ;;  %v1472_v19 = vcombine.high %v1464_v9, %v1464_v9  ;;  %v1522_v54 = vrot.slane %v1515_v14, %v7013_v26 }
 0x116   :  { %1467 = vst.msk [vmem:[#allocation2 + $0x55] ss:$2 sm:$0x3] %vm7019_vm2, %v1464_v9  ;;  %1471 = vst.msk [vmem:[#allocation2 + $0x59] ss:$2 sm:$0x3] %vm7019_vm2, %v1468_v11  ;;  %v2630_v55 = vcombine.high %v2622_v46, %v2622_v46  ;;  %v2629_v22 = vrot.slane %v2615_v47, %v7223_v0  ;;  %v2647_v24 = vcombine.high %v7247_v25, %v7247_v25 }
 0x117   :  { %1438 = vst.msk [vmem:[#allocation2 + $0x4d] ss:$2 sm:$0x3] %vm7019_vm2, %v1435_v18  ;;  %1475 = vst.msk [vmem:[#allocation2 + $0x5d] ss:$2 sm:$0x3] %vm7019_vm2, %v1472_v19  ;;  %v7262_v58 = vrot.slane %v2632_v20, %v7223_v0  ;;  %v1492_v1 = vrot.slane %v1485_v21, %v7013_v26  ;;  %v1496_v29 = vcombine.high %v1485_v21, %v1485_v21 }
 0x118   :  { %v1529_v30 = vrot.slane %v1522_v54, %v7013_v26  ;;  %v1533_v31 = vcombine.high %v1522_v54, %v1522_v54  ;;  %3015 = vmatprep.mubr.f32.mxu0 %v2630_v55  ;;  %v2631_v33 = vcombine.high %v2629_v22, %v2629_v22  ;;  %v1677_v48 = vld [vmem:[%s10351_s3 + $0x368] sm:$0xff]  ;;  %v1691_v51 = vld [vmem:[%s10351_s3 + $0x3d8] sm:$0xff]  ;;  %v1642_v52 = vld [vmem:[%s10351_s3 + $0x250] sm:$0xff] }
 0x119   :  { %3016 = vmatmul.mubr.f32.vlgmr.msra.gmra.mxu0 %v2622_v46  ;;  %1495 = vst.msk [vmem:[#allocation2 + $0x61] ss:$2 sm:$0x3] %vm7019_vm2, %v1492_v1  ;;  %v1503_v4 = vrot.slane %v1496_v29, %v7013_v26  ;;  %v1507_v6 = vcombine.high %v1492_v1, %v1492_v1  ;;  %v2648_v36 = vcombine.high %v7262_v58, %v7262_v58  ;;  %v1675_v53 = vld [vmem:[%s10351_s3 + $0x358] sm:$0xff]  ;;  %v1657_v56 = vld [vmem:[%s10351_s3 + $0x2c8] sm:$0xff]  ;;  %v1690_v61 = vld [vmem:[%s10351_s3 + $0x3d0] sm:$0xff] }
 0x11a   :  { %1532 = vst.msk [vmem:[#allocation2 + $0x71] ss:$2 sm:$0x3] %vm7019_vm2, %v1529_v30  ;;  %v1540_v59 = vrot.slane %v1533_v31, %v7013_v26  ;;  %v1544_v10 = vcombine.high %v1529_v30, %v1529_v30  ;;  %5429 = vmatpush3.msra.mxu0 %v1647_v23  ;;  %3085 = vmatprep.mubr.f32.mxu1 %v2631_v33  ;;  %v1694_v26 = vld [vmem:[%s10351_s3 + $0x3f0] sm:$0xff]  ;;  %v1641_v62 = vld [vmem:[%s10351_s3 + $0x248] sm:$0xff]  ;;  %v1656_v57 = vld [vmem:[%s10351_s3 + $0x2c0] sm:$0xff] }
 0x11b   :  { %5430 = vmatprep.subr.mxu0 %v1662_v32  ;;  %1506 = vst.msk [vmem:[#allocation2 + $0x65] ss:$2 sm:$0x3] %vm7019_vm2, %v1503_v4  ;;  %1510 = vst.msk [vmem:[#allocation2 + $0x69] ss:$2 sm:$0x3] %vm7019_vm2, %v1507_v6  ;;  %v1511_v15 = vcombine.high %v1503_v4, %v1503_v4  ;;  %3155 = vmatprep.mubr.f32.mxu0 %v2647_v24 }
 0x11c   :  { %1543 = vst.msk [vmem:[#allocation2 + $0x75] ss:$2 sm:$0x3] %vm7019_vm2, %v1540_v59  ;;  %1547 = vst.msk [vmem:[#allocation2 + $0x79] ss:$2 sm:$0x3] %vm7019_vm2, %v1544_v10  ;;  %v1548_v16 = vcombine.high %v1540_v59, %v1540_v59  ;;  %3086 = vmatmul.mubr.f32.vlgmr.msra.gmra.mxu1 %v2629_v22  ;;  %5431 = vmatpush3.msra.mxu0 %v1646_v34 }
 0x11d   :  { %5464 = vmatpush3.msra.mxu1 %v1679_v40  ;;  %1514 = vst.msk [vmem:[#allocation2 + $0x6d] ss:$2 sm:$0x3] %vm7019_vm2, %v1511_v15  ;;  %5432 = vmatprep.subr.mxu0 %v1661_v35  ;;  %v1674_v63 = vld [vmem:[%s10351_s3 + $0x350] sm:$0xff]  ;;  %v1689_v60 = vld [vmem:[%s10351_s3 + $0x3c8] sm:$0xff]  ;;  %v1640_v37 = vld [vmem:[%s10351_s3 + $0x240] sm:$0xff] }
 0x11e   :  { %1551 = vst.msk [vmem:[#allocation2 + $0x7d] ss:$2 sm:$0x3] %vm7019_vm2, %v1548_v16  ;;  %5465 = vmatprep.subr.mxu1 %v1694_v26  ;;  %3225 = vmatprep.mubr.f32.mxu1 %v2648_v36  ;;  %v1673_v38 = vld [vmem:[%s10351_s3 + $0x348] sm:$0xff]  ;;  %v1655_v5 = vld [vmem:[%s10351_s3 + $0x2b8] sm:$0xff]  ;;  %v1688_v2 = vld [vmem:[%s10351_s3 + $0x3c0] sm:$0xff] }
 0x11f   :  { %5433 = vmatpush3.msra.mxu0 %v1645_v39  ;;  %5466 = vmatpush3.msra.mxu1 %v1678_v41  ;;  %v1639_v7 = vld [vmem:[%s10351_s3 + $0x238] sm:$0xff]  ;;  %v1672_v12 = vld [vmem:[%s10351_s3 + $0x340] sm:$0xff]  ;;  %v1654_v8 = vld [vmem:[%s10351_s3 + $0x2b0] sm:$0xff] }
 0x120   :  { %5434 = vmatprep.subr.mxu0 %v1660_v43  ;;  %5467 = vmatprep.subr.mxu1 %v1693_v44  ;;  %v1687_v9 = vld [vmem:[%s10351_s3 + $0x3b8] sm:$0xff]  ;;  %v1638_v11 = vld [vmem:[%s10351_s3 + $0x230] sm:$0xff]  ;;  %v1653_v14 = vld [vmem:[%s10351_s3 + $0x2a8] sm:$0xff] }
 0x121   :  { %5435 = vmatpush3.msra.mxu0 %v1644_v45  ;;  %5468 = vmatpush3.msra.mxu1 %v1677_v48  ;;  %v1671_v13 = vld [vmem:[%s10351_s3 + $0x338] sm:$0xff]  ;;  %v1686_v46 = vld [vmem:[%s10351_s3 + $0x3b0] sm:$0xff]  ;;  %v1637_v47 = vld [vmem:[%s10351_s3 + $0x228] sm:$0xff] }
 0x122   :  { %5436 = vmatprep.subr.mxu0 %v1659_v42  ;;  %5469 = vmatprep.subr.mxu1 %v1692_v49  ;;  %v1670_v17 = vld [vmem:[%s10351_s3 + $0x330] sm:$0xff]  ;;  %v1652_v18 = vld [vmem:[%s10351_s3 + $0x2a0] sm:$0xff]  ;;  %v1685_v19 = vld [vmem:[%s10351_s3 + $0x3a8] sm:$0xff] }
 0x123   :  { %5437 = vmatpush3.msra.mxu0 %v1643_v50  ;;  %5470 = vmatpush3.msra.mxu1 %v1676_v27  ;;  %v1636_v20 = vld [vmem:[%s10351_s3 + $0x220] sm:$0xff]  ;;  %v1669_v21 = vld [vmem:[%s10351_s3 + $0x328] sm:$0xff]  ;;  %v1651_v54 = vld [vmem:[%s10351_s3 + $0x298] sm:$0xff] }
 0x124   :  { %5438 = vmatprep.subr.mxu0 %v1658_v28  ;;  %5471 = vmatprep.subr.mxu1 %v1691_v51  ;;  %v1684_v55 = vld [vmem:[%s10351_s3 + $0x3a0] sm:$0xff]  ;;  %v1635_v22 = vld [vmem:[%s10351_s3 + $0x218] sm:$0xff]  ;;  %v1650_v24 = vld [vmem:[%s10351_s3 + $0x290] sm:$0xff] }
 0x125   :  { %5439 = vmatpush3.msra.mxu0 %v1642_v52  ;;  %5472 = vmatpush3.msra.mxu1 %v1675_v53  ;;  %v1668_v23 = vld [vmem:[%s10351_s3 + $0x320] sm:$0xff]  ;;  %v1683_v1 = vld [vmem:[%s10351_s3 + $0x398] sm:$0xff]  ;;  %v1634_v29 = vld [vmem:[%s10351_s3 + $0x210] sm:$0xff] }
 0x126   :  { %5440 = vmatprep.subr.mxu0 %v1657_v56  ;;  %5473 = vmatprep.subr.mxu1 %v1690_v61  ;;  %v1667_v30 = vld [vmem:[%s10351_s3 + $0x318] sm:$0xff]  ;;  %v1649_v31 = vld [vmem:[%s10351_s3 + $0x288] sm:$0xff]  ;;  %v1554_v32 = vld [vmem:[#allocation2 + $0x10] sm:$0xff] }
 0x127   :  { %5441 = vmatpush3.msra.mxu0 %v1641_v62  ;;  %5474 = vmatpush3.msra.mxu1 %v1674_v63  ;;  %v1682_v33 = vld [vmem:[%s10351_s3 + $0x390] sm:$0xff]  ;;  %v1633_v4 = vld [vmem:[%s10351_s3 + $0x208] sm:$0xff]  ;;  %v1648_v59 = vld [vmem:[%s10351_s3 + $0x280] sm:$0xff]  ;;  %v2649_v40 = vcombine.high %v1554_v32, %v1554_v32  ;;  %v7464_v26 = vrot.slane %v1554_v32, %v7223_v0 }
 0x128   :  { %5442 = vmatprep.subr.mxu0 %v1656_v57  ;;  %5475 = vmatprep.subr.mxu1 %v1689_v60  ;;  %v1666_v6 = vld [vmem:[%s10351_s3 + $0x310] sm:$0xff]  ;;  %v1681_v10 = vld [vmem:[%s10351_s3 + $0x388] sm:$0xff]  ;;  %v1632_v34 = vld [vmem:[%s10351_s3 + $0x200] sm:$0xff] }
 0x129   :  { %5443 = vmatpush3.msra.mxu0 %v1640_v37  ;;  %5476 = vmatpush3.msra.mxu1 %v1673_v38  ;;  %v1665_v35 = vld [vmem:[%s10351_s3 + $0x308] sm:$0xff]  ;;  %v1680_v36 = vld [vmem:[%s10351_s3 + $0x380] sm:$0xff]  ;;  %v1727_v15 = vld [vmem:[%s10351_s3 + $0x4f8] sm:$0xff]  ;;  %v7480_v41 = vrot.slane %v2649_v40, %v7223_v0  ;;  %v2664_v43 = vcombine.high %v7464_v26, %v7464_v26 }
 0x12a   :  { %5444 = vmatprep.subr.mxu0 %v1655_v5  ;;  %5477 = vmatprep.subr.mxu1 %v1688_v2  ;;  %v1664_v16 = vld [vmem:[%s10351_s3 + $0x300] sm:$0xff]  ;;  %v1711_v39 = vld [vmem:[%s10351_s3 + $0x478] sm:$0xff]  ;;  %v1726_v44 = vld [vmem:[%s10351_s3 + $0x4f0] sm:$0xff] }
 0x12b   :  { %5445 = vmatpush3.msra.mxu0 %v1639_v7  ;;  %5478 = vmatpush3.msra.mxu1 %v1672_v12  ;;  %v1759_v45 = vld [vmem:[%s10351_s3 + $0x5f8] sm:$0xff]  ;;  %v1725_v42 = vld [vmem:[%s10351_s3 + $0x4e8] sm:$0xff]  ;;  %v2665_v49 = vcombine.high %v7480_v41, %v7480_v41  ;;  %v1758_v50 = vld [vmem:[%s10351_s3 + $0x5f0] sm:$0xff] }
 0x12c   :  { %5446 = vmatprep.subr.mxu0 %v1654_v8  ;;  %5479 = vmatprep.subr.mxu1 %v1687_v9  ;;  %v1743_v48 = vld [vmem:[%s10351_s3 + $0x578] sm:$0xff]  ;;  %v1709_v27 = vld [vmem:[%s10351_s3 + $0x468] sm:$0xff]  ;;  %v1724_v28 = vld [vmem:[%s10351_s3 + $0x4e0] sm:$0xff] }
 0x12d   :  { %5447 = vmatpush3.msra.mxu0 %v1638_v11  ;;  %5480 = vmatpush3.msra.mxu1 %v1671_v13  ;;  %v1757_v51 = vld [vmem:[%s10351_s3 + $0x5e8] sm:$0xff]  ;;  %v1708_v52 = vld [vmem:[%s10351_s3 + $0x460] sm:$0xff]  ;;  %v1723_v56 = vld [vmem:[%s10351_s3 + $0x4d8] sm:$0xff] }
 0x12e   :  { %5448 = vmatprep.subr.mxu0 %v1653_v14  ;;  %5481 = vmatprep.subr.mxu1 %v1686_v46  ;;  %v1741_v53 = vld [vmem:[%s10351_s3 + $0x568] sm:$0xff]  ;;  %v1756_v61 = vld [vmem:[%s10351_s3 + $0x5e0] sm:$0xff]  ;;  %v1707_v62 = vld [vmem:[%s10351_s3 + $0x458] sm:$0xff] }
 0x12f   :  { %5449 = vmatpush3.msra.mxu0 %v1637_v47  ;;  %5482 = vmatpush3.msra.mxu1 %v1670_v17  ;;  %v1740_v63 = vld [vmem:[%s10351_s3 + $0x560] sm:$0xff]  ;;  %v1722_v57 = vld [vmem:[%s10351_s3 + $0x4d0] sm:$0xff]  ;;  %v1755_v60 = vld [vmem:[%s10351_s3 + $0x5d8] sm:$0xff] }
 0x130   :  { %5450 = vmatprep.subr.mxu0 %v1652_v18  ;;  %5483 = vmatprep.subr.mxu1 %v1685_v19  ;;  %v1706_v37 = vld [vmem:[%s10351_s3 + $0x450] sm:$0xff]  ;;  %v1739_v38 = vld [vmem:[%s10351_s3 + $0x558] sm:$0xff]  ;;  %v1721_v5 = vld [vmem:[%s10351_s3 + $0x4c8] sm:$0xff] }
 0x131   :  { %5451 = vmatpush3.msra.mxu0 %v1636_v20  ;;  %5484 = vmatpush3.msra.mxu1 %v1669_v21  ;;  %v1754_v2 = vld [vmem:[%s10351_s3 + $0x5d0] sm:$0xff]  ;;  %v1705_v7 = vld [vmem:[%s10351_s3 + $0x448] sm:$0xff]  ;;  %v1720_v8 = vld [vmem:[%s10351_s3 + $0x4c0] sm:$0xff] }
 0x132   :  { %5452 = vmatprep.subr.mxu0 %v1651_v54  ;;  %5485 = vmatprep.subr.mxu1 %v1684_v55  ;;  %v1738_v12 = vld [vmem:[%s10351_s3 + $0x550] sm:$0xff]  ;;  %v1753_v9 = vld [vmem:[%s10351_s3 + $0x5c8] sm:$0xff]  ;;  %v1704_v11 = vld [vmem:[%s10351_s3 + $0x440] sm:$0xff] }
 0x133   :  { %5453 = vmatpush3.msra.mxu0 %v1635_v22  ;;  %5486 = vmatpush3.msra.mxu1 %v1668_v23  ;;  %v1737_v13 = vld [vmem:[%s10351_s3 + $0x548] sm:$0xff]  ;;  %v1719_v14 = vld [vmem:[%s10351_s3 + $0x4b8] sm:$0xff]  ;;  %v1752_v46 = vld [vmem:[%s10351_s3 + $0x5c0] sm:$0xff] }
 0x134   :  { %5454 = vmatprep.subr.mxu0 %v1650_v24  ;;  %5487 = vmatprep.subr.mxu1 %v1683_v1  ;;  %v1703_v47 = vld [vmem:[%s10351_s3 + $0x438] sm:$0xff]  ;;  %v1736_v17 = vld [vmem:[%s10351_s3 + $0x540] sm:$0xff]  ;;  %v1718_v18 = vld [vmem:[%s10351_s3 + $0x4b0] sm:$0xff] }
 0x135   :  { %5455 = vmatpush3.msra.mxu0 %v1634_v29  ;;  %5488 = vmatpush3.msra.mxu1 %v1667_v30  ;;  %v1751_v19 = vld [vmem:[%s10351_s3 + $0x5b8] sm:$0xff]  ;;  %v1702_v20 = vld [vmem:[%s10351_s3 + $0x430] sm:$0xff]  ;;  %v1717_v54 = vld [vmem:[%s10351_s3 + $0x4a8] sm:$0xff] }
 0x136   :  { %5456 = vmatprep.subr.mxu0 %v1649_v31  ;;  %5489 = vmatprep.subr.mxu1 %v1682_v33  ;;  %v1735_v21 = vld [vmem:[%s10351_s3 + $0x538] sm:$0xff]  ;;  %v1750_v55 = vld [vmem:[%s10351_s3 + $0x5b0] sm:$0xff]  ;;  %v1701_v22 = vld [vmem:[%s10351_s3 + $0x428] sm:$0xff] }
 0x137   :  { %5457 = vmatpush3.msra.mxu0 %v1633_v4  ;;  %5490 = vmatpush3.msra.mxu1 %v1666_v6  ;;  %v1734_v23 = vld [vmem:[%s10351_s3 + $0x530] sm:$0xff]  ;;  %v1716_v24 = vld [vmem:[%s10351_s3 + $0x4a0] sm:$0xff]  ;;  %v1749_v1 = vld [vmem:[%s10351_s3 + $0x5a8] sm:$0xff] }
 0x138   :  { %5458 = vmatprep.subr.mxu0 %v1648_v59  ;;  %5491 = vmatprep.subr.mxu1 %v1681_v10  ;;  %v1700_v29 = vld [vmem:[%s10351_s3 + $0x420] sm:$0xff]  ;;  %v1733_v30 = vld [vmem:[%s10351_s3 + $0x528] sm:$0xff]  ;;  %v1715_v31 = vld [vmem:[%s10351_s3 + $0x498] sm:$0xff] }
 0x139   :  { %5459 = vmatpush3.msra.mxu0 %v1632_v34  ;;  %5492 = vmatpush3.msra.mxu1 %v1665_v35  ;;  %v1748_v32 = vld [vmem:[%s10351_s3 + $0x5a0] sm:$0xff]  ;;  %v1699_v33 = vld [vmem:[%s10351_s3 + $0x418] sm:$0xff]  ;;  %v1714_v6 = vld [vmem:[%s10351_s3 + $0x490] sm:$0xff] }
 0x13a   :  { %3156 = vmatmul.mubr.f32.vlgmr.msra.gmra.mxu0 %v7247_v25  ;;  %5493 = vmatprep.subr.mxu1 %v1680_v36  ;;  %v1710_v25 = vld [vmem:[%s10351_s3 + $0x470] sm:$0xff]  ;;  %v1732_v4 = vld [vmem:[%s10351_s3 + $0x520] sm:$0xff]  ;;  %v1747_v59 = vld [vmem:[%s10351_s3 + $0x598] sm:$0xff] }
 0x13b   :  { %5498 = vmatprep.subr.mxu0 %v1727_v15  ;;  %5494 = vmatpush3.msra.mxu1 %v1664_v16  ;;  %v1698_v10 = vld [vmem:[%s10351_s3 + $0x410] sm:$0xff]  ;;  %v1731_v34 = vld [vmem:[%s10351_s3 + $0x518] sm:$0xff]  ;;  %v1713_v40 = vld [vmem:[%s10351_s3 + $0x488] sm:$0xff] }
 0x13c   :  { %5499 = vmatpush3.msra.mxu0 %v1711_v39  ;;  %3295 = vmatprep.mubr.f32.mxu0 %v2664_v43  ;;  %v1555_v35 = vld [vmem:[#allocation2 + $0x18] sm:$0xff]  ;;  %v1746_v36 = vld [vmem:[%s10351_s3 + $0x590] sm:$0xff]  ;;  %v1697_v15 = vld [vmem:[%s10351_s3 + $0x408] sm:$0xff] }
 0x13d   :  { %3226 = vmatmul.mubr.f32.vlgmr.msra.gmra.mxu1 %v7262_v58  ;;  %5500 = vmatprep.subr.mxu0 %v1726_v44  ;;  %v1742_v58 = vld [vmem:[%s10351_s3 + $0x570] sm:$0xff]  ;;  %v1712_v39 = vld [vmem:[%s10351_s3 + $0x480] sm:$0xff]  ;;  %v1745_v43 = vld [vmem:[%s10351_s3 + $0x588] sm:$0xff] }
 0x13e   :  { %5533 = vmatprep.subr.mxu1 %v1759_v45  ;;  %5501 = vmatpush3.msra.mxu0 %v1710_v25  ;;  %v1730_v16 = vld [vmem:[%s10351_s3 + $0x510] sm:$0xff]  ;;  %v1696_v44 = vld [vmem:[%s10351_s3 + $0x400] sm:$0xff]  ;;  %v2666_v45 = vcombine.high %v1555_v35, %v1555_v35  ;;  %v1729_v25 = vld [vmem:[%s10351_s3 + $0x508] sm:$0xff] }
 0x13f   :  { %5534 = vmatpush3.msra.mxu1 %v1743_v48  ;;  %3365 = vmatprep.mubr.f32.mxu1 %v2665_v49  ;;  %v7668_v48 = vrot.slane %v1555_v35, %v7223_v0  ;;  %v1791_v49 = vld [vmem:[%s10351_s3 + $0x6f8] sm:$0xff]  ;;  %v1812_v35 = vld [vmem:[%s10351_s3 + $0x7a0] sm:$0xff] }
 0x140   :  { %5502 = vmatprep.subr.mxu0 %v1725_v42  ;;  %5535 = vmatprep.subr.mxu1 %v1758_v50  ;;  %v1744_v42 = vld [vmem:[%s10351_s3 + $0x580] sm:$0xff] }
 0x141   :  { %5503 = vmatpush3.msra.mxu0 %v1709_v27  ;;  %5536 = vmatpush3.msra.mxu1 %v1742_v58  ;;  %v1728_v50 = vld [vmem:[%s10351_s3 + $0x500] sm:$0xff]  ;;  %v1775_v27 = vld [vmem:[%s10351_s3 + $0x678] sm:$0xff]  ;;  %v7684_v58 = vrot.slane %v2666_v45, %v7223_v0  ;;  %v1777_v45 = vld [vmem:[%s10351_s3 + $0x688] sm:$0xff] }
 0x142   :  { %5504 = vmatprep.subr.mxu0 %v1724_v28  ;;  %5537 = vmatprep.subr.mxu1 %v1757_v51  ;;  %v2681_v28 = vcombine.high %v7668_v48, %v7668_v48  ;;  %v1790_v51 = vld [vmem:[%s10351_s3 + $0x6f0] sm:$0xff] }
 0x143   :  { %5505 = vmatpush3.msra.mxu0 %v1708_v52  ;;  %5538 = vmatpush3.msra.mxu1 %v1741_v53  ;;  %v1823_v52 = vld [vmem:[%s10351_s3 + $0x7f8] sm:$0xff] }
 0x144   :  { %5506 = vmatprep.subr.mxu0 %v1723_v56  ;;  %5539 = vmatprep.subr.mxu1 %v1756_v61  ;;  %v1807_v53 = vld [vmem:[%s10351_s3 + $0x778] sm:$0xff]  ;;  %v1789_v56 = vld [vmem:[%s10351_s3 + $0x6e8] sm:$0xff]  ;;  %v2682_v61 = vcombine.high %v7684_v58, %v7684_v58 }
 0x145   :  { %5507 = vmatpush3.msra.mxu0 %v1707_v62  ;;  %5540 = vmatpush3.msra.mxu1 %v1740_v63  ;;  %v1822_v62 = vld [vmem:[%s10351_s3 + $0x7f0] sm:$0xff]  ;;  %v1773_v63 = vld [vmem:[%s10351_s3 + $0x668] sm:$0xff] }
 0x146   :  { %5508 = vmatprep.subr.mxu0 %v1722_v57  ;;  %5541 = vmatprep.subr.mxu1 %v1755_v60  ;;  %v1788_v57 = vld [vmem:[%s10351_s3 + $0x6e0] sm:$0xff]  ;;  %v1821_v60 = vld [vmem:[%s10351_s3 + $0x7e8] sm:$0xff] }
 0x147   :  { %5509 = vmatpush3.msra.mxu0 %v1706_v37  ;;  %5542 = vmatpush3.msra.mxu1 %v1739_v38  ;;  %v1772_v37 = vld [vmem:[%s10351_s3 + $0x660] sm:$0xff]  ;;  %v1805_v38 = vld [vmem:[%s10351_s3 + $0x768] sm:$0xff] }
 0x148   :  { %5510 = vmatprep.subr.mxu0 %v1721_v5  ;;  %5543 = vmatprep.subr.mxu1 %v1754_v2  ;;  %v1787_v5 = vld [vmem:[%s10351_s3 + $0x6d8] sm:$0xff]  ;;  %v1820_v2 = vld [vmem:[%s10351_s3 + $0x7e0] sm:$0xff] }
 0x149   :  { %5511 = vmatpush3.msra.mxu0 %v1705_v7  ;;  %5544 = vmatpush3.msra.mxu1 %v1738_v12  ;;  %v1771_v7 = vld [vmem:[%s10351_s3 + $0x658] sm:$0xff]  ;;  %v1804_v12 = vld [vmem:[%s10351_s3 + $0x760] sm:$0xff] }
 0x14a   :  { %5512 = vmatprep.subr.mxu0 %v1720_v8  ;;  %5545 = vmatprep.subr.mxu1 %v1753_v9  ;;  %v1786_v8 = vld [vmem:[%s10351_s3 + $0x6d0] sm:$0xff]  ;;  %v1819_v9 = vld [vmem:[%s10351_s3 + $0x7d8] sm:$0xff] }
 0x14b   :  { %5513 = vmatpush3.msra.mxu0 %v1704_v11  ;;  %5546 = vmatpush3.msra.mxu1 %v1737_v13  ;;  %v1770_v11 = vld [vmem:[%s10351_s3 + $0x650] sm:$0xff]  ;;  %v1803_v13 = vld [vmem:[%s10351_s3 + $0x758] sm:$0xff] }
 0x14c   :  { %5514 = vmatprep.subr.mxu0 %v1719_v14  ;;  %5547 = vmatprep.subr.mxu1 %v1752_v46  ;;  %v1785_v14 = vld [vmem:[%s10351_s3 + $0x6c8] sm:$0xff]  ;;  %v1818_v46 = vld [vmem:[%s10351_s3 + $0x7d0] sm:$0xff] }
 0x14d   :  { %5515 = vmatpush3.msra.mxu0 %v1703_v47  ;;  %5548 = vmatpush3.msra.mxu1 %v1736_v17  ;;  %v1769_v47 = vld [vmem:[%s10351_s3 + $0x648] sm:$0xff]  ;;  %v1802_v17 = vld [vmem:[%s10351_s3 + $0x750] sm:$0xff] }
 0x14e   :  { %5516 = vmatprep.subr.mxu0 %v1718_v18  ;;  %5549 = vmatprep.subr.mxu1 %v1751_v19  ;;  %v1784_v18 = vld [vmem:[%s10351_s3 + $0x6c0] sm:$0xff]  ;;  %v1817_v19 = vld [vmem:[%s10351_s3 + $0x7c8] sm:$0xff] }
 0x14f   :  { %5517 = vmatpush3.msra.mxu0 %v1702_v20  ;;  %5550 = vmatpush3.msra.mxu1 %v1735_v21  ;;  %v1768_v20 = vld [vmem:[%s10351_s3 + $0x640] sm:$0xff]  ;;  %v1801_v21 = vld [vmem:[%s10351_s3 + $0x748] sm:$0xff] }
 0x150   :  { %5518 = vmatprep.subr.mxu0 %v1717_v54  ;;  %5551 = vmatprep.subr.mxu1 %v1750_v55  ;;  %v1783_v54 = vld [vmem:[%s10351_s3 + $0x6b8] sm:$0xff]  ;;  %v1816_v55 = vld [vmem:[%s10351_s3 + $0x7c0] sm:$0xff] }
 0x151   :  { %5519 = vmatpush3.msra.mxu0 %v1701_v22  ;;  %5552 = vmatpush3.msra.mxu1 %v1734_v23  ;;  %v1767_v22 = vld [vmem:[%s10351_s3 + $0x638] sm:$0xff]  ;;  %v1800_v23 = vld [vmem:[%s10351_s3 + $0x740] sm:$0xff] }
 0x152   :  { %5520 = vmatprep.subr.mxu0 %v1716_v24  ;;  %5553 = vmatprep.subr.mxu1 %v1749_v1  ;;  %v1782_v24 = vld [vmem:[%s10351_s3 + $0x6b0] sm:$0xff]  ;;  %v1815_v1 = vld [vmem:[%s10351_s3 + $0x7b8] sm:$0xff] }
 0x153   :  { %5521 = vmatpush3.msra.mxu0 %v1700_v29  ;;  %5554 = vmatpush3.msra.mxu1 %v1733_v30  ;;  %v1766_v29 = vld [vmem:[%s10351_s3 + $0x630] sm:$0xff]  ;;  %v1799_v30 = vld [vmem:[%s10351_s3 + $0x738] sm:$0xff] }
 0x154   :  { %5522 = vmatprep.subr.mxu0 %v1715_v31  ;;  %5555 = vmatprep.subr.mxu1 %v1748_v32  ;;  %v1781_v31 = vld [vmem:[%s10351_s3 + $0x6a8] sm:$0xff]  ;;  %v1814_v32 = vld [vmem:[%s10351_s3 + $0x7b0] sm:$0xff] }
 0x155   :  { %5523 = vmatpush3.msra.mxu0 %v1699_v33  ;;  %5556 = vmatpush3.msra.mxu1 %v1732_v4  ;;  %v1765_v33 = vld [vmem:[%s10351_s3 + $0x628] sm:$0xff]  ;;  %v1798_v4 = vld [vmem:[%s10351_s3 + $0x730] sm:$0xff] }
 0x156   :  { %5524 = vmatprep.subr.mxu0 %v1714_v6  ;;  %5557 = vmatprep.subr.mxu1 %v1747_v59  ;;  %v1780_v6 = vld [vmem:[%s10351_s3 + $0x6a0] sm:$0xff]  ;;  %v1813_v59 = vld [vmem:[%s10351_s3 + $0x7a8] sm:$0xff] }
 0x157   :  { %5525 = vmatpush3.msra.mxu0 %v1698_v10  ;;  %5558 = vmatpush3.msra.mxu1 %v1731_v34  ;;  %v1764_v10 = vld [vmem:[%s10351_s3 + $0x620] sm:$0xff]  ;;  %v1797_v34 = vld [vmem:[%s10351_s3 + $0x728] sm:$0xff] }
 0x158   :  { %5526 = vmatprep.subr.mxu0 %v1713_v40  ;;  %5559 = vmatprep.subr.mxu1 %v1746_v36  ;;  %v1779_v40 = vld [vmem:[%s10351_s3 + $0x698] sm:$0xff] }
 0x159   :  { %5527 = vmatpush3.msra.mxu0 %v1697_v15  ;;  %5560 = vmatpush3.msra.mxu1 %v1730_v16  ;;  %v1763_v36 = vld [vmem:[%s10351_s3 + $0x618] sm:$0xff]  ;;  %v1796_v15 = vld [vmem:[%s10351_s3 + $0x720] sm:$0xff]  ;;  %v1778_v16 = vld [vmem:[%s10351_s3 + $0x690] sm:$0xff] }
 0x15a   :  { %5528 = vmatprep.subr.mxu0 %v1712_v39  ;;  %5561 = vmatprep.subr.mxu1 %v1745_v43  ;;  %v1811_v39 = vld [vmem:[%s10351_s3 + $0x798] sm:$0xff]  ;;  %v1762_v43 = vld [vmem:[%s10351_s3 + $0x610] sm:$0xff] }
 0x15b   :  { %5529 = vmatpush3.msra.mxu0 %v1696_v44  ;;  %5562 = vmatpush3.msra.mxu1 %v1729_v25  ;;  %v1795_v44 = vld [vmem:[%s10351_s3 + $0x718] sm:$0xff]  ;;  %v1556_v25 = vld [vmem:[#allocation2 + $0x20] sm:$0xff] }
 0x15c   :  { %3296 = vmatmul.mubr.f32.vlgmr.msra.gmra.mxu0 %v7464_v26  ;;  %5563 = vmatprep.subr.mxu1 %v1744_v42  ;;  %v1774_v26 = vld [vmem:[%s10351_s3 + $0x670] sm:$0xff] }
 0x15d   :  { %5568 = vmatprep.subr.mxu0 %v1791_v49  ;;  %5564 = vmatpush3.msra.mxu1 %v1728_v50  ;;  %v1810_v42 = vld [vmem:[%s10351_s3 + $0x790] sm:$0xff]  ;;  %v1761_v49 = vld [vmem:[%s10351_s3 + $0x608] sm:$0xff] }
 0x15e   :  { %5569 = vmatpush3.msra.mxu0 %v1775_v27  ;;  %3435 = vmatprep.mubr.f32.mxu0 %v2681_v28  ;;  %v1794_v50 = vld [vmem:[%s10351_s3 + $0x710] sm:$0xff]  ;;  %v1776_v27 = vld [vmem:[%s10351_s3 + $0x680] sm:$0xff]  ;;  %v1809_v28 = vld [vmem:[%s10351_s3 + $0x788] sm:$0xff] }
 0x15f   :  { %3366 = vmatmul.mubr.f32.vlgmr.msra.gmra.mxu1 %v7480_v41  ;;  %5570 = vmatprep.subr.mxu0 %v1790_v51  ;;  %v1806_v41 = vld [vmem:[%s10351_s3 + $0x770] sm:$0xff]  ;;  %v1760_v51 = vld [vmem:[%s10351_s3 + $0x600] sm:$0xff] }
 0x160   :  { %5603 = vmatprep.subr.mxu1 %v1823_v52  ;;  %5571 = vmatpush3.msra.mxu0 %v1774_v26  ;;  %v2683_v52 = vcombine.high %v1556_v25, %v1556_v25  ;;  %v1793_v26 = vld [vmem:[%s10351_s3 + $0x708] sm:$0xff] }
 0x161   :  { %5604 = vmatpush3.msra.mxu1 %v1807_v53  ;;  %3505 = vmatprep.mubr.f32.mxu1 %v2682_v61  ;;  %v7872_v53 = vrot.slane %v1556_v25, %v7223_v0  ;;  %v1855_v61 = vld [vmem:[%s10351_s3 + $0x8f8] sm:$0xff]  ;;  %v1876_v25 = vld [vmem:[%s10351_s3 + $0x9a0] sm:$0xff] }
 0x162   :  { %5572 = vmatprep.subr.mxu0 %v1789_v56  ;;  %5605 = vmatprep.subr.mxu1 %v1822_v62  ;;  %v1808_v56 = vld [vmem:[%s10351_s3 + $0x780] sm:$0xff] }
 0x163   :  { %5573 = vmatpush3.msra.mxu0 %v1773_v63  ;;  %5606 = vmatpush3.msra.mxu1 %v1806_v41  ;;  %v1792_v62 = vld [vmem:[%s10351_s3 + $0x700] sm:$0xff]  ;;  %v1839_v63 = vld [vmem:[%s10351_s3 + $0x878] sm:$0xff]  ;;  %v7888_v41 = vrot.slane %v2683_v52, %v7223_v0  ;;  %v1841_v52 = vld [vmem:[%s10351_s3 + $0x888] sm:$0xff] }
 0x164   :  { %5574 = vmatprep.subr.mxu0 %v1788_v57  ;;  %5607 = vmatprep.subr.mxu1 %v1821_v60  ;;  %v2698_v57 = vcombine.high %v7872_v53, %v7872_v53  ;;  %v1854_v60 = vld [vmem:[%s10351_s3 + $0x8f0] sm:$0xff] }
 0x165   :  { %5575 = vmatpush3.msra.mxu0 %v1772_v37  ;;  %5608 = vmatpush3.msra.mxu1 %v1805_v38  ;;  %v1887_v37 = vld [vmem:[%s10351_s3 + $0x9f8] sm:$0xff] }
 0x166   :  { %5576 = vmatprep.subr.mxu0 %v1787_v5  ;;  %5609 = vmatprep.subr.mxu1 %v1820_v2  ;;  %v1871_v38 = vld [vmem:[%s10351_s3 + $0x978] sm:$0xff]  ;;  %v1853_v5 = vld [vmem:[%s10351_s3 + $0x8e8] sm:$0xff]  ;;  %v2699_v2 = vcombine.high %v7888_v41, %v7888_v41 }
 0x167   :  { %5577 = vmatpush3.msra.mxu0 %v1771_v7  ;;  %5610 = vmatpush3.msra.mxu1 %v1804_v12  ;;  %v1886_v7 = vld [vmem:[%s10351_s3 + $0x9f0] sm:$0xff]  ;;  %v1837_v12 = vld [vmem:[%s10351_s3 + $0x868] sm:$0xff] }
 0x168   :  { %5578 = vmatprep.subr.mxu0 %v1786_v8  ;;  %5611 = vmatprep.subr.mxu1 %v1819_v9  ;;  %v1852_v8 = vld [vmem:[%s10351_s3 + $0x8e0] sm:$0xff]  ;;  %v1885_v9 = vld [vmem:[%s10351_s3 + $0x9e8] sm:$0xff] }
 0x169   :  { %5579 = vmatpush3.msra.mxu0 %v1770_v11  ;;  %5612 = vmatpush3.msra.mxu1 %v1803_v13  ;;  %v1836_v11 = vld [vmem:[%s10351_s3 + $0x860] sm:$0xff]  ;;  %v1869_v13 = vld [vmem:[%s10351_s3 + $0x968] sm:$0xff] }
 0x16a   :  { %5580 = vmatprep.subr.mxu0 %v1785_v14  ;;  %5613 = vmatprep.subr.mxu1 %v1818_v46  ;;  %v1851_v14 = vld [vmem:[%s10351_s3 + $0x8d8] sm:$0xff]  ;;  %v1884_v46 = vld [vmem:[%s10351_s3 + $0x9e0] sm:$0xff] }
 0x16b   :  { %5581 = vmatpush3.msra.mxu0 %v1769_v47  ;;  %5614 = vmatpush3.msra.mxu1 %v1802_v17  ;;  %v1835_v47 = vld [vmem:[%s10351_s3 + $0x858] sm:$0xff]  ;;  %v1868_v17 = vld [vmem:[%s10351_s3 + $0x960] sm:$0xff] }
 0x16c   :  { %5582 = vmatprep.subr.mxu0 %v1784_v18  ;;  %5615 = vmatprep.subr.mxu1 %v1817_v19  ;;  %v1850_v18 = vld [vmem:[%s10351_s3 + $0x8d0] sm:$0xff]  ;;  %v1883_v19 = vld [vmem:[%s10351_s3 + $0x9d8] sm:$0xff] }
 0x16d   :  { %5583 = vmatpush3.msra.mxu0 %v1768_v20  ;;  %5616 = vmatpush3.msra.mxu1 %v1801_v21  ;;  %v1834_v20 = vld [vmem:[%s10351_s3 + $0x850] sm:$0xff]  ;;  %v1867_v21 = vld [vmem:[%s10351_s3 + $0x958] sm:$0xff] }
 0x16e   :  { %5584 = vmatprep.subr.mxu0 %v1783_v54  ;;  %5617 = vmatprep.subr.mxu1 %v1816_v55  ;;  %v1849_v54 = vld [vmem:[%s10351_s3 + $0x8c8] sm:$0xff]  ;;  %v1882_v55 = vld [vmem:[%s10351_s3 + $0x9d0] sm:$0xff] }
 0x16f   :  { %5585 = vmatpush3.msra.mxu0 %v1767_v22  ;;  %5618 = vmatpush3.msra.mxu1 %v1800_v23  ;;  %v1833_v22 = vld [vmem:[%s10351_s3 + $0x848] sm:$0xff]  ;;  %v1866_v23 = vld [vmem:[%s10351_s3 + $0x950] sm:$0xff] }
 0x170   :  { %5586 = vmatprep.subr.mxu0 %v1782_v24  ;;  %5619 = vmatprep.subr.mxu1 %v1815_v1  ;;  %v1848_v24 = vld [vmem:[%s10351_s3 + $0x8c0] sm:$0xff]  ;;  %v1881_v1 = vld [vmem:[%s10351_s3 + $0x9c8] sm:$0xff] }
 0x171   :  { %5587 = vmatpush3.msra.mxu0 %v1766_v29  ;;  %5620 = vmatpush3.msra.mxu1 %v1799_v30  ;;  %v1832_v29 = vld [vmem:[%s10351_s3 + $0x840] sm:$0xff]  ;;  %v1865_v30 = vld [vmem:[%s10351_s3 + $0x948] sm:$0xff] }
 0x172   :  { %5588 = vmatprep.subr.mxu0 %v1781_v31  ;;  %5621 = vmatprep.subr.mxu1 %v1814_v32  ;;  %v1847_v31 = vld [vmem:[%s10351_s3 + $0x8b8] sm:$0xff]  ;;  %v1880_v32 = vld [vmem:[%s10351_s3 + $0x9c0] sm:$0xff] }
 0x173   :  { %5589 = vmatpush3.msra.mxu0 %v1765_v33  ;;  %5622 = vmatpush3.msra.mxu1 %v1798_v4  ;;  %v1831_v33 = vld [vmem:[%s10351_s3 + $0x838] sm:$0xff]  ;;  %v1864_v4 = vld [vmem:[%s10351_s3 + $0x940] sm:$0xff] }
 0x174   :  { %5590 = vmatprep.subr.mxu0 %v1780_v6  ;;  %5623 = vmatprep.subr.mxu1 %v1813_v59  ;;  %v1846_v6 = vld [vmem:[%s10351_s3 + $0x8b0] sm:$0xff]  ;;  %v1879_v59 = vld [vmem:[%s10351_s3 + $0x9b8] sm:$0xff] }
 0x175   :  { %5591 = vmatpush3.msra.mxu0 %v1764_v10  ;;  %5624 = vmatpush3.msra.mxu1 %v1797_v34  ;;  %v1830_v10 = vld [vmem:[%s10351_s3 + $0x830] sm:$0xff]  ;;  %v1863_v34 = vld [vmem:[%s10351_s3 + $0x938] sm:$0xff] }
 0x176   :  { %5592 = vmatprep.subr.mxu0 %v1779_v40  ;;  %5625 = vmatprep.subr.mxu1 %v1812_v35  ;;  %v1845_v40 = vld [vmem:[%s10351_s3 + $0x8a8] sm:$0xff]  ;;  %v1878_v35 = vld [vmem:[%s10351_s3 + $0x9b0] sm:$0xff] }
 0x177   :  { %5593 = vmatpush3.msra.mxu0 %v1763_v36  ;;  %5626 = vmatpush3.msra.mxu1 %v1796_v15  ;;  %v1829_v36 = vld [vmem:[%s10351_s3 + $0x828] sm:$0xff]  ;;  %v1862_v15 = vld [vmem:[%s10351_s3 + $0x930] sm:$0xff] }
 0x178   :  { %5594 = vmatprep.subr.mxu0 %v1778_v16  ;;  %5627 = vmatprep.subr.mxu1 %v1811_v39  ;;  %v1844_v16 = vld [vmem:[%s10351_s3 + $0x8a0] sm:$0xff]  ;;  %v1877_v39 = vld [vmem:[%s10351_s3 + $0x9a8] sm:$0xff] }
 0x179   :  { %5595 = vmatpush3.msra.mxu0 %v1762_v43  ;;  %5628 = vmatpush3.msra.mxu1 %v1795_v44  ;;  %v1828_v43 = vld [vmem:[%s10351_s3 + $0x820] sm:$0xff]  ;;  %v1861_v44 = vld [vmem:[%s10351_s3 + $0x928] sm:$0xff] }
 0x17a   :  { %5596 = vmatprep.subr.mxu0 %v1777_v45  ;;  %5629 = vmatprep.subr.mxu1 %v1810_v42  ;;  %v1843_v45 = vld [vmem:[%s10351_s3 + $0x898] sm:$0xff] }
 0x17b   :  { %5597 = vmatpush3.msra.mxu0 %v1761_v49  ;;  %5630 = vmatpush3.msra.mxu1 %v1794_v50  ;;  %v1827_v42 = vld [vmem:[%s10351_s3 + $0x818] sm:$0xff]  ;;  %v1860_v49 = vld [vmem:[%s10351_s3 + $0x920] sm:$0xff]  ;;  %v1842_v50 = vld [vmem:[%s10351_s3 + $0x890] sm:$0xff] }
 0x17c   :  { %5598 = vmatprep.subr.mxu0 %v1776_v27  ;;  %5631 = vmatprep.subr.mxu1 %v1809_v28  ;;  %v1875_v27 = vld [vmem:[%s10351_s3 + $0x998] sm:$0xff]  ;;  %v1826_v28 = vld [vmem:[%s10351_s3 + $0x810] sm:$0xff] }
 0x17d   :  { %5599 = vmatpush3.msra.mxu0 %v1760_v51  ;;  %5632 = vmatpush3.msra.mxu1 %v1793_v26  ;;  %v1859_v51 = vld [vmem:[%s10351_s3 + $0x918] sm:$0xff]  ;;  %v1557_v26 = vld [vmem:[#allocation2 + $0x28] sm:$0xff] }
 0x17e   :  { %3436 = vmatmul.mubr.f32.vlgmr.msra.gmra.mxu0 %v7668_v48  ;;  %5633 = vmatprep.subr.mxu1 %v1808_v56  ;;  %v1838_v48 = vld [vmem:[%s10351_s3 + $0x870] sm:$0xff] }
 0x17f   :  { %5638 = vmatprep.subr.mxu0 %v1855_v61  ;;  %5634 = vmatpush3.msra.mxu1 %v1792_v62  ;;  %v1874_v56 = vld [vmem:[%s10351_s3 + $0x990] sm:$0xff]  ;;  %v1825_v61 = vld [vmem:[%s10351_s3 + $0x808] sm:$0xff] }
 0x180   :  { %5639 = vmatpush3.msra.mxu0 %v1839_v63  ;;  %3575 = vmatprep.mubr.f32.mxu0 %v2698_v57  ;;  %v1858_v62 = vld [vmem:[%s10351_s3 + $0x910] sm:$0xff]  ;;  %v1840_v63 = vld [vmem:[%s10351_s3 + $0x880] sm:$0xff]  ;;  %v1873_v57 = vld [vmem:[%s10351_s3 + $0x988] sm:$0xff] }
 0x181   :  { %3506 = vmatmul.mubr.f32.vlgmr.msra.gmra.mxu1 %v7684_v58  ;;  %5640 = vmatprep.subr.mxu0 %v1854_v60  ;;  %v1870_v58 = vld [vmem:[%s10351_s3 + $0x970] sm:$0xff]  ;;  %v1824_v60 = vld [vmem:[%s10351_s3 + $0x800] sm:$0xff] }
 0x182   :  { %5673 = vmatprep.subr.mxu1 %v1887_v37  ;;  %5641 = vmatpush3.msra.mxu0 %v1838_v48  ;;  %v2700_v37 = vcombine.high %v1557_v26, %v1557_v26  ;;  %v1857_v48 = vld [vmem:[%s10351_s3 + $0x908] sm:$0xff] }
 0x183   :  { %5674 = vmatpush3.msra.mxu1 %v1871_v38  ;;  %3645 = vmatprep.mubr.f32.mxu1 %v2699_v2  ;;  %v8076_v38 = vrot.slane %v1557_v26, %v7223_v0  ;;  %v1919_v2 = vld [vmem:[%s10351_s3 + $0xaf8] sm:$0xff]  ;;  %v1940_v26 = vld [vmem:[%s10351_s3 + $0xba0] sm:$0xff] }
 0x184   :  { %5642 = vmatprep.subr.mxu0 %v1853_v5  ;;  %5675 = vmatprep.subr.mxu1 %v1886_v7  ;;  %v1872_v5 = vld [vmem:[%s10351_s3 + $0x980] sm:$0xff] }
 0x185   :  { %5643 = vmatpush3.msra.mxu0 %v1837_v12  ;;  %5676 = vmatpush3.msra.mxu1 %v1870_v58  ;;  %v1856_v7 = vld [vmem:[%s10351_s3 + $0x900] sm:$0xff]  ;;  %v1903_v12 = vld [vmem:[%s10351_s3 + $0xa78] sm:$0xff]  ;;  %v8092_v58 = vrot.slane %v2700_v37, %v7223_v0  ;;  %v1905_v37 = vld [vmem:[%s10351_s3 + $0xa88] sm:$0xff] }
 0x186   :  { %5644 = vmatprep.subr.mxu0 %v1852_v8  ;;  %5677 = vmatprep.subr.mxu1 %v1885_v9  ;;  %v2715_v8 = vcombine.high %v8076_v38, %v8076_v38  ;;  %v1918_v9 = vld [vmem:[%s10351_s3 + $0xaf0] sm:$0xff] }
 0x187   :  { %5645 = vmatpush3.msra.mxu0 %v1836_v11  ;;  %5678 = vmatpush3.msra.mxu1 %v1869_v13  ;;  %v1951_v11 = vld [vmem:[%s10351_s3 + $0xbf8] sm:$0xff] }
 0x188   :  { %5646 = vmatprep.subr.mxu0 %v1851_v14  ;;  %5679 = vmatprep.subr.mxu1 %v1884_v46  ;;  %v1935_v13 = vld [vmem:[%s10351_s3 + $0xb78] sm:$0xff]  ;;  %v1917_v14 = vld [vmem:[%s10351_s3 + $0xae8] sm:$0xff]  ;;  %v2716_v46 = vcombine.high %v8092_v58, %v8092_v58 }
 0x189   :  { %5647 = vmatpush3.msra.mxu0 %v1835_v47  ;;  %5680 = vmatpush3.msra.mxu1 %v1868_v17  ;;  %v1950_v47 = vld [vmem:[%s10351_s3 + $0xbf0] sm:$0xff]  ;;  %v1901_v17 = vld [vmem:[%s10351_s3 + $0xa68] sm:$0xff] }
 0x18a   :  { %5648 = vmatprep.subr.mxu0 %v1850_v18  ;;  %5681 = vmatprep.subr.mxu1 %v1883_v19  ;;  %v1916_v18 = vld [vmem:[%s10351_s3 + $0xae0] sm:$0xff]  ;;  %v1949_v19 = vld [vmem:[%s10351_s3 + $0xbe8] sm:$0xff] }
 0x18b   :  { %5649 = vmatpush3.msra.mxu0 %v1834_v20  ;;  %5682 = vmatpush3.msra.mxu1 %v1867_v21  ;;  %v1900_v20 = vld [vmem:[%s10351_s3 + $0xa60] sm:$0xff]  ;;  %v1933_v21 = vld [vmem:[%s10351_s3 + $0xb68] sm:$0xff] }
 0x18c   :  { %5650 = vmatprep.subr.mxu0 %v1849_v54  ;;  %5683 = vmatprep.subr.mxu1 %v1882_v55  ;;  %v1915_v54 = vld [vmem:[%s10351_s3 + $0xad8] sm:$0xff]  ;;  %v1948_v55 = vld [vmem:[%s10351_s3 + $0xbe0] sm:$0xff] }
 0x18d   :  { %5651 = vmatpush3.msra.mxu0 %v1833_v22  ;;  %5684 = vmatpush3.msra.mxu1 %v1866_v23  ;;  %v1899_v22 = vld [vmem:[%s10351_s3 + $0xa58] sm:$0xff]  ;;  %v1932_v23 = vld [vmem:[%s10351_s3 + $0xb60] sm:$0xff] }
 0x18e   :  { %5652 = vmatprep.subr.mxu0 %v1848_v24  ;;  %5685 = vmatprep.subr.mxu1 %v1881_v1  ;;  %v1914_v24 = vld [vmem:[%s10351_s3 + $0xad0] sm:$0xff]  ;;  %v1947_v1 = vld [vmem:[%s10351_s3 + $0xbd8] sm:$0xff] }
 0x18f   :  { %5653 = vmatpush3.msra.mxu0 %v1832_v29  ;;  %5686 = vmatpush3.msra.mxu1 %v1865_v30  ;;  %v1898_v29 = vld [vmem:[%s10351_s3 + $0xa50] sm:$0xff]  ;;  %v1931_v30 = vld [vmem:[%s10351_s3 + $0xb58] sm:$0xff] }
 0x190   :  { %5654 = vmatprep.subr.mxu0 %v1847_v31  ;;  %5687 = vmatprep.subr.mxu1 %v1880_v32  ;;  %v1913_v31 = vld [vmem:[%s10351_s3 + $0xac8] sm:$0xff]  ;;  %v1946_v32 = vld [vmem:[%s10351_s3 + $0xbd0] sm:$0xff] }
 0x191   :  { %5655 = vmatpush3.msra.mxu0 %v1831_v33  ;;  %5688 = vmatpush3.msra.mxu1 %v1864_v4  ;;  %v1897_v33 = vld [vmem:[%s10351_s3 + $0xa48] sm:$0xff]  ;;  %v1930_v4 = vld [vmem:[%s10351_s3 + $0xb50] sm:$0xff] }
 0x192   :  { %5656 = vmatprep.subr.mxu0 %v1846_v6  ;;  %5689 = vmatprep.subr.mxu1 %v1879_v59  ;;  %v1912_v6 = vld [vmem:[%s10351_s3 + $0xac0] sm:$0xff]  ;;  %v1945_v59 = vld [vmem:[%s10351_s3 + $0xbc8] sm:$0xff] }
 0x193   :  { %5657 = vmatpush3.msra.mxu0 %v1830_v10  ;;  %5690 = vmatpush3.msra.mxu1 %v1863_v34  ;;  %v1896_v10 = vld [vmem:[%s10351_s3 + $0xa40] sm:$0xff]  ;;  %v1929_v34 = vld [vmem:[%s10351_s3 + $0xb48] sm:$0xff] }
 0x194   :  { %5658 = vmatprep.subr.mxu0 %v1845_v40  ;;  %5691 = vmatprep.subr.mxu1 %v1878_v35  ;;  %v1911_v40 = vld [vmem:[%s10351_s3 + $0xab8] sm:$0xff]  ;;  %v1944_v35 = vld [vmem:[%s10351_s3 + $0xbc0] sm:$0xff] }
 0x195   :  { %5659 = vmatpush3.msra.mxu0 %v1829_v36  ;;  %5692 = vmatpush3.msra.mxu1 %v1862_v15  ;;  %v1895_v36 = vld [vmem:[%s10351_s3 + $0xa38] sm:$0xff]  ;;  %v1928_v15 = vld [vmem:[%s10351_s3 + $0xb40] sm:$0xff] }
 0x196   :  { %5660 = vmatprep.subr.mxu0 %v1844_v16  ;;  %5693 = vmatprep.subr.mxu1 %v1877_v39  ;;  %v1910_v16 = vld [vmem:[%s10351_s3 + $0xab0] sm:$0xff]  ;;  %v1943_v39 = vld [vmem:[%s10351_s3 + $0xbb8] sm:$0xff] }
 0x197   :  { %5661 = vmatpush3.msra.mxu0 %v1828_v43  ;;  %5694 = vmatpush3.msra.mxu1 %v1861_v44  ;;  %v1894_v43 = vld [vmem:[%s10351_s3 + $0xa30] sm:$0xff]  ;;  %v1927_v44 = vld [vmem:[%s10351_s3 + $0xb38] sm:$0xff] }
 0x198   :  { %5662 = vmatprep.subr.mxu0 %v1843_v45  ;;  %5695 = vmatprep.subr.mxu1 %v1876_v25  ;;  %v1909_v45 = vld [vmem:[%s10351_s3 + $0xaa8] sm:$0xff]  ;;  %v1942_v25 = vld [vmem:[%s10351_s3 + $0xbb0] sm:$0xff] }
 0x199   :  { %5663 = vmatpush3.msra.mxu0 %v1827_v42  ;;  %5696 = vmatpush3.msra.mxu1 %v1860_v49  ;;  %v1893_v42 = vld [vmem:[%s10351_s3 + $0xa28] sm:$0xff]  ;;  %v1926_v49 = vld [vmem:[%s10351_s3 + $0xb30] sm:$0xff] }
 0x19a   :  { %5664 = vmatprep.subr.mxu0 %v1842_v50  ;;  %5697 = vmatprep.subr.mxu1 %v1875_v27  ;;  %v1908_v50 = vld [vmem:[%s10351_s3 + $0xaa0] sm:$0xff]  ;;  %v1941_v27 = vld [vmem:[%s10351_s3 + $0xba8] sm:$0xff] }
 0x19b   :  { %5665 = vmatpush3.msra.mxu0 %v1826_v28  ;;  %5698 = vmatpush3.msra.mxu1 %v1859_v51  ;;  %v1892_v28 = vld [vmem:[%s10351_s3 + $0xa20] sm:$0xff]  ;;  %v1925_v51 = vld [vmem:[%s10351_s3 + $0xb28] sm:$0xff] }
 0x19c   :  { %5666 = vmatprep.subr.mxu0 %v1841_v52  ;;  %5699 = vmatprep.subr.mxu1 %v1874_v56  ;;  %v1907_v52 = vld [vmem:[%s10351_s3 + $0xa98] sm:$0xff] }
 0x19d   :  { %5667 = vmatpush3.msra.mxu0 %v1825_v61  ;;  %5700 = vmatpush3.msra.mxu1 %v1858_v62  ;;  %v1891_v56 = vld [vmem:[%s10351_s3 + $0xa18] sm:$0xff]  ;;  %v1924_v61 = vld [vmem:[%s10351_s3 + $0xb20] sm:$0xff]  ;;  %v1906_v62 = vld [vmem:[%s10351_s3 + $0xa90] sm:$0xff] }
 0x19e   :  { %5668 = vmatprep.subr.mxu0 %v1840_v63  ;;  %5701 = vmatprep.subr.mxu1 %v1873_v57  ;;  %v1939_v63 = vld [vmem:[%s10351_s3 + $0xb98] sm:$0xff]  ;;  %v1890_v57 = vld [vmem:[%s10351_s3 + $0xa10] sm:$0xff] }
 0x19f   :  { %5669 = vmatpush3.msra.mxu0 %v1824_v60  ;;  %5702 = vmatpush3.msra.mxu1 %v1857_v48  ;;  %v1923_v60 = vld [vmem:[%s10351_s3 + $0xb18] sm:$0xff]  ;;  %v1558_v48 = vld [vmem:[#allocation2 + $0x30] sm:$0xff] }
 0x1a0   :  { %3576 = vmatmul.mubr.f32.vlgmr.msra.gmra.mxu0 %v7872_v53  ;;  %5703 = vmatprep.subr.mxu1 %v1872_v5  ;;  %v1902_v53 = vld [vmem:[%s10351_s3 + $0xa70] sm:$0xff] }
 0x1a1   :  { %5708 = vmatprep.subr.mxu0 %v1919_v2  ;;  %5704 = vmatpush3.msra.mxu1 %v1856_v7  ;;  %v1938_v5 = vld [vmem:[%s10351_s3 + $0xb90] sm:$0xff]  ;;  %v1889_v2 = vld [vmem:[%s10351_s3 + $0xa08] sm:$0xff] }
 0x1a2   :  { %5709 = vmatpush3.msra.mxu0 %v1903_v12  ;;  %3715 = vmatprep.mubr.f32.mxu0 %v2715_v8  ;;  %v1922_v7 = vld [vmem:[%s10351_s3 + $0xb10] sm:$0xff]  ;;  %v1904_v12 = vld [vmem:[%s10351_s3 + $0xa80] sm:$0xff]  ;;  %v1937_v8 = vld [vmem:[%s10351_s3 + $0xb88] sm:$0xff] }
 0x1a3   :  { %3646 = vmatmul.mubr.f32.vlgmr.msra.gmra.mxu1 %v7888_v41  ;;  %5710 = vmatprep.subr.mxu0 %v1918_v9  ;;  %v1934_v41 = vld [vmem:[%s10351_s3 + $0xb70] sm:$0xff]  ;;  %v1888_v9 = vld [vmem:[%s10351_s3 + $0xa00] sm:$0xff] }
 0x1a4   :  { %5743 = vmatprep.subr.mxu1 %v1951_v11  ;;  %5711 = vmatpush3.msra.mxu0 %v1902_v53  ;;  %v2717_v11 = vcombine.high %v1558_v48, %v1558_v48  ;;  %v1921_v53 = vld [vmem:[%s10351_s3 + $0xb08] sm:$0xff] }
 0x1a5   :  { %5744 = vmatpush3.msra.mxu1 %v1935_v13  ;;  %3785 = vmatprep.mubr.f32.mxu1 %v2716_v46  ;;  %v8280_v13 = vrot.slane %v1558_v48, %v7223_v0  ;;  %v1983_v46 = vld [vmem:[%s10351_s3 + $0xcf8] sm:$0xff]  ;;  %v2004_v48 = vld [vmem:[%s10351_s3 + $0xda0] sm:$0xff] }
 0x1a6   :  { %5712 = vmatprep.subr.mxu0 %v1917_v14  ;;  %5745 = vmatprep.subr.mxu1 %v1950_v47  ;;  %v1936_v14 = vld [vmem:[%s10351_s3 + $0xb80] sm:$0xff] }
 0x1a7   :  { %5713 = vmatpush3.msra.mxu0 %v1901_v17  ;;  %5746 = vmatpush3.msra.mxu1 %v1934_v41  ;;  %v1920_v47 = vld [vmem:[%s10351_s3 + $0xb00] sm:$0xff]  ;;  %v1967_v17 = vld [vmem:[%s10351_s3 + $0xc78] sm:$0xff]  ;;  %v8296_v41 = vrot.slane %v2717_v11, %v7223_v0  ;;  %v1969_v11 = vld [vmem:[%s10351_s3 + $0xc88] sm:$0xff] }
 0x1a8   :  { %5714 = vmatprep.subr.mxu0 %v1916_v18  ;;  %5747 = vmatprep.subr.mxu1 %v1949_v19  ;;  %v2732_v18 = vcombine.high %v8280_v13, %v8280_v13  ;;  %v1982_v19 = vld [vmem:[%s10351_s3 + $0xcf0] sm:$0xff] }
 0x1a9   :  { %5715 = vmatpush3.msra.mxu0 %v1900_v20  ;;  %5748 = vmatpush3.msra.mxu1 %v1933_v21  ;;  %v2015_v20 = vld [vmem:[%s10351_s3 + $0xdf8] sm:$0xff] }
 0x1aa   :  { %5716 = vmatprep.subr.mxu0 %v1915_v54  ;;  %5749 = vmatprep.subr.mxu1 %v1948_v55  ;;  %v1999_v21 = vld [vmem:[%s10351_s3 + $0xd78] sm:$0xff]  ;;  %v1981_v54 = vld [vmem:[%s10351_s3 + $0xce8] sm:$0xff]  ;;  %v2733_v55 = vcombine.high %v8296_v41, %v8296_v41 }
 0x1ab   :  { %5717 = vmatpush3.msra.mxu0 %v1899_v22  ;;  %5750 = vmatpush3.msra.mxu1 %v1932_v23  ;;  %v2014_v22 = vld [vmem:[%s10351_s3 + $0xdf0] sm:$0xff]  ;;  %v1965_v23 = vld [vmem:[%s10351_s3 + $0xc68] sm:$0xff] }
 0x1ac   :  { %5718 = vmatprep.subr.mxu0 %v1914_v24  ;;  %5751 = vmatprep.subr.mxu1 %v1947_v1  ;;  %v1980_v24 = vld [vmem:[%s10351_s3 + $0xce0] sm:$0xff]  ;;  %v2013_v1 = vld [vmem:[%s10351_s3 + $0xde8] sm:$0xff] }
 0x1ad   :  { %5719 = vmatpush3.msra.mxu0 %v1898_v29  ;;  %5752 = vmatpush3.msra.mxu1 %v1931_v30  ;;  %v1964_v29 = vld [vmem:[%s10351_s3 + $0xc60] sm:$0xff]  ;;  %v1997_v30 = vld [vmem:[%s10351_s3 + $0xd68] sm:$0xff] }
 0x1ae   :  { %5720 = vmatprep.subr.mxu0 %v1913_v31  ;;  %5753 = vmatprep.subr.mxu1 %v1946_v32  ;;  %v1979_v31 = vld [vmem:[%s10351_s3 + $0xcd8] sm:$0xff]  ;;  %v2012_v32 = vld [vmem:[%s10351_s3 + $0xde0] sm:$0xff] }
 0x1af   :  { %5721 = vmatpush3.msra.mxu0 %v1897_v33  ;;  %5754 = vmatpush3.msra.mxu1 %v1930_v4  ;;  %v1963_v33 = vld [vmem:[%s10351_s3 + $0xc58] sm:$0xff]  ;;  %v1996_v4 = vld [vmem:[%s10351_s3 + $0xd60] sm:$0xff] }
 0x1b0   :  { %5722 = vmatprep.subr.mxu0 %v1912_v6  ;;  %5755 = vmatprep.subr.mxu1 %v1945_v59  ;;  %v1978_v6 = vld [vmem:[%s10351_s3 + $0xcd0] sm:$0xff]  ;;  %v2011_v59 = vld [vmem:[%s10351_s3 + $0xdd8] sm:$0xff] }
 0x1b1   :  { %5723 = vmatpush3.msra.mxu0 %v1896_v10  ;;  %5756 = vmatpush3.msra.mxu1 %v1929_v34  ;;  %v1962_v10 = vld [vmem:[%s10351_s3 + $0xc50] sm:$0xff]  ;;  %v1995_v34 = vld [vmem:[%s10351_s3 + $0xd58] sm:$0xff] }
 0x1b2   :  { %5724 = vmatprep.subr.mxu0 %v1911_v40  ;;  %5757 = vmatprep.subr.mxu1 %v1944_v35  ;;  %v1977_v40 = vld [vmem:[%s10351_s3 + $0xcc8] sm:$0xff]  ;;  %v2010_v35 = vld [vmem:[%s10351_s3 + $0xdd0] sm:$0xff] }
 0x1b3   :  { %5725 = vmatpush3.msra.mxu0 %v1895_v36  ;;  %5758 = vmatpush3.msra.mxu1 %v1928_v15  ;;  %v1961_v36 = vld [vmem:[%s10351_s3 + $0xc48] sm:$0xff]  ;;  %v1994_v15 = vld [vmem:[%s10351_s3 + $0xd50] sm:$0xff] }
 0x1b4   :  { %5726 = vmatprep.subr.mxu0 %v1910_v16  ;;  %5759 = vmatprep.subr.mxu1 %v1943_v39  ;;  %v1976_v16 = vld [vmem:[%s10351_s3 + $0xcc0] sm:$0xff]  ;;  %v2009_v39 = vld [vmem:[%s10351_s3 + $0xdc8] sm:$0xff] }
 0x1b5   :  { %5727 = vmatpush3.msra.mxu0 %v1894_v43  ;;  %5760 = vmatpush3.msra.mxu1 %v1927_v44  ;;  %v1960_v43 = vld [vmem:[%s10351_s3 + $0xc40] sm:$0xff]  ;;  %v1993_v44 = vld [vmem:[%s10351_s3 + $0xd48] sm:$0xff] }
 0x1b6   :  { %5728 = vmatprep.subr.mxu0 %v1909_v45  ;;  %5761 = vmatprep.subr.mxu1 %v1942_v25  ;;  %v1975_v45 = vld [vmem:[%s10351_s3 + $0xcb8] sm:$0xff]  ;;  %v2008_v25 = vld [vmem:[%s10351_s3 + $0xdc0] sm:$0xff] }
 0x1b7   :  { %5729 = vmatpush3.msra.mxu0 %v1893_v42  ;;  %5762 = vmatpush3.msra.mxu1 %v1926_v49  ;;  %v1959_v42 = vld [vmem:[%s10351_s3 + $0xc38] sm:$0xff]  ;;  %v1992_v49 = vld [vmem:[%s10351_s3 + $0xd40] sm:$0xff] }
 0x1b8   :  { %5730 = vmatprep.subr.mxu0 %v1908_v50  ;;  %5763 = vmatprep.subr.mxu1 %v1941_v27  ;;  %v1974_v50 = vld [vmem:[%s10351_s3 + $0xcb0] sm:$0xff]  ;;  %v2007_v27 = vld [vmem:[%s10351_s3 + $0xdb8] sm:$0xff] }
 0x1b9   :  { %5731 = vmatpush3.msra.mxu0 %v1892_v28  ;;  %5764 = vmatpush3.msra.mxu1 %v1925_v51  ;;  %v1958_v28 = vld [vmem:[%s10351_s3 + $0xc30] sm:$0xff]  ;;  %v1991_v51 = vld [vmem:[%s10351_s3 + $0xd38] sm:$0xff] }
 0x1ba   :  { %5732 = vmatprep.subr.mxu0 %v1907_v52  ;;  %5765 = vmatprep.subr.mxu1 %v1940_v26  ;;  %v1973_v52 = vld [vmem:[%s10351_s3 + $0xca8] sm:$0xff]  ;;  %v2006_v26 = vld [vmem:[%s10351_s3 + $0xdb0] sm:$0xff] }
 0x1bb   :  { %5733 = vmatpush3.msra.mxu0 %v1891_v56  ;;  %5766 = vmatpush3.msra.mxu1 %v1924_v61  ;;  %v1957_v56 = vld [vmem:[%s10351_s3 + $0xc28] sm:$0xff]  ;;  %v1990_v61 = vld [vmem:[%s10351_s3 + $0xd30] sm:$0xff] }
 0x1bc   :  { %5734 = vmatprep.subr.mxu0 %v1906_v62  ;;  %5767 = vmatprep.subr.mxu1 %v1939_v63  ;;  %v1972_v62 = vld [vmem:[%s10351_s3 + $0xca0] sm:$0xff]  ;;  %v2005_v63 = vld [vmem:[%s10351_s3 + $0xda8] sm:$0xff] }
 0x1bd   :  { %5735 = vmatpush3.msra.mxu0 %v1890_v57  ;;  %5768 = vmatpush3.msra.mxu1 %v1923_v60  ;;  %v1956_v57 = vld [vmem:[%s10351_s3 + $0xc20] sm:$0xff]  ;;  %v1989_v60 = vld [vmem:[%s10351_s3 + $0xd28] sm:$0xff] }
 0x1be   :  { %5736 = vmatprep.subr.mxu0 %v1905_v37  ;;  %5769 = vmatprep.subr.mxu1 %v1938_v5  ;;  %v1971_v37 = vld [vmem:[%s10351_s3 + $0xc98] sm:$0xff] }
 0x1bf   :  { %5737 = vmatpush3.msra.mxu0 %v1889_v2  ;;  %5770 = vmatpush3.msra.mxu1 %v1922_v7  ;;  %v1955_v5 = vld [vmem:[%s10351_s3 + $0xc18] sm:$0xff]  ;;  %v1988_v2 = vld [vmem:[%s10351_s3 + $0xd20] sm:$0xff]  ;;  %v1970_v7 = vld [vmem:[%s10351_s3 + $0xc90] sm:$0xff] }
 0x1c0   :  { %5738 = vmatprep.subr.mxu0 %v1904_v12  ;;  %5771 = vmatprep.subr.mxu1 %v1937_v8  ;;  %v2003_v12 = vld [vmem:[%s10351_s3 + $0xd98] sm:$0xff]  ;;  %v1954_v8 = vld [vmem:[%s10351_s3 + $0xc10] sm:$0xff] }
 0x1c1   :  { %5739 = vmatpush3.msra.mxu0 %v1888_v9  ;;  %5772 = vmatpush3.msra.mxu1 %v1921_v53  ;;  %v1987_v9 = vld [vmem:[%s10351_s3 + $0xd18] sm:$0xff] }
 0x1c2   :  { %3716 = vmatmul.mubr.f32.vlgmr.msra.gmra.mxu0 %v8076_v38  ;;  %5773 = vmatprep.subr.mxu1 %v1936_v14  ;;  %v1966_v38 = vld [vmem:[%s10351_s3 + $0xc70] sm:$0xff]  ;;  %v1559_v53 = vld [vmem:[#allocation2 + $0x38] sm:$0xff] }
 0x1c3   :  { %5778 = vmatprep.subr.mxu0 %v1983_v46  ;;  %5774 = vmatpush3.msra.mxu1 %v1920_v47  ;;  %v2002_v14 = vld [vmem:[%s10351_s3 + $0xd90] sm:$0xff]  ;;  %v1953_v46 = vld [vmem:[%s10351_s3 + $0xc08] sm:$0xff] }
 0x1c4   :  { %5779 = vmatpush3.msra.mxu0 %v1967_v17  ;;  %3855 = vmatprep.mubr.f32.mxu0 %v2732_v18  ;;  %v1986_v47 = vld [vmem:[%s10351_s3 + $0xd10] sm:$0xff]  ;;  %v1968_v17 = vld [vmem:[%s10351_s3 + $0xc80] sm:$0xff]  ;;  %v2001_v18 = vld [vmem:[%s10351_s3 + $0xd88] sm:$0xff] }
 0x1c5   :  { %3786 = vmatmul.mubr.f32.vlgmr.msra.gmra.mxu1 %v8092_v58  ;;  %5780 = vmatprep.subr.mxu0 %v1982_v19  ;;  %v1998_v58 = vld [vmem:[%s10351_s3 + $0xd70] sm:$0xff]  ;;  %v1952_v19 = vld [vmem:[%s10351_s3 + $0xc00] sm:$0xff] }
 0x1c6   :  { %5813 = vmatprep.subr.mxu1 %v2015_v20  ;;  %5781 = vmatpush3.msra.mxu0 %v1966_v38  ;;  %v2734_v20 = vcombine.high %v1559_v53, %v1559_v53  ;;  %v1985_v38 = vld [vmem:[%s10351_s3 + $0xd08] sm:$0xff] }
 0x1c7   :  { %5814 = vmatpush3.msra.mxu1 %v1999_v21  ;;  %3925 = vmatprep.mubr.f32.mxu1 %v2733_v55  ;;  %v8484_v21 = vrot.slane %v1559_v53, %v7223_v0  ;;  %v2047_v55 = vld [vmem:[%s10351_s3 + $0xef8] sm:$0xff]  ;;  %v2068_v53 = vld [vmem:[%s10351_s3 + $0xfa0] sm:$0xff] }
 0x1c8   :  { %5782 = vmatprep.subr.mxu0 %v1981_v54  ;;  %5815 = vmatprep.subr.mxu1 %v2014_v22  ;;  %v2000_v54 = vld [vmem:[%s10351_s3 + $0xd80] sm:$0xff] }
 0x1c9   :  { %5783 = vmatpush3.msra.mxu0 %v1965_v23  ;;  %5816 = vmatpush3.msra.mxu1 %v1998_v58  ;;  %v1984_v22 = vld [vmem:[%s10351_s3 + $0xd00] sm:$0xff]  ;;  %v2031_v23 = vld [vmem:[%s10351_s3 + $0xe78] sm:$0xff]  ;;  %v8500_v58 = vrot.slane %v2734_v20, %v7223_v0  ;;  %v2033_v20 = vld [vmem:[%s10351_s3 + $0xe88] sm:$0xff] }
 0x1ca   :  { %5784 = vmatprep.subr.mxu0 %v1980_v24  ;;  %5817 = vmatprep.subr.mxu1 %v2013_v1  ;;  %v2749_v24 = vcombine.high %v8484_v21, %v8484_v21  ;;  %v2046_v1 = vld [vmem:[%s10351_s3 + $0xef0] sm:$0xff] }
 0x1cb   :  { %5785 = vmatpush3.msra.mxu0 %v1964_v29  ;;  %5818 = vmatpush3.msra.mxu1 %v1997_v30  ;;  %v2079_v29 = vld [vmem:[%s10351_s3 + $0xff8] sm:$0xff] }
 0x1cc   :  { %5786 = vmatprep.subr.mxu0 %v1979_v31  ;;  %5819 = vmatprep.subr.mxu1 %v2012_v32  ;;  %v2063_v30 = vld [vmem:[%s10351_s3 + $0xf78] sm:$0xff]  ;;  %v2045_v31 = vld [vmem:[%s10351_s3 + $0xee8] sm:$0xff]  ;;  %v2750_v32 = vcombine.high %v8500_v58, %v8500_v58 }
 0x1cd   :  { %5787 = vmatpush3.msra.mxu0 %v1963_v33  ;;  %5820 = vmatpush3.msra.mxu1 %v1996_v4  ;;  %v2078_v33 = vld [vmem:[%s10351_s3 + $0xff0] sm:$0xff]  ;;  %v2029_v4 = vld [vmem:[%s10351_s3 + $0xe68] sm:$0xff] }
 0x1ce   :  { %5788 = vmatprep.subr.mxu0 %v1978_v6  ;;  %5821 = vmatprep.subr.mxu1 %v2011_v59  ;;  %v2044_v6 = vld [vmem:[%s10351_s3 + $0xee0] sm:$0xff]  ;;  %v2077_v59 = vld [vmem:[%s10351_s3 + $0xfe8] sm:$0xff] }
 0x1cf   :  { %5789 = vmatpush3.msra.mxu0 %v1962_v10  ;;  %5822 = vmatpush3.msra.mxu1 %v1995_v34  ;;  %v2028_v10 = vld [vmem:[%s10351_s3 + $0xe60] sm:$0xff]  ;;  %v2061_v34 = vld [vmem:[%s10351_s3 + $0xf68] sm:$0xff] }
 0x1d0   :  { %5790 = vmatprep.subr.mxu0 %v1977_v40  ;;  %5823 = vmatprep.subr.mxu1 %v2010_v35  ;;  %v2043_v40 = vld [vmem:[%s10351_s3 + $0xed8] sm:$0xff]  ;;  %v2076_v35 = vld [vmem:[%s10351_s3 + $0xfe0] sm:$0xff] }
 0x1d1   :  { %5791 = vmatpush3.msra.mxu0 %v1961_v36  ;;  %5824 = vmatpush3.msra.mxu1 %v1994_v15  ;;  %v2027_v36 = vld [vmem:[%s10351_s3 + $0xe58] sm:$0xff]  ;;  %v2060_v15 = vld [vmem:[%s10351_s3 + $0xf60] sm:$0xff] }
 0x1d2   :  { %5792 = vmatprep.subr.mxu0 %v1976_v16  ;;  %5825 = vmatprep.subr.mxu1 %v2009_v39  ;;  %v2042_v16 = vld [vmem:[%s10351_s3 + $0xed0] sm:$0xff]  ;;  %v2075_v39 = vld [vmem:[%s10351_s3 + $0xfd8] sm:$0xff] }
 0x1d3   :  { %5793 = vmatpush3.msra.mxu0 %v1960_v43  ;;  %5826 = vmatpush3.msra.mxu1 %v1993_v44  ;;  %v2026_v43 = vld [vmem:[%s10351_s3 + $0xe50] sm:$0xff]  ;;  %v2059_v44 = vld [vmem:[%s10351_s3 + $0xf58] sm:$0xff] }
 0x1d4   :  { %5794 = vmatprep.subr.mxu0 %v1975_v45  ;;  %5827 = vmatprep.subr.mxu1 %v2008_v25  ;;  %v2041_v45 = vld [vmem:[%s10351_s3 + $0xec8] sm:$0xff]  ;;  %v2074_v25 = vld [vmem:[%s10351_s3 + $0xfd0] sm:$0xff] }
 0x1d5   :  { %5795 = vmatpush3.msra.mxu0 %v1959_v42  ;;  %5828 = vmatpush3.msra.mxu1 %v1992_v49  ;;  %v2025_v42 = vld [vmem:[%s10351_s3 + $0xe48] sm:$0xff]  ;;  %v2058_v49 = vld [vmem:[%s10351_s3 + $0xf50] sm:$0xff] }
 0x1d6   :  { %5796 = vmatprep.subr.mxu0 %v1974_v50  ;;  %5829 = vmatprep.subr.mxu1 %v2007_v27  ;;  %v2040_v50 = vld [vmem:[%s10351_s3 + $0xec0] sm:$0xff]  ;;  %v2073_v27 = vld [vmem:[%s10351_s3 + $0xfc8] sm:$0xff] }
 0x1d7   :  { %5797 = vmatpush3.msra.mxu0 %v1958_v28  ;;  %5830 = vmatpush3.msra.mxu1 %v1991_v51  ;;  %v2024_v28 = vld [vmem:[%s10351_s3 + $0xe40] sm:$0xff]  ;;  %v2057_v51 = vld [vmem:[%s10351_s3 + $0xf48] sm:$0xff] }
 0x1d8   :  { %5798 = vmatprep.subr.mxu0 %v1973_v52  ;;  %5831 = vmatprep.subr.mxu1 %v2006_v26  ;;  %v2039_v52 = vld [vmem:[%s10351_s3 + $0xeb8] sm:$0xff]  ;;  %v2072_v26 = vld [vmem:[%s10351_s3 + $0xfc0] sm:$0xff] }
 0x1d9   :  { %5799 = vmatpush3.msra.mxu0 %v1957_v56  ;;  %5832 = vmatpush3.msra.mxu1 %v1990_v61  ;;  %v2023_v56 = vld [vmem:[%s10351_s3 + $0xe38] sm:$0xff]  ;;  %v2056_v61 = vld [vmem:[%s10351_s3 + $0xf40] sm:$0xff] }
 0x1da   :  { %5800 = vmatprep.subr.mxu0 %v1972_v62  ;;  %5833 = vmatprep.subr.mxu1 %v2005_v63  ;;  %v2038_v62 = vld [vmem:[%s10351_s3 + $0xeb0] sm:$0xff]  ;;  %v2071_v63 = vld [vmem:[%s10351_s3 + $0xfb8] sm:$0xff] }
 0x1db   :  { %5801 = vmatpush3.msra.mxu0 %v1956_v57  ;;  %5834 = vmatpush3.msra.mxu1 %v1989_v60  ;;  %v2022_v57 = vld [vmem:[%s10351_s3 + $0xe30] sm:$0xff]  ;;  %v2055_v60 = vld [vmem:[%s10351_s3 + $0xf38] sm:$0xff] }
 0x1dc   :  { %5802 = vmatprep.subr.mxu0 %v1971_v37  ;;  %5835 = vmatprep.subr.mxu1 %v2004_v48  ;;  %v2037_v37 = vld [vmem:[%s10351_s3 + $0xea8] sm:$0xff]  ;;  %v2070_v48 = vld [vmem:[%s10351_s3 + $0xfb0] sm:$0xff] }
 0x1dd   :  { %5803 = vmatpush3.msra.mxu0 %v1955_v5  ;;  %5836 = vmatpush3.msra.mxu1 %v1988_v2  ;;  %v2021_v5 = vld [vmem:[%s10351_s3 + $0xe28] sm:$0xff]  ;;  %v2054_v2 = vld [vmem:[%s10351_s3 + $0xf30] sm:$0xff] }
 0x1de   :  { %5804 = vmatprep.subr.mxu0 %v1970_v7  ;;  %5837 = vmatprep.subr.mxu1 %v2003_v12  ;;  %v2036_v7 = vld [vmem:[%s10351_s3 + $0xea0] sm:$0xff]  ;;  %v2069_v12 = vld [vmem:[%s10351_s3 + $0xfa8] sm:$0xff] }
 0x1df   :  { %5805 = vmatpush3.msra.mxu0 %v1954_v8  ;;  %5838 = vmatpush3.msra.mxu1 %v1987_v9  ;;  %v2020_v8 = vld [vmem:[%s10351_s3 + $0xe20] sm:$0xff]  ;;  %v2053_v9 = vld [vmem:[%s10351_s3 + $0xf28] sm:$0xff] }
 0x1e0   :  { %5806 = vmatprep.subr.mxu0 %v1969_v11  ;;  %5839 = vmatprep.subr.mxu1 %v2002_v14  ;;  %v2035_v11 = vld [vmem:[%s10351_s3 + $0xe98] sm:$0xff] }
 0x1e1   :  { %5807 = vmatpush3.msra.mxu0 %v1953_v46  ;;  %5840 = vmatpush3.msra.mxu1 %v1986_v47  ;;  %v2019_v14 = vld [vmem:[%s10351_s3 + $0xe18] sm:$0xff]  ;;  %v2052_v46 = vld [vmem:[%s10351_s3 + $0xf20] sm:$0xff]  ;;  %v2034_v47 = vld [vmem:[%s10351_s3 + $0xe90] sm:$0xff] }
 0x1e2   :  { %5808 = vmatprep.subr.mxu0 %v1968_v17  ;;  %5841 = vmatprep.subr.mxu1 %v2001_v18  ;;  %v2067_v17 = vld [vmem:[%s10351_s3 + $0xf98] sm:$0xff]  ;;  %v2018_v18 = vld [vmem:[%s10351_s3 + $0xe10] sm:$0xff] }
 0x1e3   :  { %5809 = vmatpush3.msra.mxu0 %v1952_v19  ;;  %5842 = vmatpush3.msra.mxu1 %v1985_v38  ;;  %v2051_v19 = vld [vmem:[%s10351_s3 + $0xf18] sm:$0xff]  ;;  %v1560_v38 = vld [vmem:[#allocation2 + $0x40] sm:$0xff] }
 0x1e4   :  { %3856 = vmatmul.mubr.f32.vlgmr.msra.gmra.mxu0 %v8280_v13  ;;  %5843 = vmatprep.subr.mxu1 %v2000_v54  ;;  %v2030_v13 = vld [vmem:[%s10351_s3 + $0xe70] sm:$0xff] }
 0x1e5   :  { %5848 = vmatprep.subr.mxu0 %v2047_v55  ;;  %5844 = vmatpush3.msra.mxu1 %v1984_v22  ;;  %v2066_v54 = vld [vmem:[%s10351_s3 + $0xf90] sm:$0xff]  ;;  %v2017_v55 = vld [vmem:[%s10351_s3 + $0xe08] sm:$0xff] }
 0x1e6   :  { %5849 = vmatpush3.msra.mxu0 %v2031_v23  ;;  %3995 = vmatprep.mubr.f32.mxu0 %v2749_v24  ;;  %v2050_v22 = vld [vmem:[%s10351_s3 + $0xf10] sm:$0xff]  ;;  %v2032_v23 = vld [vmem:[%s10351_s3 + $0xe80] sm:$0xff]  ;;  %v2065_v24 = vld [vmem:[%s10351_s3 + $0xf88] sm:$0xff] }
 0x1e7   :  { %3926 = vmatmul.mubr.f32.vlgmr.msra.gmra.mxu1 %v8296_v41  ;;  %5850 = vmatprep.subr.mxu0 %v2046_v1  ;;  %v2062_v41 = vld [vmem:[%s10351_s3 + $0xf70] sm:$0xff]  ;;  %v2016_v1 = vld [vmem:[%s10351_s3 + $0xe00] sm:$0xff] }
 0x1e8   :  { %5883 = vmatprep.subr.mxu1 %v2079_v29  ;;  %5851 = vmatpush3.msra.mxu0 %v2030_v13  ;;  %v2751_v29 = vcombine.high %v1560_v38, %v1560_v38  ;;  %v2049_v13 = vld [vmem:[%s10351_s3 + $0xf08] sm:$0xff] }
 0x1e9   :  { %5884 = vmatpush3.msra.mxu1 %v2063_v30  ;;  %4065 = vmatprep.mubr.f32.mxu1 %v2750_v32  ;;  %v8688_v30 = vrot.slane %v1560_v38, %v7223_v0  ;;  %v2111_v32 = vld [vmem:[%s10351_s3 + $0x10f8] sm:$0xff]  ;;  %v2132_v38 = vld [vmem:[%s10351_s3 + $0x11a0] sm:$0xff] }
 0x1ea   :  { %5852 = vmatprep.subr.mxu0 %v2045_v31  ;;  %5885 = vmatprep.subr.mxu1 %v2078_v33  ;;  %v2064_v31 = vld [vmem:[%s10351_s3 + $0xf80] sm:$0xff] }
 0x1eb   :  { %5853 = vmatpush3.msra.mxu0 %v2029_v4  ;;  %5886 = vmatpush3.msra.mxu1 %v2062_v41  ;;  %v2048_v33 = vld [vmem:[%s10351_s3 + $0xf00] sm:$0xff]  ;;  %v2095_v4 = vld [vmem:[%s10351_s3 + $0x1078] sm:$0xff]  ;;  %v8704_v41 = vrot.slane %v2751_v29, %v7223_v0  ;;  %v2097_v29 = vld [vmem:[%s10351_s3 + $0x1088] sm:$0xff] }
 0x1ec   :  { %5854 = vmatprep.subr.mxu0 %v2044_v6  ;;  %5887 = vmatprep.subr.mxu1 %v2077_v59  ;;  %v2766_v6 = vcombine.high %v8688_v30, %v8688_v30  ;;  %v2110_v59 = vld [vmem:[%s10351_s3 + $0x10f0] sm:$0xff] }
 0x1ed   :  { %5855 = vmatpush3.msra.mxu0 %v2028_v10  ;;  %5888 = vmatpush3.msra.mxu1 %v2061_v34  ;;  %v2143_v10 = vld [vmem:[%s10351_s3 + $0x11f8] sm:$0xff] }
 0x1ee   :  { %5856 = vmatprep.subr.mxu0 %v2043_v40  ;;  %5889 = vmatprep.subr.mxu1 %v2076_v35  ;;  %v2127_v34 = vld [vmem:[%s10351_s3 + $0x1178] sm:$0xff]  ;;  %v2109_v40 = vld [vmem:[%s10351_s3 + $0x10e8] sm:$0xff]  ;;  %v2767_v35 = vcombine.high %v8704_v41, %v8704_v41 }
 0x1ef   :  { %5857 = vmatpush3.msra.mxu0 %v2027_v36  ;;  %5890 = vmatpush3.msra.mxu1 %v2060_v15  ;;  %v2142_v36 = vld [vmem:[%s10351_s3 + $0x11f0] sm:$0xff]  ;;  %v2093_v15 = vld [vmem:[%s10351_s3 + $0x1068] sm:$0xff] }
 0x1f0   :  { %5858 = vmatprep.subr.mxu0 %v2042_v16  ;;  %5891 = vmatprep.subr.mxu1 %v2075_v39  ;;  %v2108_v16 = vld [vmem:[%s10351_s3 + $0x10e0] sm:$0xff]  ;;  %v2141_v39 = vld [vmem:[%s10351_s3 + $0x11e8] sm:$0xff] }
 0x1f1   :  { %5859 = vmatpush3.msra.mxu0 %v2026_v43  ;;  %5892 = vmatpush3.msra.mxu1 %v2059_v44  ;;  %v2092_v43 = vld [vmem:[%s10351_s3 + $0x1060] sm:$0xff]  ;;  %v2125_v44 = vld [vmem:[%s10351_s3 + $0x1168] sm:$0xff] }
 0x1f2   :  { %5860 = vmatprep.subr.mxu0 %v2041_v45  ;;  %5893 = vmatprep.subr.mxu1 %v2074_v25  ;;  %v2107_v45 = vld [vmem:[%s10351_s3 + $0x10d8] sm:$0xff]  ;;  %v2140_v25 = vld [vmem:[%s10351_s3 + $0x11e0] sm:$0xff] }
 0x1f3   :  { %5861 = vmatpush3.msra.mxu0 %v2025_v42  ;;  %5894 = vmatpush3.msra.mxu1 %v2058_v49  ;;  %v2091_v42 = vld [vmem:[%s10351_s3 + $0x1058] sm:$0xff]  ;;  %v2124_v49 = vld [vmem:[%s10351_s3 + $0x1160] sm:$0xff] }
 0x1f4   :  { %5862 = vmatprep.subr.mxu0 %v2040_v50  ;;  %5895 = vmatprep.subr.mxu1 %v2073_v27  ;;  %v2106_v50 = vld [vmem:[%s10351_s3 + $0x10d0] sm:$0xff]  ;;  %v2139_v27 = vld [vmem:[%s10351_s3 + $0x11d8] sm:$0xff] }
 0x1f5   :  { %5863 = vmatpush3.msra.mxu0 %v2024_v28  ;;  %5896 = vmatpush3.msra.mxu1 %v2057_v51  ;;  %v2090_v28 = vld [vmem:[%s10351_s3 + $0x1050] sm:$0xff]  ;;  %v2123_v51 = vld [vmem:[%s10351_s3 + $0x1158] sm:$0xff] }
 0x1f6   :  { %5864 = vmatprep.subr.mxu0 %v2039_v52  ;;  %5897 = vmatprep.subr.mxu1 %v2072_v26  ;;  %v2105_v52 = vld [vmem:[%s10351_s3 + $0x10c8] sm:$0xff]  ;;  %v2138_v26 = vld [vmem:[%s10351_s3 + $0x11d0] sm:$0xff] }
 0x1f7   :  { %5865 = vmatpush3.msra.mxu0 %v2023_v56  ;;  %5898 = vmatpush3.msra.mxu1 %v2056_v61  ;;  %v2089_v56 = vld [vmem:[%s10351_s3 + $0x1048] sm:$0xff]  ;;  %v2122_v61 = vld [vmem:[%s10351_s3 + $0x1150] sm:$0xff] }
 0x1f8   :  { %5866 = vmatprep.subr.mxu0 %v2038_v62  ;;  %5899 = vmatprep.subr.mxu1 %v2071_v63  ;;  %v2104_v62 = vld [vmem:[%s10351_s3 + $0x10c0] sm:$0xff]  ;;  %v2137_v63 = vld [vmem:[%s10351_s3 + $0x11c8] sm:$0xff] }
 0x1f9   :  { %5867 = vmatpush3.msra.mxu0 %v2022_v57  ;;  %5900 = vmatpush3.msra.mxu1 %v2055_v60  ;;  %v2088_v57 = vld [vmem:[%s10351_s3 + $0x1040] sm:$0xff]  ;;  %v2121_v60 = vld [vmem:[%s10351_s3 + $0x1148] sm:$0xff] }
 0x1fa   :  { %5868 = vmatprep.subr.mxu0 %v2037_v37  ;;  %5901 = vmatprep.subr.mxu1 %v2070_v48  ;;  %v2103_v37 = vld [vmem:[%s10351_s3 + $0x10b8] sm:$0xff]  ;;  %v2136_v48 = vld [vmem:[%s10351_s3 + $0x11c0] sm:$0xff] }
 0x1fb   :  { %5869 = vmatpush3.msra.mxu0 %v2021_v5  ;;  %5902 = vmatpush3.msra.mxu1 %v2054_v2  ;;  %v2087_v5 = vld [vmem:[%s10351_s3 + $0x1038] sm:$0xff]  ;;  %v2120_v2 = vld [vmem:[%s10351_s3 + $0x1140] sm:$0xff] }
 0x1fc   :  { %5870 = vmatprep.subr.mxu0 %v2036_v7  ;;  %5903 = vmatprep.subr.mxu1 %v2069_v12  ;;  %v2102_v7 = vld [vmem:[%s10351_s3 + $0x10b0] sm:$0xff]  ;;  %v2135_v12 = vld [vmem:[%s10351_s3 + $0x11b8] sm:$0xff] }
 0x1fd   :  { %5871 = vmatpush3.msra.mxu0 %v2020_v8  ;;  %5904 = vmatpush3.msra.mxu1 %v2053_v9  ;;  %v2086_v8 = vld [vmem:[%s10351_s3 + $0x1030] sm:$0xff]  ;;  %v2119_v9 = vld [vmem:[%s10351_s3 + $0x1138] sm:$0xff] }
 0x1fe   :  { %5872 = vmatprep.subr.mxu0 %v2035_v11  ;;  %5905 = vmatprep.subr.mxu1 %v2068_v53  ;;  %v2101_v11 = vld [vmem:[%s10351_s3 + $0x10a8] sm:$0xff]  ;;  %v2134_v53 = vld [vmem:[%s10351_s3 + $0x11b0] sm:$0xff] }
 0x1ff   :  { %5873 = vmatpush3.msra.mxu0 %v2019_v14  ;;  %5906 = vmatpush3.msra.mxu1 %v2052_v46  ;;  %v2085_v14 = vld [vmem:[%s10351_s3 + $0x1028] sm:$0xff]  ;;  %v2118_v46 = vld [vmem:[%s10351_s3 + $0x1130] sm:$0xff] }
 0x200   :  { %5874 = vmatprep.subr.mxu0 %v2034_v47  ;;  %5907 = vmatprep.subr.mxu1 %v2067_v17  ;;  %v2100_v47 = vld [vmem:[%s10351_s3 + $0x10a0] sm:$0xff]  ;;  %v2133_v17 = vld [vmem:[%s10351_s3 + $0x11a8] sm:$0xff] }
 0x201   :  { %5875 = vmatpush3.msra.mxu0 %v2018_v18  ;;  %5908 = vmatpush3.msra.mxu1 %v2051_v19  ;;  %v2084_v18 = vld [vmem:[%s10351_s3 + $0x1020] sm:$0xff]  ;;  %v2117_v19 = vld [vmem:[%s10351_s3 + $0x1128] sm:$0xff] }
 0x202   :  { %5876 = vmatprep.subr.mxu0 %v2033_v20  ;;  %5909 = vmatprep.subr.mxu1 %v2066_v54  ;;  %v2099_v20 = vld [vmem:[%s10351_s3 + $0x1098] sm:$0xff] }
 0x203   :  { %5877 = vmatpush3.msra.mxu0 %v2017_v55  ;;  %5910 = vmatpush3.msra.mxu1 %v2050_v22  ;;  %v2083_v54 = vld [vmem:[%s10351_s3 + $0x1018] sm:$0xff]  ;;  %v2116_v55 = vld [vmem:[%s10351_s3 + $0x1120] sm:$0xff]  ;;  %v2098_v22 = vld [vmem:[%s10351_s3 + $0x1090] sm:$0xff] }
 0x204   :  { %5878 = vmatprep.subr.mxu0 %v2032_v23  ;;  %5911 = vmatprep.subr.mxu1 %v2065_v24  ;;  %v2131_v23 = vld [vmem:[%s10351_s3 + $0x1198] sm:$0xff]  ;;  %v2082_v24 = vld [vmem:[%s10351_s3 + $0x1010] sm:$0xff] }
 0x205   :  { %5879 = vmatpush3.msra.mxu0 %v2016_v1  ;;  %5912 = vmatpush3.msra.mxu1 %v2049_v13  ;;  %v2115_v1 = vld [vmem:[%s10351_s3 + $0x1118] sm:$0xff]  ;;  %v1561_v13 = vld [vmem:[#allocation2 + $0x48] sm:$0xff] }
 0x206   :  { %3996 = vmatmul.mubr.f32.vlgmr.msra.gmra.mxu0 %v8484_v21  ;;  %5913 = vmatprep.subr.mxu1 %v2064_v31  ;;  %v2094_v21 = vld [vmem:[%s10351_s3 + $0x1070] sm:$0xff] }
 0x207   :  { %5918 = vmatprep.subr.mxu0 %v2111_v32  ;;  %5914 = vmatpush3.msra.mxu1 %v2048_v33  ;;  %v2130_v31 = vld [vmem:[%s10351_s3 + $0x1190] sm:$0xff]  ;;  %v2081_v32 = vld [vmem:[%s10351_s3 + $0x1008] sm:$0xff] }
 0x208   :  { %5919 = vmatpush3.msra.mxu0 %v2095_v4  ;;  %4135 = vmatprep.mubr.f32.mxu0 %v2766_v6  ;;  %v2114_v33 = vld [vmem:[%s10351_s3 + $0x1110] sm:$0xff]  ;;  %v2096_v4 = vld [vmem:[%s10351_s3 + $0x1080] sm:$0xff]  ;;  %v2129_v6 = vld [vmem:[%s10351_s3 + $0x1188] sm:$0xff] }
 0x209   :  { %4066 = vmatmul.mubr.f32.vlgmr.msra.gmra.mxu1 %v8500_v58  ;;  %5920 = vmatprep.subr.mxu0 %v2110_v59  ;;  %v2126_v58 = vld [vmem:[%s10351_s3 + $0x1170] sm:$0xff]  ;;  %v2080_v59 = vld [vmem:[%s10351_s3 + $0x1000] sm:$0xff] }
 0x20a   :  { %5953 = vmatprep.subr.mxu1 %v2143_v10  ;;  %5921 = vmatpush3.msra.mxu0 %v2094_v21  ;;  %v2768_v10 = vcombine.high %v1561_v13, %v1561_v13  ;;  %v2113_v21 = vld [vmem:[%s10351_s3 + $0x1108] sm:$0xff] }
 0x20b   :  { %5954 = vmatpush3.msra.mxu1 %v2127_v34  ;;  %4205 = vmatprep.mubr.f32.mxu1 %v2767_v35  ;;  %v8892_v34 = vrot.slane %v1561_v13, %v7223_v0  ;;  %v2175_v35 = vld [vmem:[%s10351_s3 + $0x12f8] sm:$0xff]  ;;  %v2196_v13 = vld [vmem:[%s10351_s3 + $0x13a0] sm:$0xff] }
 0x20c   :  { %5922 = vmatprep.subr.mxu0 %v2109_v40  ;;  %5955 = vmatprep.subr.mxu1 %v2142_v36  ;;  %v2128_v40 = vld [vmem:[%s10351_s3 + $0x1180] sm:$0xff] }
 0x20d   :  { %5923 = vmatpush3.msra.mxu0 %v2093_v15  ;;  %5956 = vmatpush3.msra.mxu1 %v2126_v58  ;;  %v2112_v36 = vld [vmem:[%s10351_s3 + $0x1100] sm:$0xff]  ;;  %v2159_v15 = vld [vmem:[%s10351_s3 + $0x1278] sm:$0xff]  ;;  %v8908_v58 = vrot.slane %v2768_v10, %v7223_v0  ;;  %v2161_v10 = vld [vmem:[%s10351_s3 + $0x1288] sm:$0xff] }
 0x20e   :  { %5924 = vmatprep.subr.mxu0 %v2108_v16  ;;  %5957 = vmatprep.subr.mxu1 %v2141_v39  ;;  %v2783_v16 = vcombine.high %v8892_v34, %v8892_v34  ;;  %v2174_v39 = vld [vmem:[%s10351_s3 + $0x12f0] sm:$0xff] }
 0x20f   :  { %5925 = vmatpush3.msra.mxu0 %v2092_v43  ;;  %5958 = vmatpush3.msra.mxu1 %v2125_v44  ;;  %v2207_v43 = vld [vmem:[%s10351_s3 + $0x13f8] sm:$0xff] }
 0x210   :  { %5926 = vmatprep.subr.mxu0 %v2107_v45  ;;  %5959 = vmatprep.subr.mxu1 %v2140_v25  ;;  %v2191_v44 = vld [vmem:[%s10351_s3 + $0x1378] sm:$0xff]  ;;  %v2173_v45 = vld [vmem:[%s10351_s3 + $0x12e8] sm:$0xff]  ;;  %v2784_v25 = vcombine.high %v8908_v58, %v8908_v58 }
 0x211   :  { %5927 = vmatpush3.msra.mxu0 %v2091_v42  ;;  %5960 = vmatpush3.msra.mxu1 %v2124_v49  ;;  %v2206_v42 = vld [vmem:[%s10351_s3 + $0x13f0] sm:$0xff]  ;;  %v2157_v49 = vld [vmem:[%s10351_s3 + $0x1268] sm:$0xff] }
 0x212   :  { %5928 = vmatprep.subr.mxu0 %v2106_v50  ;;  %5961 = vmatprep.subr.mxu1 %v2139_v27  ;;  %v2172_v50 = vld [vmem:[%s10351_s3 + $0x12e0] sm:$0xff]  ;;  %v2205_v27 = vld [vmem:[%s10351_s3 + $0x13e8] sm:$0xff] }
 0x213   :  { %5929 = vmatpush3.msra.mxu0 %v2090_v28  ;;  %5962 = vmatpush3.msra.mxu1 %v2123_v51  ;;  %v2156_v28 = vld [vmem:[%s10351_s3 + $0x1260] sm:$0xff]  ;;  %v2189_v51 = vld [vmem:[%s10351_s3 + $0x1368] sm:$0xff] }
 0x214   :  { %5930 = vmatprep.subr.mxu0 %v2105_v52  ;;  %5963 = vmatprep.subr.mxu1 %v2138_v26  ;;  %v2171_v52 = vld [vmem:[%s10351_s3 + $0x12d8] sm:$0xff]  ;;  %v2204_v26 = vld [vmem:[%s10351_s3 + $0x13e0] sm:$0xff] }
 0x215   :  { %5931 = vmatpush3.msra.mxu0 %v2089_v56  ;;  %5964 = vmatpush3.msra.mxu1 %v2122_v61  ;;  %v2155_v56 = vld [vmem:[%s10351_s3 + $0x1258] sm:$0xff]  ;;  %v2188_v61 = vld [vmem:[%s10351_s3 + $0x1360] sm:$0xff] }
 0x216   :  { %5932 = vmatprep.subr.mxu0 %v2104_v62  ;;  %5965 = vmatprep.subr.mxu1 %v2137_v63  ;;  %v2170_v62 = vld [vmem:[%s10351_s3 + $0x12d0] sm:$0xff]  ;;  %v2203_v63 = vld [vmem:[%s10351_s3 + $0x13d8] sm:$0xff] }
 0x217   :  { %5933 = vmatpush3.msra.mxu0 %v2088_v57  ;;  %5966 = vmatpush3.msra.mxu1 %v2121_v60  ;;  %v2154_v57 = vld [vmem:[%s10351_s3 + $0x1250] sm:$0xff]  ;;  %v2187_v60 = vld [vmem:[%s10351_s3 + $0x1358] sm:$0xff] }
 0x218   :  { %5934 = vmatprep.subr.mxu0 %v2103_v37  ;;  %5967 = vmatprep.subr.mxu1 %v2136_v48  ;;  %v2169_v37 = vld [vmem:[%s10351_s3 + $0x12c8] sm:$0xff]  ;;  %v2202_v48 = vld [vmem:[%s10351_s3 + $0x13d0] sm:$0xff] }
 0x219   :  { %5935 = vmatpush3.msra.mxu0 %v2087_v5  ;;  %5968 = vmatpush3.msra.mxu1 %v2120_v2  ;;  %v2153_v5 = vld [vmem:[%s10351_s3 + $0x1248] sm:$0xff]  ;;  %v2186_v2 = vld [vmem:[%s10351_s3 + $0x1350] sm:$0xff] }
 0x21a   :  { %5936 = vmatprep.subr.mxu0 %v2102_v7  ;;  %5969 = vmatprep.subr.mxu1 %v2135_v12  ;;  %v2168_v7 = vld [vmem:[%s10351_s3 + $0x12c0] sm:$0xff]  ;;  %v2201_v12 = vld [vmem:[%s10351_s3 + $0x13c8] sm:$0xff] }
 0x21b   :  { %5937 = vmatpush3.msra.mxu0 %v2086_v8  ;;  %5970 = vmatpush3.msra.mxu1 %v2119_v9  ;;  %v2152_v8 = vld [vmem:[%s10351_s3 + $0x1240] sm:$0xff]  ;;  %v2185_v9 = vld [vmem:[%s10351_s3 + $0x1348] sm:$0xff] }
 0x21c   :  { %5938 = vmatprep.subr.mxu0 %v2101_v11  ;;  %5971 = vmatprep.subr.mxu1 %v2134_v53  ;;  %v2167_v11 = vld [vmem:[%s10351_s3 + $0x12b8] sm:$0xff]  ;;  %v2200_v53 = vld [vmem:[%s10351_s3 + $0x13c0] sm:$0xff] }
 0x21d   :  { %5939 = vmatpush3.msra.mxu0 %v2085_v14  ;;  %5972 = vmatpush3.msra.mxu1 %v2118_v46  ;;  %v2151_v14 = vld [vmem:[%s10351_s3 + $0x1238] sm:$0xff]  ;;  %v2184_v46 = vld [vmem:[%s10351_s3 + $0x1340] sm:$0xff] }
 0x21e   :  { %5940 = vmatprep.subr.mxu0 %v2100_v47  ;;  %5973 = vmatprep.subr.mxu1 %v2133_v17  ;;  %v2166_v47 = vld [vmem:[%s10351_s3 + $0x12b0] sm:$0xff]  ;;  %v2199_v17 = vld [vmem:[%s10351_s3 + $0x13b8] sm:$0xff] }
 0x21f   :  { %5941 = vmatpush3.msra.mxu0 %v2084_v18  ;;  %5974 = vmatpush3.msra.mxu1 %v2117_v19  ;;  %v2150_v18 = vld [vmem:[%s10351_s3 + $0x1230] sm:$0xff]  ;;  %v2183_v19 = vld [vmem:[%s10351_s3 + $0x1338] sm:$0xff] }
 0x220   :  { %5942 = vmatprep.subr.mxu0 %v2099_v20  ;;  %5975 = vmatprep.subr.mxu1 %v2132_v38  ;;  %v2165_v20 = vld [vmem:[%s10351_s3 + $0x12a8] sm:$0xff]  ;;  %v2198_v38 = vld [vmem:[%s10351_s3 + $0x13b0] sm:$0xff] }
 0x221   :  { %5943 = vmatpush3.msra.mxu0 %v2083_v54  ;;  %5976 = vmatpush3.msra.mxu1 %v2116_v55  ;;  %v2149_v54 = vld [vmem:[%s10351_s3 + $0x1228] sm:$0xff]  ;;  %v2182_v55 = vld [vmem:[%s10351_s3 + $0x1330] sm:$0xff] }
 0x222   :  { %5944 = vmatprep.subr.mxu0 %v2098_v22  ;;  %5977 = vmatprep.subr.mxu1 %v2131_v23  ;;  %v2164_v22 = vld [vmem:[%s10351_s3 + $0x12a0] sm:$0xff]  ;;  %v2197_v23 = vld [vmem:[%s10351_s3 + $0x13a8] sm:$0xff] }
 0x223   :  { %5945 = vmatpush3.msra.mxu0 %v2082_v24  ;;  %5978 = vmatpush3.msra.mxu1 %v2115_v1  ;;  %v2148_v24 = vld [vmem:[%s10351_s3 + $0x1220] sm:$0xff]  ;;  %v2181_v1 = vld [vmem:[%s10351_s3 + $0x1328] sm:$0xff] }
 0x224   :  { %5946 = vmatprep.subr.mxu0 %v2097_v29  ;;  %5979 = vmatprep.subr.mxu1 %v2130_v31  ;;  %v2163_v29 = vld [vmem:[%s10351_s3 + $0x1298] sm:$0xff] }
 0x225   :  { %5947 = vmatpush3.msra.mxu0 %v2081_v32  ;;  %5980 = vmatpush3.msra.mxu1 %v2114_v33  ;;  %v2147_v31 = vld [vmem:[%s10351_s3 + $0x1218] sm:$0xff]  ;;  %v2180_v32 = vld [vmem:[%s10351_s3 + $0x1320] sm:$0xff]  ;;  %v2162_v33 = vld [vmem:[%s10351_s3 + $0x1290] sm:$0xff] }
 0x226   :  { %5948 = vmatprep.subr.mxu0 %v2096_v4  ;;  %5981 = vmatprep.subr.mxu1 %v2129_v6  ;;  %v2195_v4 = vld [vmem:[%s10351_s3 + $0x1398] sm:$0xff]  ;;  %v2146_v6 = vld [vmem:[%s10351_s3 + $0x1210] sm:$0xff] }
 0x227   :  { %5949 = vmatpush3.msra.mxu0 %v2080_v59  ;;  %5982 = vmatpush3.msra.mxu1 %v2113_v21  ;;  %v2179_v59 = vld [vmem:[%s10351_s3 + $0x1318] sm:$0xff]  ;;  %v1562_v21 = vld [vmem:[#allocation2 + $0x50] sm:$0xff] }
 0x228   :  { %4136 = vmatmul.mubr.f32.vlgmr.msra.gmra.mxu0 %v8688_v30  ;;  %5983 = vmatprep.subr.mxu1 %v2128_v40  ;;  %v2158_v30 = vld [vmem:[%s10351_s3 + $0x1270] sm:$0xff] }
 0x229   :  { %5988 = vmatprep.subr.mxu0 %v2175_v35  ;;  %5984 = vmatpush3.msra.mxu1 %v2112_v36  ;;  %v2194_v40 = vld [vmem:[%s10351_s3 + $0x1390] sm:$0xff]  ;;  %v2145_v35 = vld [vmem:[%s10351_s3 + $0x1208] sm:$0xff] }
 0x22a   :  { %5989 = vmatpush3.msra.mxu0 %v2159_v15  ;;  %4275 = vmatprep.mubr.f32.mxu0 %v2783_v16  ;;  %v2178_v36 = vld [vmem:[%s10351_s3 + $0x1310] sm:$0xff]  ;;  %v2160_v15 = vld [vmem:[%s10351_s3 + $0x1280] sm:$0xff]  ;;  %v2193_v16 = vld [vmem:[%s10351_s3 + $0x1388] sm:$0xff] }
 0x22b   :  { %4206 = vmatmul.mubr.f32.vlgmr.msra.gmra.mxu1 %v8704_v41  ;;  %5990 = vmatprep.subr.mxu0 %v2174_v39  ;;  %v2190_v41 = vld [vmem:[%s10351_s3 + $0x1370] sm:$0xff]  ;;  %v2144_v39 = vld [vmem:[%s10351_s3 + $0x1200] sm:$0xff] }
 0x22c   :  { %6023 = vmatprep.subr.mxu1 %v2207_v43  ;;  %5991 = vmatpush3.msra.mxu0 %v2158_v30  ;;  %v2785_v43 = vcombine.high %v1562_v21, %v1562_v21  ;;  %v2177_v30 = vld [vmem:[%s10351_s3 + $0x1308] sm:$0xff] }
 0x22d   :  { %6024 = vmatpush3.msra.mxu1 %v2191_v44  ;;  %4345 = vmatprep.mubr.f32.mxu1 %v2784_v25  ;;  %v9096_v44 = vrot.slane %v1562_v21, %v7223_v0  ;;  %v2239_v25 = vld [vmem:[%s10351_s3 + $0x14f8] sm:$0xff]  ;;  %v2260_v21 = vld [vmem:[%s10351_s3 + $0x15a0] sm:$0xff] }
 0x22e   :  { %5992 = vmatprep.subr.mxu0 %v2173_v45  ;;  %6025 = vmatprep.subr.mxu1 %v2206_v42  ;;  %v2192_v45 = vld [vmem:[%s10351_s3 + $0x1380] sm:$0xff] }
 0x22f   :  { %5993 = vmatpush3.msra.mxu0 %v2157_v49  ;;  %6026 = vmatpush3.msra.mxu1 %v2190_v41  ;;  %v2176_v42 = vld [vmem:[%s10351_s3 + $0x1300] sm:$0xff]  ;;  %v2223_v49 = vld [vmem:[%s10351_s3 + $0x1478] sm:$0xff]  ;;  %v9112_v41 = vrot.slane %v2785_v43, %v7223_v0  ;;  %v2225_v43 = vld [vmem:[%s10351_s3 + $0x1488] sm:$0xff] }
 0x230   :  { %5994 = vmatprep.subr.mxu0 %v2172_v50  ;;  %6027 = vmatprep.subr.mxu1 %v2205_v27  ;;  %v2800_v50 = vcombine.high %v9096_v44, %v9096_v44  ;;  %v2238_v27 = vld [vmem:[%s10351_s3 + $0x14f0] sm:$0xff] }
 0x231   :  { %5995 = vmatpush3.msra.mxu0 %v2156_v28  ;;  %6028 = vmatpush3.msra.mxu1 %v2189_v51  ;;  %v2271_v28 = vld [vmem:[%s10351_s3 + $0x15f8] sm:$0xff] }
 0x232   :  { %5996 = vmatprep.subr.mxu0 %v2171_v52  ;;  %6029 = vmatprep.subr.mxu1 %v2204_v26  ;;  %v2255_v51 = vld [vmem:[%s10351_s3 + $0x1578] sm:$0xff]  ;;  %v2237_v52 = vld [vmem:[%s10351_s3 + $0x14e8] sm:$0xff]  ;;  %v2801_v26 = vcombine.high %v9112_v41, %v9112_v41 }
 0x233   :  { %5997 = vmatpush3.msra.mxu0 %v2155_v56  ;;  %6030 = vmatpush3.msra.mxu1 %v2188_v61  ;;  %v2270_v56 = vld [vmem:[%s10351_s3 + $0x15f0] sm:$0xff]  ;;  %v2221_v61 = vld [vmem:[%s10351_s3 + $0x1468] sm:$0xff] }
 0x234   :  { %5998 = vmatprep.subr.mxu0 %v2170_v62  ;;  %6031 = vmatprep.subr.mxu1 %v2203_v63  ;;  %v2236_v62 = vld [vmem:[%s10351_s3 + $0x14e0] sm:$0xff]  ;;  %v2269_v63 = vld [vmem:[%s10351_s3 + $0x15e8] sm:$0xff] }
 0x235   :  { %5999 = vmatpush3.msra.mxu0 %v2154_v57  ;;  %6032 = vmatpush3.msra.mxu1 %v2187_v60  ;;  %v2220_v57 = vld [vmem:[%s10351_s3 + $0x1460] sm:$0xff]  ;;  %v2253_v60 = vld [vmem:[%s10351_s3 + $0x1568] sm:$0xff] }
 0x236   :  { %6000 = vmatprep.subr.mxu0 %v2169_v37  ;;  %6033 = vmatprep.subr.mxu1 %v2202_v48  ;;  %v2235_v37 = vld [vmem:[%s10351_s3 + $0x14d8] sm:$0xff]  ;;  %v2268_v48 = vld [vmem:[%s10351_s3 + $0x15e0] sm:$0xff] }
 0x237   :  { %6001 = vmatpush3.msra.mxu0 %v2153_v5  ;;  %6034 = vmatpush3.msra.mxu1 %v2186_v2  ;;  %v2219_v5 = vld [vmem:[%s10351_s3 + $0x1458] sm:$0xff]  ;;  %v2252_v2 = vld [vmem:[%s10351_s3 + $0x1560] sm:$0xff] }
 0x238   :  { %6002 = vmatprep.subr.mxu0 %v2168_v7  ;;  %6035 = vmatprep.subr.mxu1 %v2201_v12  ;;  %v2234_v7 = vld [vmem:[%s10351_s3 + $0x14d0] sm:$0xff]  ;;  %v2267_v12 = vld [vmem:[%s10351_s3 + $0x15d8] sm:$0xff] }
 0x239   :  { %6003 = vmatpush3.msra.mxu0 %v2152_v8  ;;  %6036 = vmatpush3.msra.mxu1 %v2185_v9  ;;  %v2218_v8 = vld [vmem:[%s10351_s3 + $0x1450] sm:$0xff]  ;;  %v2251_v9 = vld [vmem:[%s10351_s3 + $0x1558] sm:$0xff] }
 0x23a   :  { %6004 = vmatprep.subr.mxu0 %v2167_v11  ;;  %6037 = vmatprep.subr.mxu1 %v2200_v53  ;;  %v2233_v11 = vld [vmem:[%s10351_s3 + $0x14c8] sm:$0xff]  ;;  %v2266_v53 = vld [vmem:[%s10351_s3 + $0x15d0] sm:$0xff] }
 0x23b   :  { %6005 = vmatpush3.msra.mxu0 %v2151_v14  ;;  %6038 = vmatpush3.msra.mxu1 %v2184_v46  ;;  %v2217_v14 = vld [vmem:[%s10351_s3 + $0x1448] sm:$0xff]  ;;  %v2250_v46 = vld [vmem:[%s10351_s3 + $0x1550] sm:$0xff] }
 0x23c   :  { %6006 = vmatprep.subr.mxu0 %v2166_v47  ;;  %6039 = vmatprep.subr.mxu1 %v2199_v17  ;;  %v2232_v47 = vld [vmem:[%s10351_s3 + $0x14c0] sm:$0xff]  ;;  %v2265_v17 = vld [vmem:[%s10351_s3 + $0x15c8] sm:$0xff] }
 0x23d   :  { %6007 = vmatpush3.msra.mxu0 %v2150_v18  ;;  %6040 = vmatpush3.msra.mxu1 %v2183_v19  ;;  %v2216_v18 = vld [vmem:[%s10351_s3 + $0x1440] sm:$0xff]  ;;  %v2249_v19 = vld [vmem:[%s10351_s3 + $0x1548] sm:$0xff] }
 0x23e   :  { %6008 = vmatprep.subr.mxu0 %v2165_v20  ;;  %6041 = vmatprep.subr.mxu1 %v2198_v38  ;;  %v2231_v20 = vld [vmem:[%s10351_s3 + $0x14b8] sm:$0xff]  ;;  %v2264_v38 = vld [vmem:[%s10351_s3 + $0x15c0] sm:$0xff] }
 0x23f   :  { %6009 = vmatpush3.msra.mxu0 %v2149_v54  ;;  %6042 = vmatpush3.msra.mxu1 %v2182_v55  ;;  %v2215_v54 = vld [vmem:[%s10351_s3 + $0x1438] sm:$0xff]  ;;  %v2248_v55 = vld [vmem:[%s10351_s3 + $0x1540] sm:$0xff] }
 0x240   :  { %6010 = vmatprep.subr.mxu0 %v2164_v22  ;;  %6043 = vmatprep.subr.mxu1 %v2197_v23  ;;  %v2230_v22 = vld [vmem:[%s10351_s3 + $0x14b0] sm:$0xff]  ;;  %v2263_v23 = vld [vmem:[%s10351_s3 + $0x15b8] sm:$0xff] }
 0x241   :  { %6011 = vmatpush3.msra.mxu0 %v2148_v24  ;;  %6044 = vmatpush3.msra.mxu1 %v2181_v1  ;;  %v2214_v24 = vld [vmem:[%s10351_s3 + $0x1430] sm:$0xff]  ;;  %v2247_v1 = vld [vmem:[%s10351_s3 + $0x1538] sm:$0xff] }
 0x242   :  { %6012 = vmatprep.subr.mxu0 %v2163_v29  ;;  %6045 = vmatprep.subr.mxu1 %v2196_v13  ;;  %v2229_v29 = vld [vmem:[%s10351_s3 + $0x14a8] sm:$0xff]  ;;  %v2262_v13 = vld [vmem:[%s10351_s3 + $0x15b0] sm:$0xff] }
 0x243   :  { %6013 = vmatpush3.msra.mxu0 %v2147_v31  ;;  %6046 = vmatpush3.msra.mxu1 %v2180_v32  ;;  %v2213_v31 = vld [vmem:[%s10351_s3 + $0x1428] sm:$0xff]  ;;  %v2246_v32 = vld [vmem:[%s10351_s3 + $0x1530] sm:$0xff] }
 0x244   :  { %6014 = vmatprep.subr.mxu0 %v2162_v33  ;;  %6047 = vmatprep.subr.mxu1 %v2195_v4  ;;  %v2228_v33 = vld [vmem:[%s10351_s3 + $0x14a0] sm:$0xff]  ;;  %v2261_v4 = vld [vmem:[%s10351_s3 + $0x15a8] sm:$0xff] }
 0x245   :  { %6015 = vmatpush3.msra.mxu0 %v2146_v6  ;;  %6048 = vmatpush3.msra.mxu1 %v2179_v59  ;;  %v2212_v6 = vld [vmem:[%s10351_s3 + $0x1420] sm:$0xff]  ;;  %v2245_v59 = vld [vmem:[%s10351_s3 + $0x1528] sm:$0xff] }
 0x246   :  { %6016 = vmatprep.subr.mxu0 %v2161_v10  ;;  %6049 = vmatprep.subr.mxu1 %v2194_v40  ;;  %v2227_v10 = vld [vmem:[%s10351_s3 + $0x1498] sm:$0xff] }
 0x247   :  { %6017 = vmatpush3.msra.mxu0 %v2145_v35  ;;  %6050 = vmatpush3.msra.mxu1 %v2178_v36  ;;  %v2211_v40 = vld [vmem:[%s10351_s3 + $0x1418] sm:$0xff]  ;;  %v2244_v35 = vld [vmem:[%s10351_s3 + $0x1520] sm:$0xff]  ;;  %v2226_v36 = vld [vmem:[%s10351_s3 + $0x1490] sm:$0xff] }
 0x248   :  { %6018 = vmatprep.subr.mxu0 %v2160_v15  ;;  %6051 = vmatprep.subr.mxu1 %v2193_v16  ;;  %v2259_v15 = vld [vmem:[%s10351_s3 + $0x1598] sm:$0xff]  ;;  %v2210_v16 = vld [vmem:[%s10351_s3 + $0x1410] sm:$0xff] }
 0x249   :  { %6019 = vmatpush3.msra.mxu0 %v2144_v39  ;;  %6052 = vmatpush3.msra.mxu1 %v2177_v30  ;;  %v2243_v39 = vld [vmem:[%s10351_s3 + $0x1518] sm:$0xff] }
 0x24a   :  { %4276 = vmatmul.mubr.f32.vlgmr.msra.gmra.mxu0 %v8892_v34  ;;  %6053 = vmatprep.subr.mxu1 %v2192_v45  ;;  %v2222_v34 = vld [vmem:[%s10351_s3 + $0x1470] sm:$0xff]  ;;  %v1563_v30 = vld [vmem:[#allocation2 + $0x58] sm:$0xff] }
 0x24b   :  { %6058 = vmatprep.subr.mxu0 %v2239_v25  ;;  %6054 = vmatpush3.msra.mxu1 %v2176_v42  ;;  %v2258_v45 = vld [vmem:[%s10351_s3 + $0x1590] sm:$0xff]  ;;  %v2209_v25 = vld [vmem:[%s10351_s3 + $0x1408] sm:$0xff] }
 0x24c   :  { %6059 = vmatpush3.msra.mxu0 %v2223_v49  ;;  %4415 = vmatprep.mubr.f32.mxu0 %v2800_v50  ;;  %v2242_v42 = vld [vmem:[%s10351_s3 + $0x1510] sm:$0xff]  ;;  %v2224_v49 = vld [vmem:[%s10351_s3 + $0x1480] sm:$0xff]  ;;  %v2257_v50 = vld [vmem:[%s10351_s3 + $0x1588] sm:$0xff] }
 0x24d   :  { %4346 = vmatmul.mubr.f32.vlgmr.msra.gmra.mxu1 %v8908_v58  ;;  %6060 = vmatprep.subr.mxu0 %v2238_v27  ;;  %v2254_v58 = vld [vmem:[%s10351_s3 + $0x1570] sm:$0xff]  ;;  %v2208_v27 = vld [vmem:[%s10351_s3 + $0x1400] sm:$0xff] }
 0x24e   :  { %6093 = vmatprep.subr.mxu1 %v2271_v28  ;;  %6061 = vmatpush3.msra.mxu0 %v2222_v34  ;;  %v2802_v28 = vcombine.high %v1563_v30, %v1563_v30  ;;  %v2241_v34 = vld [vmem:[%s10351_s3 + $0x1508] sm:$0xff] }
 0x24f   :  { %6094 = vmatpush3.msra.mxu1 %v2255_v51  ;;  %4485 = vmatprep.mubr.f32.mxu1 %v2801_v26  ;;  %v9300_v51 = vrot.slane %v1563_v30, %v7223_v0  ;;  %v2303_v26 = vld [vmem:[%s10351_s3 + $0x16f8] sm:$0xff]  ;;  %v2324_v30 = vld [vmem:[%s10351_s3 + $0x17a0] sm:$0xff] }
 0x250   :  { %6062 = vmatprep.subr.mxu0 %v2237_v52  ;;  %6095 = vmatprep.subr.mxu1 %v2270_v56  ;;  %v2256_v52 = vld [vmem:[%s10351_s3 + $0x1580] sm:$0xff] }
 0x251   :  { %6063 = vmatpush3.msra.mxu0 %v2221_v61  ;;  %6096 = vmatpush3.msra.mxu1 %v2254_v58  ;;  %v2240_v56 = vld [vmem:[%s10351_s3 + $0x1500] sm:$0xff]  ;;  %v2287_v61 = vld [vmem:[%s10351_s3 + $0x1678] sm:$0xff]  ;;  %v9316_v58 = vrot.slane %v2802_v28, %v7223_v0  ;;  %v2289_v28 = vld [vmem:[%s10351_s3 + $0x1688] sm:$0xff] }
 0x252   :  { %6064 = vmatprep.subr.mxu0 %v2236_v62  ;;  %6097 = vmatprep.subr.mxu1 %v2269_v63  ;;  %v2817_v62 = vcombine.high %v9300_v51, %v9300_v51  ;;  %v2302_v63 = vld [vmem:[%s10351_s3 + $0x16f0] sm:$0xff] }
 0x253   :  { %6065 = vmatpush3.msra.mxu0 %v2220_v57  ;;  %6098 = vmatpush3.msra.mxu1 %v2253_v60  ;;  %v2335_v57 = vld [vmem:[%s10351_s3 + $0x17f8] sm:$0xff] }
 0x254   :  { %6066 = vmatprep.subr.mxu0 %v2235_v37  ;;  %6099 = vmatprep.subr.mxu1 %v2268_v48  ;;  %v2319_v60 = vld [vmem:[%s10351_s3 + $0x1778] sm:$0xff]  ;;  %v2301_v37 = vld [vmem:[%s10351_s3 + $0x16e8] sm:$0xff]  ;;  %v2818_v48 = vcombine.high %v9316_v58, %v9316_v58 }
 0x255   :  { %6067 = vmatpush3.msra.mxu0 %v2219_v5  ;;  %6100 = vmatpush3.msra.mxu1 %v2252_v2  ;;  %v2334_v5 = vld [vmem:[%s10351_s3 + $0x17f0] sm:$0xff]  ;;  %v2285_v2 = vld [vmem:[%s10351_s3 + $0x1668] sm:$0xff] }
 0x256   :  { %6068 = vmatprep.subr.mxu0 %v2234_v7  ;;  %6101 = vmatprep.subr.mxu1 %v2267_v12  ;;  %v2300_v7 = vld [vmem:[%s10351_s3 + $0x16e0] sm:$0xff]  ;;  %v2333_v12 = vld [vmem:[%s10351_s3 + $0x17e8] sm:$0xff] }
 0x257   :  { %6069 = vmatpush3.msra.mxu0 %v2218_v8  ;;  %6102 = vmatpush3.msra.mxu1 %v2251_v9  ;;  %v2284_v8 = vld [vmem:[%s10351_s3 + $0x1660] sm:$0xff]  ;;  %v2317_v9 = vld [vmem:[%s10351_s3 + $0x1768] sm:$0xff] }
 0x258   :  { %6070 = vmatprep.subr.mxu0 %v2233_v11  ;;  %6103 = vmatprep.subr.mxu1 %v2266_v53  ;;  %v2299_v11 = vld [vmem:[%s10351_s3 + $0x16d8] sm:$0xff]  ;;  %v2332_v53 = vld [vmem:[%s10351_s3 + $0x17e0] sm:$0xff] }
 0x259   :  { %6071 = vmatpush3.msra.mxu0 %v2217_v14  ;;  %6104 = vmatpush3.msra.mxu1 %v2250_v46  ;;  %v2283_v14 = vld [vmem:[%s10351_s3 + $0x1658] sm:$0xff]  ;;  %v2316_v46 = vld [vmem:[%s10351_s3 + $0x1760] sm:$0xff] }
 0x25a   :  { %6072 = vmatprep.subr.mxu0 %v2232_v47  ;;  %6105 = vmatprep.subr.mxu1 %v2265_v17  ;;  %v2298_v47 = vld [vmem:[%s10351_s3 + $0x16d0] sm:$0xff]  ;;  %v2331_v17 = vld [vmem:[%s10351_s3 + $0x17d8] sm:$0xff] }
 0x25b   :  { %6073 = vmatpush3.msra.mxu0 %v2216_v18  ;;  %6106 = vmatpush3.msra.mxu1 %v2249_v19  ;;  %v2282_v18 = vld [vmem:[%s10351_s3 + $0x1650] sm:$0xff]  ;;  %v2315_v19 = vld [vmem:[%s10351_s3 + $0x1758] sm:$0xff] }
 0x25c   :  { %6074 = vmatprep.subr.mxu0 %v2231_v20  ;;  %6107 = vmatprep.subr.mxu1 %v2264_v38  ;;  %v2297_v20 = vld [vmem:[%s10351_s3 + $0x16c8] sm:$0xff]  ;;  %v2330_v38 = vld [vmem:[%s10351_s3 + $0x17d0] sm:$0xff] }
 0x25d   :  { %6075 = vmatpush3.msra.mxu0 %v2215_v54  ;;  %6108 = vmatpush3.msra.mxu1 %v2248_v55  ;;  %v2281_v54 = vld [vmem:[%s10351_s3 + $0x1648] sm:$0xff]  ;;  %v2314_v55 = vld [vmem:[%s10351_s3 + $0x1750] sm:$0xff] }
 0x25e   :  { %6076 = vmatprep.subr.mxu0 %v2230_v22  ;;  %6109 = vmatprep.subr.mxu1 %v2263_v23  ;;  %v2296_v22 = vld [vmem:[%s10351_s3 + $0x16c0] sm:$0xff]  ;;  %v2329_v23 = vld [vmem:[%s10351_s3 + $0x17c8] sm:$0xff] }
 0x25f   :  { %6077 = vmatpush3.msra.mxu0 %v2214_v24  ;;  %6110 = vmatpush3.msra.mxu1 %v2247_v1  ;;  %v2280_v24 = vld [vmem:[%s10351_s3 + $0x1640] sm:$0xff]  ;;  %v2313_v1 = vld [vmem:[%s10351_s3 + $0x1748] sm:$0xff] }
 0x260   :  { %6078 = vmatprep.subr.mxu0 %v2229_v29  ;;  %6111 = vmatprep.subr.mxu1 %v2262_v13  ;;  %v2295_v29 = vld [vmem:[%s10351_s3 + $0x16b8] sm:$0xff]  ;;  %v2328_v13 = vld [vmem:[%s10351_s3 + $0x17c0] sm:$0xff] }
 0x261   :  { %6079 = vmatpush3.msra.mxu0 %v2213_v31  ;;  %6112 = vmatpush3.msra.mxu1 %v2246_v32  ;;  %v2279_v31 = vld [vmem:[%s10351_s3 + $0x1638] sm:$0xff]  ;;  %v2312_v32 = vld [vmem:[%s10351_s3 + $0x1740] sm:$0xff] }
 0x262   :  { %6080 = vmatprep.subr.mxu0 %v2228_v33  ;;  %6113 = vmatprep.subr.mxu1 %v2261_v4  ;;  %v2294_v33 = vld [vmem:[%s10351_s3 + $0x16b0] sm:$0xff]  ;;  %v2327_v4 = vld [vmem:[%s10351_s3 + $0x17b8] sm:$0xff] }
 0x263   :  { %6081 = vmatpush3.msra.mxu0 %v2212_v6  ;;  %6114 = vmatpush3.msra.mxu1 %v2245_v59  ;;  %v2278_v6 = vld [vmem:[%s10351_s3 + $0x1630] sm:$0xff]  ;;  %v2311_v59 = vld [vmem:[%s10351_s3 + $0x1738] sm:$0xff] }
 0x264   :  { %6082 = vmatprep.subr.mxu0 %v2227_v10  ;;  %6115 = vmatprep.subr.mxu1 %v2260_v21  ;;  %v2293_v10 = vld [vmem:[%s10351_s3 + $0x16a8] sm:$0xff]  ;;  %v2326_v21 = vld [vmem:[%s10351_s3 + $0x17b0] sm:$0xff] }
 0x265   :  { %6083 = vmatpush3.msra.mxu0 %v2211_v40  ;;  %6116 = vmatpush3.msra.mxu1 %v2244_v35  ;;  %v2277_v40 = vld [vmem:[%s10351_s3 + $0x1628] sm:$0xff]  ;;  %v2310_v35 = vld [vmem:[%s10351_s3 + $0x1730] sm:$0xff] }
 0x266   :  { %6084 = vmatprep.subr.mxu0 %v2226_v36  ;;  %6117 = vmatprep.subr.mxu1 %v2259_v15  ;;  %v2292_v36 = vld [vmem:[%s10351_s3 + $0x16a0] sm:$0xff]  ;;  %v2325_v15 = vld [vmem:[%s10351_s3 + $0x17a8] sm:$0xff] }
 0x267   :  { %6085 = vmatpush3.msra.mxu0 %v2210_v16  ;;  %6118 = vmatpush3.msra.mxu1 %v2243_v39  ;;  %v2276_v16 = vld [vmem:[%s10351_s3 + $0x1620] sm:$0xff]  ;;  %v2309_v39 = vld [vmem:[%s10351_s3 + $0x1728] sm:$0xff] }
 0x268   :  { %6086 = vmatprep.subr.mxu0 %v2225_v43  ;;  %6119 = vmatprep.subr.mxu1 %v2258_v45  ;;  %v2291_v43 = vld [vmem:[%s10351_s3 + $0x1698] sm:$0xff] }
 0x269   :  { %6087 = vmatpush3.msra.mxu0 %v2209_v25  ;;  %6120 = vmatpush3.msra.mxu1 %v2242_v42  ;;  %v2275_v45 = vld [vmem:[%s10351_s3 + $0x1618] sm:$0xff]  ;;  %v2308_v25 = vld [vmem:[%s10351_s3 + $0x1720] sm:$0xff]  ;;  %v2290_v42 = vld [vmem:[%s10351_s3 + $0x1690] sm:$0xff] }
 0x26a   :  { %6088 = vmatprep.subr.mxu0 %v2224_v49  ;;  %6121 = vmatprep.subr.mxu1 %v2257_v50  ;;  %v2323_v49 = vld [vmem:[%s10351_s3 + $0x1798] sm:$0xff]  ;;  %v2274_v50 = vld [vmem:[%s10351_s3 + $0x1610] sm:$0xff] }
 0x26b   :  { %6089 = vmatpush3.msra.mxu0 %v2208_v27  ;;  %6122 = vmatpush3.msra.mxu1 %v2241_v34  ;;  %v2307_v27 = vld [vmem:[%s10351_s3 + $0x1718] sm:$0xff]  ;;  %v1564_v34 = vld [vmem:[#allocation2 + $0x60] sm:$0xff] }
 0x26c   :  { %4416 = vmatmul.mubr.f32.vlgmr.msra.gmra.mxu0 %v9096_v44  ;;  %6123 = vmatprep.subr.mxu1 %v2256_v52  ;;  %v2286_v44 = vld [vmem:[%s10351_s3 + $0x1670] sm:$0xff] }
 0x26d   :  { %6128 = vmatprep.subr.mxu0 %v2303_v26  ;;  %6124 = vmatpush3.msra.mxu1 %v2240_v56  ;;  %v2322_v52 = vld [vmem:[%s10351_s3 + $0x1790] sm:$0xff]  ;;  %v2273_v26 = vld [vmem:[%s10351_s3 + $0x1608] sm:$0xff] }
 0x26e   :  { %6129 = vmatpush3.msra.mxu0 %v2287_v61  ;;  %4555 = vmatprep.mubr.f32.mxu0 %v2817_v62  ;;  %v2306_v56 = vld [vmem:[%s10351_s3 + $0x1710] sm:$0xff]  ;;  %v2288_v61 = vld [vmem:[%s10351_s3 + $0x1680] sm:$0xff]  ;;  %v2321_v62 = vld [vmem:[%s10351_s3 + $0x1788] sm:$0xff] }
 0x26f   :  { %4486 = vmatmul.mubr.f32.vlgmr.msra.gmra.mxu1 %v9112_v41  ;;  %6130 = vmatprep.subr.mxu0 %v2302_v63  ;;  %v2318_v41 = vld [vmem:[%s10351_s3 + $0x1770] sm:$0xff]  ;;  %v2272_v63 = vld [vmem:[%s10351_s3 + $0x1600] sm:$0xff] }
 0x270   :  { %6163 = vmatprep.subr.mxu1 %v2335_v57  ;;  %6131 = vmatpush3.msra.mxu0 %v2286_v44  ;;  %v2819_v57 = vcombine.high %v1564_v34, %v1564_v34  ;;  %v2305_v44 = vld [vmem:[%s10351_s3 + $0x1708] sm:$0xff] }
 0x271   :  { %6164 = vmatpush3.msra.mxu1 %v2319_v60  ;;  %4625 = vmatprep.mubr.f32.mxu1 %v2818_v48  ;;  %v9504_v60 = vrot.slane %v1564_v34, %v7223_v0  ;;  %v2367_v48 = vld [vmem:[%s10351_s3 + $0x18f8] sm:$0xff]  ;;  %v2388_v34 = vld [vmem:[%s10351_s3 + $0x19a0] sm:$0xff] }
 0x272   :  { %6132 = vmatprep.subr.mxu0 %v2301_v37  ;;  %6165 = vmatprep.subr.mxu1 %v2334_v5  ;;  %v2320_v37 = vld [vmem:[%s10351_s3 + $0x1780] sm:$0xff] }
 0x273   :  { %6133 = vmatpush3.msra.mxu0 %v2285_v2  ;;  %6166 = vmatpush3.msra.mxu1 %v2318_v41  ;;  %v2304_v5 = vld [vmem:[%s10351_s3 + $0x1700] sm:$0xff]  ;;  %v2351_v2 = vld [vmem:[%s10351_s3 + $0x1878] sm:$0xff]  ;;  %v9520_v41 = vrot.slane %v2819_v57, %v7223_v0  ;;  %v2353_v57 = vld [vmem:[%s10351_s3 + $0x1888] sm:$0xff] }
 0x274   :  { %6134 = vmatprep.subr.mxu0 %v2300_v7  ;;  %6167 = vmatprep.subr.mxu1 %v2333_v12  ;;  %v2834_v7 = vcombine.high %v9504_v60, %v9504_v60  ;;  %v2366_v12 = vld [vmem:[%s10351_s3 + $0x18f0] sm:$0xff] }
 0x275   :  { %6135 = vmatpush3.msra.mxu0 %v2284_v8  ;;  %6168 = vmatpush3.msra.mxu1 %v2317_v9  ;;  %v2399_v8 = vld [vmem:[%s10351_s3 + $0x19f8] sm:$0xff] }
 0x276   :  { %6136 = vmatprep.subr.mxu0 %v2299_v11  ;;  %6169 = vmatprep.subr.mxu1 %v2332_v53  ;;  %v2383_v9 = vld [vmem:[%s10351_s3 + $0x1978] sm:$0xff]  ;;  %v2365_v11 = vld [vmem:[%s10351_s3 + $0x18e8] sm:$0xff]  ;;  %v2835_v53 = vcombine.high %v9520_v41, %v9520_v41 }
 0x277   :  { %6137 = vmatpush3.msra.mxu0 %v2283_v14  ;;  %6170 = vmatpush3.msra.mxu1 %v2316_v46  ;;  %v2398_v14 = vld [vmem:[%s10351_s3 + $0x19f0] sm:$0xff]  ;;  %v2349_v46 = vld [vmem:[%s10351_s3 + $0x1868] sm:$0xff] }
 0x278   :  { %6138 = vmatprep.subr.mxu0 %v2298_v47  ;;  %6171 = vmatprep.subr.mxu1 %v2331_v17  ;;  %v2364_v47 = vld [vmem:[%s10351_s3 + $0x18e0] sm:$0xff]  ;;  %v2397_v17 = vld [vmem:[%s10351_s3 + $0x19e8] sm:$0xff] }
 0x279   :  { %6139 = vmatpush3.msra.mxu0 %v2282_v18  ;;  %6172 = vmatpush3.msra.mxu1 %v2315_v19  ;;  %v2348_v18 = vld [vmem:[%s10351_s3 + $0x1860] sm:$0xff]  ;;  %v2381_v19 = vld [vmem:[%s10351_s3 + $0x1968] sm:$0xff] }
 0x27a   :  { %6140 = vmatprep.subr.mxu0 %v2297_v20  ;;  %6173 = vmatprep.subr.mxu1 %v2330_v38  ;;  %v2363_v20 = vld [vmem:[%s10351_s3 + $0x18d8] sm:$0xff]  ;;  %v2396_v38 = vld [vmem:[%s10351_s3 + $0x19e0] sm:$0xff] }
 0x27b   :  { %6141 = vmatpush3.msra.mxu0 %v2281_v54  ;;  %6174 = vmatpush3.msra.mxu1 %v2314_v55  ;;  %v2347_v54 = vld [vmem:[%s10351_s3 + $0x1858] sm:$0xff]  ;;  %v2380_v55 = vld [vmem:[%s10351_s3 + $0x1960] sm:$0xff] }
 0x27c   :  { %6142 = vmatprep.subr.mxu0 %v2296_v22  ;;  %6175 = vmatprep.subr.mxu1 %v2329_v23  ;;  %v2362_v22 = vld [vmem:[%s10351_s3 + $0x18d0] sm:$0xff]  ;;  %v2395_v23 = vld [vmem:[%s10351_s3 + $0x19d8] sm:$0xff] }
 0x27d   :  { %6143 = vmatpush3.msra.mxu0 %v2280_v24  ;;  %6176 = vmatpush3.msra.mxu1 %v2313_v1  ;;  %v2346_v24 = vld [vmem:[%s10351_s3 + $0x1850] sm:$0xff]  ;;  %v2379_v1 = vld [vmem:[%s10351_s3 + $0x1958] sm:$0xff] }
 0x27e   :  { %6144 = vmatprep.subr.mxu0 %v2295_v29  ;;  %6177 = vmatprep.subr.mxu1 %v2328_v13  ;;  %v2361_v29 = vld [vmem:[%s10351_s3 + $0x18c8] sm:$0xff]  ;;  %v2394_v13 = vld [vmem:[%s10351_s3 + $0x19d0] sm:$0xff] }
 0x27f   :  { %6145 = vmatpush3.msra.mxu0 %v2279_v31  ;;  %6178 = vmatpush3.msra.mxu1 %v2312_v32  ;;  %v2345_v31 = vld [vmem:[%s10351_s3 + $0x1848] sm:$0xff]  ;;  %v2378_v32 = vld [vmem:[%s10351_s3 + $0x1950] sm:$0xff] }
 0x280   :  { %6146 = vmatprep.subr.mxu0 %v2294_v33  ;;  %6179 = vmatprep.subr.mxu1 %v2327_v4  ;;  %v2360_v33 = vld [vmem:[%s10351_s3 + $0x18c0] sm:$0xff]  ;;  %v2393_v4 = vld [vmem:[%s10351_s3 + $0x19c8] sm:$0xff] }
 0x281   :  { %6147 = vmatpush3.msra.mxu0 %v2278_v6  ;;  %6180 = vmatpush3.msra.mxu1 %v2311_v59  ;;  %v2344_v6 = vld [vmem:[%s10351_s3 + $0x1840] sm:$0xff]  ;;  %v2377_v59 = vld [vmem:[%s10351_s3 + $0x1948] sm:$0xff] }
 0x282   :  { %6148 = vmatprep.subr.mxu0 %v2293_v10  ;;  %6181 = vmatprep.subr.mxu1 %v2326_v21  ;;  %v2359_v10 = vld [vmem:[%s10351_s3 + $0x18b8] sm:$0xff]  ;;  %v2392_v21 = vld [vmem:[%s10351_s3 + $0x19c0] sm:$0xff] }
 0x283   :  { %6149 = vmatpush3.msra.mxu0 %v2277_v40  ;;  %6182 = vmatpush3.msra.mxu1 %v2310_v35  ;;  %v2343_v40 = vld [vmem:[%s10351_s3 + $0x1838] sm:$0xff]  ;;  %v2376_v35 = vld [vmem:[%s10351_s3 + $0x1940] sm:$0xff] }
 0x284   :  { %6150 = vmatprep.subr.mxu0 %v2292_v36  ;;  %6183 = vmatprep.subr.mxu1 %v2325_v15  ;;  %v2358_v36 = vld [vmem:[%s10351_s3 + $0x18b0] sm:$0xff]  ;;  %v2391_v15 = vld [vmem:[%s10351_s3 + $0x19b8] sm:$0xff] }
 0x285   :  { %6151 = vmatpush3.msra.mxu0 %v2276_v16  ;;  %6184 = vmatpush3.msra.mxu1 %v2309_v39  ;;  %v2342_v16 = vld [vmem:[%s10351_s3 + $0x1830] sm:$0xff]  ;;  %v2375_v39 = vld [vmem:[%s10351_s3 + $0x1938] sm:$0xff] }
 0x286   :  { %6152 = vmatprep.subr.mxu0 %v2291_v43  ;;  %6185 = vmatprep.subr.mxu1 %v2324_v30  ;;  %v2357_v43 = vld [vmem:[%s10351_s3 + $0x18a8] sm:$0xff]  ;;  %v2390_v30 = vld [vmem:[%s10351_s3 + $0x19b0] sm:$0xff] }
 0x287   :  { %6153 = vmatpush3.msra.mxu0 %v2275_v45  ;;  %6186 = vmatpush3.msra.mxu1 %v2308_v25  ;;  %v2341_v45 = vld [vmem:[%s10351_s3 + $0x1828] sm:$0xff]  ;;  %v2374_v25 = vld [vmem:[%s10351_s3 + $0x1930] sm:$0xff] }
 0x288   :  { %6154 = vmatprep.subr.mxu0 %v2290_v42  ;;  %6187 = vmatprep.subr.mxu1 %v2323_v49  ;;  %v2356_v42 = vld [vmem:[%s10351_s3 + $0x18a0] sm:$0xff]  ;;  %v2389_v49 = vld [vmem:[%s10351_s3 + $0x19a8] sm:$0xff] }
 0x289   :  { %6155 = vmatpush3.msra.mxu0 %v2274_v50  ;;  %6188 = vmatpush3.msra.mxu1 %v2307_v27  ;;  %v2340_v50 = vld [vmem:[%s10351_s3 + $0x1820] sm:$0xff]  ;;  %v2373_v27 = vld [vmem:[%s10351_s3 + $0x1928] sm:$0xff] }
 0x28a   :  { %6156 = vmatprep.subr.mxu0 %v2289_v28  ;;  %6189 = vmatprep.subr.mxu1 %v2322_v52  ;;  %v2355_v28 = vld [vmem:[%s10351_s3 + $0x1898] sm:$0xff] }
 0x28b   :  { %6157 = vmatpush3.msra.mxu0 %v2273_v26  ;;  %6190 = vmatpush3.msra.mxu1 %v2306_v56  ;;  %v2339_v52 = vld [vmem:[%s10351_s3 + $0x1818] sm:$0xff]  ;;  %v2372_v26 = vld [vmem:[%s10351_s3 + $0x1920] sm:$0xff]  ;;  %v2354_v56 = vld [vmem:[%s10351_s3 + $0x1890] sm:$0xff] }
 0x28c   :  { %6158 = vmatprep.subr.mxu0 %v2288_v61  ;;  %6191 = vmatprep.subr.mxu1 %v2321_v62  ;;  %v2387_v61 = vld [vmem:[%s10351_s3 + $0x1998] sm:$0xff]  ;;  %v2338_v62 = vld [vmem:[%s10351_s3 + $0x1810] sm:$0xff] }
 0x28d   :  { %6159 = vmatpush3.msra.mxu0 %v2272_v63  ;;  %6192 = vmatpush3.msra.mxu1 %v2305_v44  ;;  %v2371_v63 = vld [vmem:[%s10351_s3 + $0x1918] sm:$0xff]  ;;  %v1565_v44 = vld [vmem:[#allocation2 + $0x68] sm:$0xff] }
 0x28e   :  { %4556 = vmatmul.mubr.f32.vlgmr.msra.gmra.mxu0 %v9300_v51  ;;  %6193 = vmatprep.subr.mxu1 %v2320_v37  ;;  %v2350_v51 = vld [vmem:[%s10351_s3 + $0x1870] sm:$0xff] }
 0x28f   :  { %6198 = vmatprep.subr.mxu0 %v2367_v48  ;;  %6194 = vmatpush3.msra.mxu1 %v2304_v5  ;;  %v2386_v37 = vld [vmem:[%s10351_s3 + $0x1990] sm:$0xff]  ;;  %v2337_v48 = vld [vmem:[%s10351_s3 + $0x1808] sm:$0xff] }
 0x290   :  { %6199 = vmatpush3.msra.mxu0 %v2351_v2  ;;  %4695 = vmatprep.mubr.f32.mxu0 %v2834_v7  ;;  %v2370_v5 = vld [vmem:[%s10351_s3 + $0x1910] sm:$0xff]  ;;  %v2352_v2 = vld [vmem:[%s10351_s3 + $0x1880] sm:$0xff]  ;;  %v2385_v7 = vld [vmem:[%s10351_s3 + $0x1988] sm:$0xff] }
 0x291   :  { %4626 = vmatmul.mubr.f32.vlgmr.msra.gmra.mxu1 %v9316_v58  ;;  %6200 = vmatprep.subr.mxu0 %v2366_v12  ;;  %v2382_v58 = vld [vmem:[%s10351_s3 + $0x1970] sm:$0xff]  ;;  %v2336_v12 = vld [vmem:[%s10351_s3 + $0x1800] sm:$0xff] }
 0x292   :  { %6233 = vmatprep.subr.mxu1 %v2399_v8  ;;  %6201 = vmatpush3.msra.mxu0 %v2350_v51  ;;  %v2836_v8 = vcombine.high %v1565_v44, %v1565_v44  ;;  %v2369_v51 = vld [vmem:[%s10351_s3 + $0x1908] sm:$0xff] }
 0x293   :  { %6234 = vmatpush3.msra.mxu1 %v2383_v9  ;;  %4765 = vmatprep.mubr.f32.mxu1 %v2835_v53  ;;  %v9708_v9 = vrot.slane %v1565_v44, %v7223_v0  ;;  %v2431_v53 = vld [vmem:[%s10351_s3 + $0x1af8] sm:$0xff]  ;;  %v2452_v44 = vld [vmem:[%s10351_s3 + $0x1ba0] sm:$0xff] }
 0x294   :  { %6202 = vmatprep.subr.mxu0 %v2365_v11  ;;  %6235 = vmatprep.subr.mxu1 %v2398_v14  ;;  %v2384_v11 = vld [vmem:[%s10351_s3 + $0x1980] sm:$0xff] }
 0x295   :  { %6203 = vmatpush3.msra.mxu0 %v2349_v46  ;;  %6236 = vmatpush3.msra.mxu1 %v2382_v58  ;;  %v2368_v14 = vld [vmem:[%s10351_s3 + $0x1900] sm:$0xff]  ;;  %v2415_v46 = vld [vmem:[%s10351_s3 + $0x1a78] sm:$0xff]  ;;  %v9724_v58 = vrot.slane %v2836_v8, %v7223_v0  ;;  %v2417_v8 = vld [vmem:[%s10351_s3 + $0x1a88] sm:$0xff] }
 0x296   :  { %6204 = vmatprep.subr.mxu0 %v2364_v47  ;;  %6237 = vmatprep.subr.mxu1 %v2397_v17  ;;  %v2851_v47 = vcombine.high %v9708_v9, %v9708_v9  ;;  %v2430_v17 = vld [vmem:[%s10351_s3 + $0x1af0] sm:$0xff] }
 0x297   :  { %6205 = vmatpush3.msra.mxu0 %v2348_v18  ;;  %6238 = vmatpush3.msra.mxu1 %v2381_v19  ;;  %v2463_v18 = vld [vmem:[%s10351_s3 + $0x1bf8] sm:$0xff] }
 0x298   :  { %6206 = vmatprep.subr.mxu0 %v2363_v20  ;;  %6239 = vmatprep.subr.mxu1 %v2396_v38  ;;  %v2447_v19 = vld [vmem:[%s10351_s3 + $0x1b78] sm:$0xff]  ;;  %v2429_v20 = vld [vmem:[%s10351_s3 + $0x1ae8] sm:$0xff]  ;;  %v2852_v38 = vcombine.high %v9724_v58, %v9724_v58 }
 0x299   :  { %6207 = vmatpush3.msra.mxu0 %v2347_v54  ;;  %6240 = vmatpush3.msra.mxu1 %v2380_v55  ;;  %v2462_v54 = vld [vmem:[%s10351_s3 + $0x1bf0] sm:$0xff]  ;;  %v2413_v55 = vld [vmem:[%s10351_s3 + $0x1a68] sm:$0xff] }
 0x29a   :  { %6208 = vmatprep.subr.mxu0 %v2362_v22  ;;  %6241 = vmatprep.subr.mxu1 %v2395_v23  ;;  %v2428_v22 = vld [vmem:[%s10351_s3 + $0x1ae0] sm:$0xff]  ;;  %v2461_v23 = vld [vmem:[%s10351_s3 + $0x1be8] sm:$0xff] }
 0x29b   :  { %6209 = vmatpush3.msra.mxu0 %v2346_v24  ;;  %6242 = vmatpush3.msra.mxu1 %v2379_v1  ;;  %v2412_v24 = vld [vmem:[%s10351_s3 + $0x1a60] sm:$0xff]  ;;  %v2445_v1 = vld [vmem:[%s10351_s3 + $0x1b68] sm:$0xff] }
 0x29c   :  { %6210 = vmatprep.subr.mxu0 %v2361_v29  ;;  %6243 = vmatprep.subr.mxu1 %v2394_v13  ;;  %v2427_v29 = vld [vmem:[%s10351_s3 + $0x1ad8] sm:$0xff]  ;;  %v2460_v13 = vld [vmem:[%s10351_s3 + $0x1be0] sm:$0xff] }
 0x29d   :  { %6211 = vmatpush3.msra.mxu0 %v2345_v31  ;;  %6244 = vmatpush3.msra.mxu1 %v2378_v32  ;;  %v2411_v31 = vld [vmem:[%s10351_s3 + $0x1a58] sm:$0xff]  ;;  %v2444_v32 = vld [vmem:[%s10351_s3 + $0x1b60] sm:$0xff] }
 0x29e   :  { %6212 = vmatprep.subr.mxu0 %v2360_v33  ;;  %6245 = vmatprep.subr.mxu1 %v2393_v4  ;;  %v2426_v33 = vld [vmem:[%s10351_s3 + $0x1ad0] sm:$0xff]  ;;  %v2459_v4 = vld [vmem:[%s10351_s3 + $0x1bd8] sm:$0xff] }
 0x29f   :  { %6213 = vmatpush3.msra.mxu0 %v2344_v6  ;;  %6246 = vmatpush3.msra.mxu1 %v2377_v59  ;;  %v2410_v6 = vld [vmem:[%s10351_s3 + $0x1a50] sm:$0xff]  ;;  %v2443_v59 = vld [vmem:[%s10351_s3 + $0x1b58] sm:$0xff] }
 0x2a0   :  { %6214 = vmatprep.subr.mxu0 %v2359_v10  ;;  %6247 = vmatprep.subr.mxu1 %v2392_v21  ;;  %v2425_v10 = vld [vmem:[%s10351_s3 + $0x1ac8] sm:$0xff]  ;;  %v2458_v21 = vld [vmem:[%s10351_s3 + $0x1bd0] sm:$0xff] }
 0x2a1   :  { %6215 = vmatpush3.msra.mxu0 %v2343_v40  ;;  %6248 = vmatpush3.msra.mxu1 %v2376_v35  ;;  %v2409_v40 = vld [vmem:[%s10351_s3 + $0x1a48] sm:$0xff]  ;;  %v2442_v35 = vld [vmem:[%s10351_s3 + $0x1b50] sm:$0xff] }
 0x2a2   :  { %6216 = vmatprep.subr.mxu0 %v2358_v36  ;;  %6249 = vmatprep.subr.mxu1 %v2391_v15  ;;  %v2424_v36 = vld [vmem:[%s10351_s3 + $0x1ac0] sm:$0xff]  ;;  %v2457_v15 = vld [vmem:[%s10351_s3 + $0x1bc8] sm:$0xff] }
 0x2a3   :  { %6217 = vmatpush3.msra.mxu0 %v2342_v16  ;;  %6250 = vmatpush3.msra.mxu1 %v2375_v39  ;;  %v2408_v16 = vld [vmem:[%s10351_s3 + $0x1a40] sm:$0xff]  ;;  %v2441_v39 = vld [vmem:[%s10351_s3 + $0x1b48] sm:$0xff] }
 0x2a4   :  { %6218 = vmatprep.subr.mxu0 %v2357_v43  ;;  %6251 = vmatprep.subr.mxu1 %v2390_v30  ;;  %v2423_v43 = vld [vmem:[%s10351_s3 + $0x1ab8] sm:$0xff]  ;;  %v2456_v30 = vld [vmem:[%s10351_s3 + $0x1bc0] sm:$0xff] }
 0x2a5   :  { %6219 = vmatpush3.msra.mxu0 %v2341_v45  ;;  %6252 = vmatpush3.msra.mxu1 %v2374_v25  ;;  %v2407_v45 = vld [vmem:[%s10351_s3 + $0x1a38] sm:$0xff]  ;;  %v2440_v25 = vld [vmem:[%s10351_s3 + $0x1b40] sm:$0xff] }
 0x2a6   :  { %6220 = vmatprep.subr.mxu0 %v2356_v42  ;;  %6253 = vmatprep.subr.mxu1 %v2389_v49  ;;  %v2422_v42 = vld [vmem:[%s10351_s3 + $0x1ab0] sm:$0xff]  ;;  %v2455_v49 = vld [vmem:[%s10351_s3 + $0x1bb8] sm:$0xff] }
 0x2a7   :  { %6221 = vmatpush3.msra.mxu0 %v2340_v50  ;;  %6254 = vmatpush3.msra.mxu1 %v2373_v27  ;;  %v2406_v50 = vld [vmem:[%s10351_s3 + $0x1a30] sm:$0xff]  ;;  %v2439_v27 = vld [vmem:[%s10351_s3 + $0x1b38] sm:$0xff] }
 0x2a8   :  { %6222 = vmatprep.subr.mxu0 %v2355_v28  ;;  %6255 = vmatprep.subr.mxu1 %v2388_v34  ;;  %v2421_v28 = vld [vmem:[%s10351_s3 + $0x1aa8] sm:$0xff]  ;;  %v2454_v34 = vld [vmem:[%s10351_s3 + $0x1bb0] sm:$0xff] }
 0x2a9   :  { %6223 = vmatpush3.msra.mxu0 %v2339_v52  ;;  %6256 = vmatpush3.msra.mxu1 %v2372_v26  ;;  %v2405_v52 = vld [vmem:[%s10351_s3 + $0x1a28] sm:$0xff]  ;;  %v2438_v26 = vld [vmem:[%s10351_s3 + $0x1b30] sm:$0xff] }
 0x2aa   :  { %6224 = vmatprep.subr.mxu0 %v2354_v56  ;;  %6257 = vmatprep.subr.mxu1 %v2387_v61  ;;  %v2420_v56 = vld [vmem:[%s10351_s3 + $0x1aa0] sm:$0xff]  ;;  %v2453_v61 = vld [vmem:[%s10351_s3 + $0x1ba8] sm:$0xff] }
 0x2ab   :  { %6225 = vmatpush3.msra.mxu0 %v2338_v62  ;;  %6258 = vmatpush3.msra.mxu1 %v2371_v63  ;;  %v2404_v62 = vld [vmem:[%s10351_s3 + $0x1a20] sm:$0xff]  ;;  %v2437_v63 = vld [vmem:[%s10351_s3 + $0x1b28] sm:$0xff] }
 0x2ac   :  { %6226 = vmatprep.subr.mxu0 %v2353_v57  ;;  %6259 = vmatprep.subr.mxu1 %v2386_v37  ;;  %v2419_v57 = vld [vmem:[%s10351_s3 + $0x1a98] sm:$0xff] }
 0x2ad   :  { %6227 = vmatpush3.msra.mxu0 %v2337_v48  ;;  %6260 = vmatpush3.msra.mxu1 %v2370_v5  ;;  %v2403_v37 = vld [vmem:[%s10351_s3 + $0x1a18] sm:$0xff]  ;;  %v2436_v48 = vld [vmem:[%s10351_s3 + $0x1b20] sm:$0xff]  ;;  %v2418_v5 = vld [vmem:[%s10351_s3 + $0x1a90] sm:$0xff] }
 0x2ae   :  { %6228 = vmatprep.subr.mxu0 %v2352_v2  ;;  %6261 = vmatprep.subr.mxu1 %v2385_v7  ;;  %v2451_v2 = vld [vmem:[%s10351_s3 + $0x1b98] sm:$0xff]  ;;  %v2402_v7 = vld [vmem:[%s10351_s3 + $0x1a10] sm:$0xff] }
 0x2af   :  { %6229 = vmatpush3.msra.mxu0 %v2336_v12  ;;  %6262 = vmatpush3.msra.mxu1 %v2369_v51  ;;  %v2435_v12 = vld [vmem:[%s10351_s3 + $0x1b18] sm:$0xff]  ;;  %v1566_v51 = vld [vmem:[#allocation2 + $0x70] sm:$0xff] }
 0x2b0   :  { %4696 = vmatmul.mubr.f32.vlgmr.msra.gmra.mxu0 %v9504_v60  ;;  %6263 = vmatprep.subr.mxu1 %v2384_v11  ;;  %v2414_v60 = vld [vmem:[%s10351_s3 + $0x1a70] sm:$0xff] }
 0x2b1   :  { %6268 = vmatprep.subr.mxu0 %v2431_v53  ;;  %6264 = vmatpush3.msra.mxu1 %v2368_v14  ;;  %v2450_v11 = vld [vmem:[%s10351_s3 + $0x1b90] sm:$0xff]  ;;  %v2401_v53 = vld [vmem:[%s10351_s3 + $0x1a08] sm:$0xff] }
 0x2b2   :  { %6269 = vmatpush3.msra.mxu0 %v2415_v46  ;;  %4835 = vmatprep.mubr.f32.mxu0 %v2851_v47  ;;  %v2434_v14 = vld [vmem:[%s10351_s3 + $0x1b10] sm:$0xff]  ;;  %v2416_v46 = vld [vmem:[%s10351_s3 + $0x1a80] sm:$0xff]  ;;  %v2449_v47 = vld [vmem:[%s10351_s3 + $0x1b88] sm:$0xff] }
 0x2b3   :  { %4766 = vmatmul.mubr.f32.vlgmr.msra.gmra.mxu1 %v9520_v41  ;;  %6270 = vmatprep.subr.mxu0 %v2430_v17  ;;  %v2446_v41 = vld [vmem:[%s10351_s3 + $0x1b70] sm:$0xff]  ;;  %v2400_v17 = vld [vmem:[%s10351_s3 + $0x1a00] sm:$0xff] }
 0x2b4   :  { %6303 = vmatprep.subr.mxu1 %v2463_v18  ;;  %6271 = vmatpush3.msra.mxu0 %v2414_v60  ;;  %v2853_v18 = vcombine.high %v1566_v51, %v1566_v51  ;;  %v2433_v60 = vld [vmem:[%s10351_s3 + $0x1b08] sm:$0xff] }
 0x2b5   :  { %6304 = vmatpush3.msra.mxu1 %v2447_v19  ;;  %4905 = vmatprep.mubr.f32.mxu1 %v2852_v38  ;;  %v9912_v19 = vrot.slane %v1566_v51, %v7223_v0  ;;  %v2495_v38 = vld [vmem:[%s10351_s3 + $0x1cf8] sm:$0xff]  ;;  %v2516_v51 = vld [vmem:[%s10351_s3 + $0x1da0] sm:$0xff] }
 0x2b6   :  { %6272 = vmatprep.subr.mxu0 %v2429_v20  ;;  %6305 = vmatprep.subr.mxu1 %v2462_v54  ;;  %v2448_v20 = vld [vmem:[%s10351_s3 + $0x1b80] sm:$0xff] }
 0x2b7   :  { %6273 = vmatpush3.msra.mxu0 %v2413_v55  ;;  %6306 = vmatpush3.msra.mxu1 %v2446_v41  ;;  %v2432_v54 = vld [vmem:[%s10351_s3 + $0x1b00] sm:$0xff]  ;;  %v2479_v55 = vld [vmem:[%s10351_s3 + $0x1c78] sm:$0xff]  ;;  %v9928_v41 = vrot.slane %v2853_v18, %v7223_v0  ;;  %v2481_v18 = vld [vmem:[%s10351_s3 + $0x1c88] sm:$0xff] }
 0x2b8   :  { %6274 = vmatprep.subr.mxu0 %v2428_v22  ;;  %6307 = vmatprep.subr.mxu1 %v2461_v23  ;;  %v2868_v22 = vcombine.high %v9912_v19, %v9912_v19  ;;  %v2494_v23 = vld [vmem:[%s10351_s3 + $0x1cf0] sm:$0xff] }
 0x2b9   :  { %6275 = vmatpush3.msra.mxu0 %v2412_v24  ;;  %6308 = vmatpush3.msra.mxu1 %v2445_v1  ;;  %v2527_v24 = vld [vmem:[%s10351_s3 + $0x1df8] sm:$0xff] }
 0x2ba   :  { %6276 = vmatprep.subr.mxu0 %v2427_v29  ;;  %6309 = vmatprep.subr.mxu1 %v2460_v13  ;;  %v2511_v1 = vld [vmem:[%s10351_s3 + $0x1d78] sm:$0xff]  ;;  %v2493_v29 = vld [vmem:[%s10351_s3 + $0x1ce8] sm:$0xff]  ;;  %v2869_v13 = vcombine.high %v9928_v41, %v9928_v41 }
 0x2bb   :  { %6277 = vmatpush3.msra.mxu0 %v2411_v31  ;;  %6310 = vmatpush3.msra.mxu1 %v2444_v32  ;;  %v2526_v31 = vld [vmem:[%s10351_s3 + $0x1df0] sm:$0xff]  ;;  %v2477_v32 = vld [vmem:[%s10351_s3 + $0x1c68] sm:$0xff] }
 0x2bc   :  { %6278 = vmatprep.subr.mxu0 %v2426_v33  ;;  %6311 = vmatprep.subr.mxu1 %v2459_v4  ;;  %v2492_v33 = vld [vmem:[%s10351_s3 + $0x1ce0] sm:$0xff]  ;;  %v2525_v4 = vld [vmem:[%s10351_s3 + $0x1de8] sm:$0xff] }
 0x2bd   :  { %6279 = vmatpush3.msra.mxu0 %v2410_v6  ;;  %6312 = vmatpush3.msra.mxu1 %v2443_v59  ;;  %v2476_v6 = vld [vmem:[%s10351_s3 + $0x1c60] sm:$0xff]  ;;  %v2509_v59 = vld [vmem:[%s10351_s3 + $0x1d68] sm:$0xff] }
 0x2be   :  { %6280 = vmatprep.subr.mxu0 %v2425_v10  ;;  %6313 = vmatprep.subr.mxu1 %v2458_v21  ;;  %v2491_v10 = vld [vmem:[%s10351_s3 + $0x1cd8] sm:$0xff]  ;;  %v2524_v21 = vld [vmem:[%s10351_s3 + $0x1de0] sm:$0xff] }
 0x2bf   :  { %6281 = vmatpush3.msra.mxu0 %v2409_v40  ;;  %6314 = vmatpush3.msra.mxu1 %v2442_v35  ;;  %v2475_v40 = vld [vmem:[%s10351_s3 + $0x1c58] sm:$0xff]  ;;  %v2508_v35 = vld [vmem:[%s10351_s3 + $0x1d60] sm:$0xff] }
 0x2c0   :  { %6282 = vmatprep.subr.mxu0 %v2424_v36  ;;  %6315 = vmatprep.subr.mxu1 %v2457_v15  ;;  %v2490_v36 = vld [vmem:[%s10351_s3 + $0x1cd0] sm:$0xff]  ;;  %v2523_v15 = vld [vmem:[%s10351_s3 + $0x1dd8] sm:$0xff] }
 0x2c1   :  { %6283 = vmatpush3.msra.mxu0 %v2408_v16  ;;  %6316 = vmatpush3.msra.mxu1 %v2441_v39  ;;  %v2474_v16 = vld [vmem:[%s10351_s3 + $0x1c50] sm:$0xff]  ;;  %v2507_v39 = vld [vmem:[%s10351_s3 + $0x1d58] sm:$0xff] }
 0x2c2   :  { %6284 = vmatprep.subr.mxu0 %v2423_v43  ;;  %6317 = vmatprep.subr.mxu1 %v2456_v30  ;;  %v2489_v43 = vld [vmem:[%s10351_s3 + $0x1cc8] sm:$0xff]  ;;  %v2522_v30 = vld [vmem:[%s10351_s3 + $0x1dd0] sm:$0xff] }
 0x2c3   :  { %6285 = vmatpush3.msra.mxu0 %v2407_v45  ;;  %6318 = vmatpush3.msra.mxu1 %v2440_v25  ;;  %v2473_v45 = vld [vmem:[%s10351_s3 + $0x1c48] sm:$0xff]  ;;  %v2506_v25 = vld [vmem:[%s10351_s3 + $0x1d50] sm:$0xff] }
 0x2c4   :  { %6286 = vmatprep.subr.mxu0 %v2422_v42  ;;  %6319 = vmatprep.subr.mxu1 %v2455_v49  ;;  %v2488_v42 = vld [vmem:[%s10351_s3 + $0x1cc0] sm:$0xff]  ;;  %v2521_v49 = vld [vmem:[%s10351_s3 + $0x1dc8] sm:$0xff] }
 0x2c5   :  { %6287 = vmatpush3.msra.mxu0 %v2406_v50  ;;  %6320 = vmatpush3.msra.mxu1 %v2439_v27  ;;  %v2472_v50 = vld [vmem:[%s10351_s3 + $0x1c40] sm:$0xff]  ;;  %v2505_v27 = vld [vmem:[%s10351_s3 + $0x1d48] sm:$0xff] }
 0x2c6   :  { %6288 = vmatprep.subr.mxu0 %v2421_v28  ;;  %6321 = vmatprep.subr.mxu1 %v2454_v34  ;;  %v2487_v28 = vld [vmem:[%s10351_s3 + $0x1cb8] sm:$0xff]  ;;  %v2520_v34 = vld [vmem:[%s10351_s3 + $0x1dc0] sm:$0xff] }
 0x2c7   :  { %6289 = vmatpush3.msra.mxu0 %v2405_v52  ;;  %6322 = vmatpush3.msra.mxu1 %v2438_v26  ;;  %v2471_v52 = vld [vmem:[%s10351_s3 + $0x1c38] sm:$0xff]  ;;  %v2504_v26 = vld [vmem:[%s10351_s3 + $0x1d40] sm:$0xff] }
 0x2c8   :  { %6290 = vmatprep.subr.mxu0 %v2420_v56  ;;  %6323 = vmatprep.subr.mxu1 %v2453_v61  ;;  %v2486_v56 = vld [vmem:[%s10351_s3 + $0x1cb0] sm:$0xff]  ;;  %v2519_v61 = vld [vmem:[%s10351_s3 + $0x1db8] sm:$0xff] }
 0x2c9   :  { %6291 = vmatpush3.msra.mxu0 %v2404_v62  ;;  %6324 = vmatpush3.msra.mxu1 %v2437_v63  ;;  %v2470_v62 = vld [vmem:[%s10351_s3 + $0x1c30] sm:$0xff]  ;;  %v2503_v63 = vld [vmem:[%s10351_s3 + $0x1d38] sm:$0xff] }
 0x2ca   :  { %6292 = vmatprep.subr.mxu0 %v2419_v57  ;;  %6325 = vmatprep.subr.mxu1 %v2452_v44  ;;  %v2485_v57 = vld [vmem:[%s10351_s3 + $0x1ca8] sm:$0xff]  ;;  %v2518_v44 = vld [vmem:[%s10351_s3 + $0x1db0] sm:$0xff] }
 0x2cb   :  { %6293 = vmatpush3.msra.mxu0 %v2403_v37  ;;  %6326 = vmatpush3.msra.mxu1 %v2436_v48  ;;  %v2469_v37 = vld [vmem:[%s10351_s3 + $0x1c28] sm:$0xff]  ;;  %v2502_v48 = vld [vmem:[%s10351_s3 + $0x1d30] sm:$0xff] }
 0x2cc   :  { %6294 = vmatprep.subr.mxu0 %v2418_v5  ;;  %6327 = vmatprep.subr.mxu1 %v2451_v2  ;;  %v2484_v5 = vld [vmem:[%s10351_s3 + $0x1ca0] sm:$0xff]  ;;  %v2517_v2 = vld [vmem:[%s10351_s3 + $0x1da8] sm:$0xff] }
 0x2cd   :  { %6295 = vmatpush3.msra.mxu0 %v2402_v7  ;;  %6328 = vmatpush3.msra.mxu1 %v2435_v12  ;;  %v2468_v7 = vld [vmem:[%s10351_s3 + $0x1c20] sm:$0xff]  ;;  %v2501_v12 = vld [vmem:[%s10351_s3 + $0x1d28] sm:$0xff] }
 0x2ce   :  { %6296 = vmatprep.subr.mxu0 %v2417_v8  ;;  %6329 = vmatprep.subr.mxu1 %v2450_v11  ;;  %v2483_v8 = vld [vmem:[%s10351_s3 + $0x1c98] sm:$0xff] }
 0x2cf   :  { %6297 = vmatpush3.msra.mxu0 %v2401_v53  ;;  %6330 = vmatpush3.msra.mxu1 %v2434_v14  ;;  %v2467_v11 = vld [vmem:[%s10351_s3 + $0x1c18] sm:$0xff]  ;;  %v2500_v53 = vld [vmem:[%s10351_s3 + $0x1d20] sm:$0xff]  ;;  %v2482_v14 = vld [vmem:[%s10351_s3 + $0x1c90] sm:$0xff] }
 0x2d0   :  { %6298 = vmatprep.subr.mxu0 %v2416_v46  ;;  %6331 = vmatprep.subr.mxu1 %v2449_v47  ;;  %v2515_v46 = vld [vmem:[%s10351_s3 + $0x1d98] sm:$0xff]  ;;  %v2466_v47 = vld [vmem:[%s10351_s3 + $0x1c10] sm:$0xff] }
 0x2d1   :  { %6299 = vmatpush3.msra.mxu0 %v2400_v17  ;;  %6332 = vmatpush3.msra.mxu1 %v2433_v60  ;;  %v2499_v17 = vld [vmem:[%s10351_s3 + $0x1d18] sm:$0xff] }
 0x2d2   :  { %4836 = vmatmul.mubr.f32.vlgmr.msra.gmra.mxu0 %v9708_v9  ;;  %6333 = vmatprep.subr.mxu1 %v2448_v20  ;;  %v2478_v9 = vld [vmem:[%s10351_s3 + $0x1c70] sm:$0xff]  ;;  %v1567_v60 = vld [vmem:[#allocation2 + $0x78] sm:$0xff] }
 0x2d3   :  { %6338 = vmatprep.subr.mxu0 %v2495_v38  ;;  %6334 = vmatpush3.msra.mxu1 %v2432_v54  ;;  %v2514_v20 = vld [vmem:[%s10351_s3 + $0x1d90] sm:$0xff]  ;;  %v2465_v38 = vld [vmem:[%s10351_s3 + $0x1c08] sm:$0xff] }
 0x2d4   :  { %6339 = vmatpush3.msra.mxu0 %v2479_v55  ;;  %4975 = vmatprep.mubr.f32.mxu0 %v2868_v22  ;;  %v2498_v54 = vld [vmem:[%s10351_s3 + $0x1d10] sm:$0xff]  ;;  %v2480_v55 = vld [vmem:[%s10351_s3 + $0x1c80] sm:$0xff]  ;;  %v2513_v22 = vld [vmem:[%s10351_s3 + $0x1d88] sm:$0xff] }
 0x2d5   :  { %4906 = vmatmul.mubr.f32.vlgmr.msra.gmra.mxu1 %v9724_v58  ;;  %6340 = vmatprep.subr.mxu0 %v2494_v23  ;;  %v2510_v58 = vld [vmem:[%s10351_s3 + $0x1d70] sm:$0xff]  ;;  %v2464_v23 = vld [vmem:[%s10351_s3 + $0x1c00] sm:$0xff] }
 0x2d6   :  { %6373 = vmatprep.subr.mxu1 %v2527_v24  ;;  %6341 = vmatpush3.msra.mxu0 %v2478_v9  ;;  %v2870_v24 = vcombine.high %v1567_v60, %v1567_v60  ;;  %v2497_v9 = vld [vmem:[%s10351_s3 + $0x1d08] sm:$0xff] }
 0x2d7   :  { %6374 = vmatpush3.msra.mxu1 %v2511_v1  ;;  %5045 = vmatprep.mubr.f32.mxu1 %v2869_v13  ;;  %v10116_v1 = vrot.slane %v1567_v60, %v7223_v0  ;;  %v2559_v13 = vld [vmem:[%s10351_s3 + $0x1ef8] sm:$0xff] }
 0x2d8   :  { %6342 = vmatprep.subr.mxu0 %v2493_v29  ;;  %6375 = vmatprep.subr.mxu1 %v2526_v31  ;;  %v2512_v29 = vld [vmem:[%s10351_s3 + $0x1d80] sm:$0xff]  ;;  %v2531_v60 = vld [vmem:[%s10351_s3 + $0x1e18] sm:$0xff] }
 0x2d9   :  { %6343 = vmatpush3.msra.mxu0 %v2477_v32  ;;  %6376 = vmatpush3.msra.mxu1 %v2510_v58  ;;  %v2496_v31 = vld [vmem:[%s10351_s3 + $0x1d00] sm:$0xff]  ;;  %v2543_v32 = vld [vmem:[%s10351_s3 + $0x1e78] sm:$0xff]  ;;  %v10132_v58 = vrot.slane %v2870_v24, %v7223_v0  ;;  %v2542_v0 = vld [vmem:[%s10351_s3 + $0x1e70] sm:$0xff] }
 0x2da   :  { %6344 = vmatprep.subr.mxu0 %v2492_v33  ;;  %6377 = vmatprep.subr.mxu1 %v2525_v4  ;;  %v2885_v33 = vcombine.high %v10116_v1, %v10116_v1  ;;  %v2558_v4 = vld [vmem:[%s10351_s3 + $0x1ef0] sm:$0xff] }
 0x2db   :  { %6345 = vmatpush3.msra.mxu0 %v2476_v6  ;;  %6378 = vmatpush3.msra.mxu1 %v2509_v59  ;;  %v2591_v6 = vld [vmem:[%s10351_s3 + $0x1ff8] sm:$0xff]  ;;  %v2557_v59 = vld [vmem:[%s10351_s3 + $0x1ee8] sm:$0xff]  ;;  %v2578_v24 = vld [vmem:[%s10351_s3 + $0x1f90] sm:$0xff] }
 0x2dc   :  { %6346 = vmatprep.subr.mxu0 %v2491_v10  ;;  %6379 = vmatprep.subr.mxu1 %v2524_v21  ;;  %v2886_v10 = vcombine.high %v10132_v58, %v10132_v58  ;;  %v2590_v21 = vld [vmem:[%s10351_s3 + $0x1ff0] sm:$0xff] }
 0x2dd   :  { %6347 = vmatpush3.msra.mxu0 %v2475_v40  ;;  %6380 = vmatpush3.msra.mxu1 %v2508_v35  ;;  %v2541_v40 = vld [vmem:[%s10351_s3 + $0x1e68] sm:$0xff]  ;;  %v2556_v35 = vld [vmem:[%s10351_s3 + $0x1ee0] sm:$0xff] }
 0x2de   :  { %6348 = vmatprep.subr.mxu0 %v2490_v36  ;;  %6381 = vmatprep.subr.mxu1 %v2523_v15  ;;  %v2589_v36 = vld [vmem:[%s10351_s3 + $0x1fe8] sm:$0xff]  ;;  %v2540_v15 = vld [vmem:[%s10351_s3 + $0x1e60] sm:$0xff] }
 0x2df   :  { %6349 = vmatpush3.msra.mxu0 %v2474_v16  ;;  %6382 = vmatpush3.msra.mxu1 %v2507_v39  ;;  %v2573_v16 = vld [vmem:[%s10351_s3 + $0x1f68] sm:$0xff]  ;;  %v2555_v39 = vld [vmem:[%s10351_s3 + $0x1ed8] sm:$0xff] }
 0x2e0   :  { %6350 = vmatprep.subr.mxu0 %v2489_v43  ;;  %6383 = vmatprep.subr.mxu1 %v2522_v30  ;;  %v2588_v43 = vld [vmem:[%s10351_s3 + $0x1fe0] sm:$0xff]  ;;  %v2539_v30 = vld [vmem:[%s10351_s3 + $0x1e58] sm:$0xff] }
 0x2e1   :  { %6351 = vmatpush3.msra.mxu0 %v2473_v45  ;;  %6384 = vmatpush3.msra.mxu1 %v2506_v25  ;;  %v2572_v45 = vld [vmem:[%s10351_s3 + $0x1f60] sm:$0xff]  ;;  %v2554_v25 = vld [vmem:[%s10351_s3 + $0x1ed0] sm:$0xff] }
 0x2e2   :  { %6352 = vmatprep.subr.mxu0 %v2488_v42  ;;  %6385 = vmatprep.subr.mxu1 %v2521_v49  ;;  %v2587_v42 = vld [vmem:[%s10351_s3 + $0x1fd8] sm:$0xff]  ;;  %v2538_v49 = vld [vmem:[%s10351_s3 + $0x1e50] sm:$0xff] }
 0x2e3   :  { %6353 = vmatpush3.msra.mxu0 %v2472_v50  ;;  %6386 = vmatpush3.msra.mxu1 %v2505_v27  ;;  %v2571_v50 = vld [vmem:[%s10351_s3 + $0x1f58] sm:$0xff]  ;;  %v2553_v27 = vld [vmem:[%s10351_s3 + $0x1ec8] sm:$0xff] }
 0x2e4   :  { %6354 = vmatprep.subr.mxu0 %v2487_v28  ;;  %6387 = vmatprep.subr.mxu1 %v2520_v34  ;;  %v2586_v28 = vld [vmem:[%s10351_s3 + $0x1fd0] sm:$0xff]  ;;  %v2537_v34 = vld [vmem:[%s10351_s3 + $0x1e48] sm:$0xff] }
 0x2e5   :  { %6355 = vmatpush3.msra.mxu0 %v2471_v52  ;;  %6388 = vmatpush3.msra.mxu1 %v2504_v26  ;;  %v2570_v52 = vld [vmem:[%s10351_s3 + $0x1f50] sm:$0xff]  ;;  %v2552_v26 = vld [vmem:[%s10351_s3 + $0x1ec0] sm:$0xff] }
 0x2e6   :  { %6356 = vmatprep.subr.mxu0 %v2486_v56  ;;  %6389 = vmatprep.subr.mxu1 %v2519_v61  ;;  %v2585_v56 = vld [vmem:[%s10351_s3 + $0x1fc8] sm:$0xff]  ;;  %v2536_v61 = vld [vmem:[%s10351_s3 + $0x1e40] sm:$0xff] }
 0x2e7   :  { %6357 = vmatpush3.msra.mxu0 %v2470_v62  ;;  %6390 = vmatpush3.msra.mxu1 %v2503_v63  ;;  %v2569_v62 = vld [vmem:[%s10351_s3 + $0x1f48] sm:$0xff]  ;;  %v2551_v63 = vld [vmem:[%s10351_s3 + $0x1eb8] sm:$0xff] }
 0x2e8   :  { %6358 = vmatprep.subr.mxu0 %v2485_v57  ;;  %6391 = vmatprep.subr.mxu1 %v2518_v44  ;;  %v2584_v57 = vld [vmem:[%s10351_s3 + $0x1fc0] sm:$0xff]  ;;  %v2535_v44 = vld [vmem:[%s10351_s3 + $0x1e38] sm:$0xff] }
 0x2e9   :  { %6359 = vmatpush3.msra.mxu0 %v2469_v37  ;;  %6392 = vmatpush3.msra.mxu1 %v2502_v48  ;;  %v2568_v37 = vld [vmem:[%s10351_s3 + $0x1f40] sm:$0xff]  ;;  %v2550_v48 = vld [vmem:[%s10351_s3 + $0x1eb0] sm:$0xff] }
 0x2ea   :  { %6360 = vmatprep.subr.mxu0 %v2484_v5  ;;  %6393 = vmatprep.subr.mxu1 %v2517_v2  ;;  %v2583_v5 = vld [vmem:[%s10351_s3 + $0x1fb8] sm:$0xff]  ;;  %v2534_v2 = vld [vmem:[%s10351_s3 + $0x1e30] sm:$0xff] }
 0x2eb   :  { %6361 = vmatpush3.msra.mxu0 %v2468_v7  ;;  %6394 = vmatpush3.msra.mxu1 %v2501_v12  ;;  %v2567_v7 = vld [vmem:[%s10351_s3 + $0x1f38] sm:$0xff]  ;;  %v2549_v12 = vld [vmem:[%s10351_s3 + $0x1ea8] sm:$0xff] }
 0x2ec   :  { %6362 = vmatprep.subr.mxu0 %v2483_v8  ;;  %6395 = vmatprep.subr.mxu1 %v2516_v51  ;;  %v2582_v8 = vld [vmem:[%s10351_s3 + $0x1fb0] sm:$0xff]  ;;  %v2533_v51 = vld [vmem:[%s10351_s3 + $0x1e28] sm:$0xff] }
 0x2ed   :  { %6363 = vmatpush3.msra.mxu0 %v2467_v11  ;;  %6396 = vmatpush3.msra.mxu1 %v2500_v53  ;;  %v2566_v11 = vld [vmem:[%s10351_s3 + $0x1f30] sm:$0xff]  ;;  %v2548_v53 = vld [vmem:[%s10351_s3 + $0x1ea0] sm:$0xff] }
 0x2ee   :  { %6364 = vmatprep.subr.mxu0 %v2482_v14  ;;  %6397 = vmatprep.subr.mxu1 %v2515_v46  ;;  %v2581_v14 = vld [vmem:[%s10351_s3 + $0x1fa8] sm:$0xff]  ;;  %v2532_v46 = vld [vmem:[%s10351_s3 + $0x1e20] sm:$0xff] }
 0x2ef   :  { %6365 = vmatpush3.msra.mxu0 %v2466_v47  ;;  %6398 = vmatpush3.msra.mxu1 %v2499_v17  ;;  %v2565_v47 = vld [vmem:[%s10351_s3 + $0x1f28] sm:$0xff]  ;;  %v2547_v17 = vld [vmem:[%s10351_s3 + $0x1e98] sm:$0xff] }
 0x2f0   :  { %6366 = vmatprep.subr.mxu0 %v2481_v18  ;;  %6399 = vmatprep.subr.mxu1 %v2514_v20  ;;  %v2580_v18 = vld [vmem:[%s10351_s3 + $0x1fa0] sm:$0xff] }
 0x2f1   :  { %6367 = vmatpush3.msra.mxu0 %v2465_v38  ;;  %6400 = vmatpush3.msra.mxu1 %v2498_v54  ;;  %v2564_v20 = vld [vmem:[%s10351_s3 + $0x1f20] sm:$0xff]  ;;  %v2546_v38 = vld [vmem:[%s10351_s3 + $0x1e90] sm:$0xff]  ;;  %v2579_v54 = vld [vmem:[%s10351_s3 + $0x1f98] sm:$0xff] }
 0x2f2   :  { %6368 = vmatprep.subr.mxu0 %v2480_v55  ;;  %6401 = vmatprep.subr.mxu1 %v2513_v22  ;;  %v2530_v55 = vld [vmem:[%s10351_s3 + $0x1e10] sm:$0xff]  ;;  %v2563_v22 = vld [vmem:[%s10351_s3 + $0x1f18] sm:$0xff] }
 0x2f3   :  { %6369 = vmatpush3.msra.mxu0 %v2464_v23  ;;  %6402 = vmatpush3.msra.mxu1 %v2497_v9  ;;  %v2545_v23 = vld [vmem:[%s10351_s3 + $0x1e88] sm:$0xff] }
 0x2f4   :  { %4976 = vmatmul.mubr.f32.vlgmr.msra.gmra.mxu0 %v9912_v19  ;;  %6403 = vmatprep.subr.mxu1 %v2512_v29  ;;  %v2575_v19 = vld [vmem:[%s10351_s3 + $0x1f78] sm:$0xff]  ;;  %v2529_v9 = vld [vmem:[%s10351_s3 + $0x1e08] sm:$0xff]  ;;  %v2562_v29 = vld [vmem:[%s10351_s3 + $0x1f10] sm:$0xff] }
 0x2f5   :  { %6408 = vmatprep.subr.mxu0 %v2559_v13  ;;  %6404 = vmatpush3.msra.mxu1 %v2496_v31  ;;  %v2544_v13 = vld [vmem:[%s10351_s3 + $0x1e80] sm:$0xff]  ;;  %v2577_v31 = vld [vmem:[%s10351_s3 + $0x1f88] sm:$0xff] }
 0x2f6   :  { %6409 = vmatpush3.msra.mxu0 %v2543_v32  ;;  %5115 = vmatprep.mubr.f32.mxu0 %v2885_v33  ;;  %v2528_v32 = vld [vmem:[%s10351_s3 + $0x1e00] sm:$0xff]  ;;  %v2561_v33 = vld [vmem:[%s10351_s3 + $0x1f08] sm:$0xff] }
 0x2f7   :  { %5046 = vmatmul.mubr.f32.vlgmr.msra.gmra.mxu1 %v9928_v41  ;;  %6410 = vmatprep.subr.mxu0 %v2558_v4  ;;  %v2574_v41 = vld [vmem:[%s10351_s3 + $0x1f70] sm:$0xff]  ;;  %v2576_v4 = vld [vmem:[%s10351_s3 + $0x1f80] sm:$0xff] }
 0x2f8   :  { %6443 = vmatprep.subr.mxu1 %v2591_v6  ;;  %6411 = vmatpush3.msra.mxu0 %v2542_v0  ;;  %v2560_v6 = vld [vmem:[%s10351_s3 + $0x1f00] sm:$0xff]  ;;  %v5192_v0 = vld [vmem:[%s10352_s5 + $0x8] sm:$0x3] }
 0x2f9   :  { %6444 = vmatpush3.msra.mxu1 %v2575_v19  ;;  %5185 = vmatprep.mubr.f32.mxu1 %v2886_v10  ;;  %v5191_v19 = vld [vmem:[%s10352_s5] sm:$0xff]  ;;  %v5425_v10 = vpop.f32.mrf.mxu1 }
 0x2fa   :  { %6412 = vmatprep.subr.mxu0 %v2557_v59  ;;  %6445 = vmatprep.subr.mxu1 %v2590_v21 }
 0x2fb   :  { %6413 = vmatpush3.msra.mxu0 %v2541_v40  ;;  %6446 = vmatpush3.msra.mxu1 %v2574_v41  ;;  %v5354_v40 = vld [vmem:[%s10353_s4] ss:$0 sm:$0xff]  ;;  %v5426_v41 = vpop.f32.mrf.mxu1 }
 0x2fc   :  { %6414 = vmatprep.subr.mxu0 %v2556_v35  ;;  %6447 = vmatprep.subr.mxu1 %v2589_v36 }
 0x2fd   :  { %6415 = vmatpush3.msra.mxu0 %v2540_v15  ;;  %6448 = vmatpush3.msra.mxu1 %v2573_v16  ;;  %v5495_v36 = vpop.f32.mrf.mxu1  ;;  %v5427_v16 = vadd.f32 %v5426_v41, %v5425_v10 }
 0x2fe   :  { %6416 = vmatprep.subr.mxu0 %v2555_v39  ;;  %6449 = vmatprep.subr.mxu1 %v2588_v43 }
 0x2ff   :  { %6417 = vmatpush3.msra.mxu0 %v2539_v30  ;;  %6450 = vmatpush3.msra.mxu1 %v2572_v45  ;;  %v5496_v30 = vpop.f32.mrf.mxu1 }
 0x300   :  { %6418 = vmatprep.subr.mxu0 %v2554_v25  ;;  %6451 = vmatprep.subr.mxu1 %v2587_v42 }
 0x301   :  { %6419 = vmatpush3.msra.mxu0 %v2538_v49  ;;  %6452 = vmatpush3.msra.mxu1 %v2571_v50  ;;  %v5497_v49 = vadd.f32 %v5496_v30, %v5495_v36 }
 0x302   :  { %6420 = vmatprep.subr.mxu0 %v2553_v27  ;;  %6453 = vmatprep.subr.mxu1 %v2586_v28 }
 0x303   :  { %6421 = vmatpush3.msra.mxu0 %v2537_v34  ;;  %6454 = vmatpush3.msra.mxu1 %v2570_v52 }
 0x304   :  { %6422 = vmatprep.subr.mxu0 %v2552_v26  ;;  %6455 = vmatprep.subr.mxu1 %v2585_v56 }
 0x305   :  { %6423 = vmatpush3.msra.mxu0 %v2536_v61  ;;  %6456 = vmatpush3.msra.mxu1 %v2569_v62 }
 0x306   :  { %6424 = vmatprep.subr.mxu0 %v2551_v63  ;;  %6457 = vmatprep.subr.mxu1 %v2584_v57 }
 0x307   :  { %6425 = vmatpush3.msra.mxu0 %v2535_v44  ;;  %6458 = vmatpush3.msra.mxu1 %v2568_v37 }
 0x308   :  { %6426 = vmatprep.subr.mxu0 %v2550_v48  ;;  %6459 = vmatprep.subr.mxu1 %v2583_v5 }
 0x309   :  { %6427 = vmatpush3.msra.mxu0 %v2534_v2  ;;  %6460 = vmatpush3.msra.mxu1 %v2567_v7 }
 0x30a   :  { %6428 = vmatprep.subr.mxu0 %v2549_v12  ;;  %6461 = vmatprep.subr.mxu1 %v2582_v8 }
 0x30b   :  { %6429 = vmatpush3.msra.mxu0 %v2533_v51  ;;  %6462 = vmatpush3.msra.mxu1 %v2566_v11 }
 0x30c   :  { %6430 = vmatprep.subr.mxu0 %v2548_v53  ;;  %6463 = vmatprep.subr.mxu1 %v2581_v14 }
 0x30d   :  { %6431 = vmatpush3.msra.mxu0 %v2532_v46  ;;  %6464 = vmatpush3.msra.mxu1 %v2565_v47 }
 0x30e   :  { %6432 = vmatprep.subr.mxu0 %v2547_v17  ;;  %6465 = vmatprep.subr.mxu1 %v2580_v18 }
 0x30f   :  { %6433 = vmatpush3.msra.mxu0 %v2531_v60  ;;  %6466 = vmatpush3.msra.mxu1 %v2564_v20 }
 0x310   :  { %6434 = vmatprep.subr.mxu0 %v2546_v38  ;;  %6467 = vmatprep.subr.mxu1 %v2579_v54 }
 0x311   :  { %6435 = vmatpush3.msra.mxu0 %v2530_v55  ;;  %6468 = vmatpush3.msra.mxu1 %v2563_v22 }
 0x312   :  { %6436 = vmatprep.subr.mxu0 %v2545_v23  ;;  %6469 = vmatprep.subr.mxu1 %v2578_v24 }
 0x313   :  { %6437 = vmatpush3.msra.mxu0 %v2529_v9  ;;  %6470 = vmatpush3.msra.mxu1 %v2562_v29 }
 0x314   :  { %6438 = vmatprep.subr.mxu0 %v2544_v13  ;;  %6471 = vmatprep.subr.mxu1 %v2577_v31 }
 0x315   :  { %6439 = vmatpush3.msra.mxu0 %v2528_v32  ;;  %6472 = vmatpush3.msra.mxu1 %v2561_v33 }
 0x316   :  { %5116 = vmatmul.mubr.f32.vlgmr.msra.gmra.mxu0 %v10116_v1  ;;  %6473 = vmatprep.subr.mxu1 %v2576_v4  ;;  %v5390_v1 = vpop.f32.mrf.mxu0 }
 0x317   :  { %6481 = vmatprep.subr.mxu0 %v6512_v3  ;;  %6474 = vmatpush3.msra.mxu1 %v2560_v6 }
 0x318   :  { %5186 = vmatmul.mubr.f32.vlgmr.msra.gmra.mxu1 %v10132_v58  ;;  %6482 = vmatpush3.msk.msra.mxu0 %vm5204_vm3, %v5192_v0  ;;  %v5391_v59 = vpop.f32.mrf.mxu0 }
 0x319   :  { %6483 = vmatprep.subr.mxu0 %v6512_v3  ;;  %6485 = vmatprep.mubr.msk.f32.mxu0 %vm6516_vm4, %v6512_v3  ;;  %v5392_v21 = vadd.f32 %v5391_v59, %v5390_v1  ;;  %v5565_v3 = vpop.f32.mrf.mxu1 }
 0x31a   :  { %6484 = vmatpush3.msra.mxu0 %v5191_v19  ;;  %v5460_v58 = vpop.f32.mrf.mxu0 }
 0x31b   :  { %v3018_v15 = vadd.f32 %v5392_v21, %v5354_v40  ;;  %v5566_v28 = vpop.f32.mrf.mxu1 }
 0x31c   :  { %v5461_v35 = vpop.f32.mrf.mxu0  ;;  %v5567_v61 = vadd.f32 %v5566_v28, %v5565_v3 }
 0x31d   :  { %v5462_v43 = vadd.f32 %v5461_v35, %v5460_v58  ;;  %v3088_v45 = vadd.f32 %v5427_v16, %v3018_v15  ;;  %v5635_v26 = vpop.f32.mrf.mxu1 }
 0x31e   :  { %v5530_v39 = vpop.f32.mrf.mxu0 }
 0x31f   :  { %v3158_v42 = vadd.f32 %v5462_v43, %v3088_v45  ;;  %v5636_v57 = vpop.f32.mrf.mxu1 }
 0x320   :  { %v5531_v25 = vpop.f32.mrf.mxu0  ;;  %v5637_v2 = vadd.f32 %v5636_v57, %v5635_v26 }
 0x321   :  { %v5532_v27 = vadd.f32 %v5531_v25, %v5530_v39  ;;  %v3228_v34 = vadd.f32 %v5497_v49, %v3158_v42  ;;  %v5705_v48 = vpop.f32.mrf.mxu1 }
 0x322   :  { %v5600_v50 = vpop.f32.mrf.mxu0 }
 0x323   :  { %v3298_v56 = vadd.f32 %v5532_v27, %v3228_v34  ;;  %v5706_v8 = vpop.f32.mrf.mxu1 }
 0x324   :  { %v5601_v52 = vpop.f32.mrf.mxu0  ;;  %v5707_v46 = vadd.f32 %v5706_v8, %v5705_v48 }
 0x325   :  { %v5602_v63 = vadd.f32 %v5601_v52, %v5600_v50  ;;  %v3368_v44 = vadd.f32 %v5567_v61, %v3298_v56  ;;  %v5775_v53 = vpop.f32.mrf.mxu1 }
 0x326   :  { %v5670_v62 = vpop.f32.mrf.mxu0 }
 0x327   :  { %v3438_v5 = vadd.f32 %v5602_v63, %v3368_v44  ;;  %v5776_v18 = vpop.f32.mrf.mxu1 }
 0x328   :  { %v5671_v37 = vpop.f32.mrf.mxu0  ;;  %v5777_v55 = vadd.f32 %v5776_v18, %v5775_v53 }
 0x329   :  { %v5672_v12 = vadd.f32 %v5671_v37, %v5670_v62  ;;  %v3508_v51 = vadd.f32 %v5637_v2, %v3438_v5  ;;  %v5845_v38 = vpop.f32.mrf.mxu1 }
 0x32a   :  { %v5740_v7 = vpop.f32.mrf.mxu0 }
 0x32b   :  { %v3578_v14 = vadd.f32 %v5672_v12, %v3508_v51  ;;  %v5846_v24 = vpop.f32.mrf.mxu1 }
 0x32c   :  { %v5741_v11 = vpop.f32.mrf.mxu0  ;;  %v5847_v32 = vadd.f32 %v5846_v24, %v5845_v38 }
 0x32d   :  { %v5742_v17 = vadd.f32 %v5741_v11, %v5740_v7  ;;  %v3648_v60 = vadd.f32 %v5707_v46, %v3578_v14  ;;  %v5915_v13 = vpop.f32.mrf.mxu1 }
 0x32e   :  { %v5810_v47 = vpop.f32.mrf.mxu0 }
 0x32f   :  { %v3718_v54 = vadd.f32 %v5742_v17, %v3648_v60  ;;  %v5916_v6 = vpop.f32.mrf.mxu1 }
 0x330   :  { %v5811_v20 = vpop.f32.mrf.mxu0  ;;  %v5917_v10 = vadd.f32 %v5916_v6, %v5915_v13 }
 0x331   :  { %v5812_v23 = vadd.f32 %v5811_v20, %v5810_v47  ;;  %v3788_v9 = vadd.f32 %v5777_v55, %v3718_v54  ;;  %v5985_v1 = vpop.f32.mrf.mxu1 }
 0x332   :  { %v5880_v22 = vpop.f32.mrf.mxu0 }
 0x333   :  { %v3858_v31 = vadd.f32 %v5812_v23, %v3788_v9  ;;  %v5986_v40 = vpop.f32.mrf.mxu1 }
 0x334   :  { %v5881_v29 = vpop.f32.mrf.mxu0  ;;  %v5987_v16 = vadd.f32 %v5986_v40, %v5985_v1 }
 0x335   :  { %v5882_v4 = vadd.f32 %v5881_v29, %v5880_v22  ;;  %v3928_v0 = vadd.f32 %v5847_v32, %v3858_v31  ;;  %v6055_v36 = vpop.f32.mrf.mxu1 }
 0x336   :  { %v5950_v33 = vpop.f32.mrf.mxu0 }
 0x337   :  { %v3998_v59 = vadd.f32 %v5882_v4, %v3928_v0  ;;  %v6056_v30 = vpop.f32.mrf.mxu1 }
 0x338   :  { %v5951_v19 = vpop.f32.mrf.mxu0  ;;  %v6057_v49 = vadd.f32 %v6056_v30, %v6055_v36 }
 0x339   :  { %v5952_v21 = vadd.f32 %v5951_v19, %v5950_v33  ;;  %v4068_v41 = vadd.f32 %v5917_v10, %v3998_v59  ;;  %v6125_v3 = vpop.f32.mrf.mxu1  ;;  %v5355_v59 = vld [vmem:[%s10355_s6] ss:$0 sm:$0xff] }
 0x33a   :  { %v6020_v58 = vpop.f32.mrf.mxu0 }
 0x33b   :  { %v4138_v15 = vadd.f32 %v5952_v21, %v4068_v41  ;;  %v6126_v28 = vpop.f32.mrf.mxu1 }
 0x33c   :  { %v6021_v35 = vpop.f32.mrf.mxu0  ;;  %v6127_v61 = vadd.f32 %v6126_v28, %v6125_v3 }
 0x33d   :  { %v6022_v43 = vadd.f32 %v6021_v35, %v6020_v58  ;;  %v4208_v45 = vadd.f32 %v5987_v16, %v4138_v15 }
 0x33e   :  { %v6090_v39 = vpop.f32.mrf.mxu0 }
 0x33f   :  { %v4278_v42 = vadd.f32 %v6022_v43, %v4208_v45 }
 0x340   :  { %v6091_v25 = vpop.f32.mrf.mxu0 }
 0x341   :  { %v6092_v27 = vadd.f32 %v6091_v25, %v6090_v39  ;;  %v4348_v34 = vadd.f32 %v6057_v49, %v4278_v42 }
 0x343   :  { %v4418_v56 = vadd.f32 %v6092_v27, %v4348_v34 }
 0x345   :  { %v4488_v44 = vadd.f32 %v6127_v61, %v4418_v56 }
 0x34e   :  { %v6160_v50 = vpop.f32.mrf.mxu0 }
 0x350   :  { %v6161_v52 = vpop.f32.mrf.mxu0 }
 0x351   :  { %v6195_v26 = vpop.f32.mrf.mxu1  ;;  %v6162_v63 = vadd.f32 %v6161_v52, %v6160_v50 }
 0x353   :  { %v6196_v57 = vpop.f32.mrf.mxu1  ;;  %v4558_v5 = vadd.f32 %v6162_v63, %v4488_v44 }
 0x354   :  { %v6197_v2 = vadd.f32 %v6196_v57, %v6195_v26 }
 0x356   :  { %v4628_v51 = vadd.f32 %v6197_v2, %v4558_v5 }
 0x370   :  { %v6230_v62 = vpop.f32.mrf.mxu0 }
 0x372   :  { %v6231_v37 = vpop.f32.mrf.mxu0 }
 0x373   :  { %v6265_v48 = vpop.f32.mrf.mxu1  ;;  %v6232_v12 = vadd.f32 %v6231_v37, %v6230_v62 }
 0x375   :  { %v6266_v8 = vpop.f32.mrf.mxu1  ;;  %v4698_v14 = vadd.f32 %v6232_v12, %v4628_v51 }
 0x376   :  { %v6267_v46 = vadd.f32 %v6266_v8, %v6265_v48 }
 0x378   :  { %v4768_v60 = vadd.f32 %v6267_v46, %v4698_v14 }
 0x392   :  { %v6300_v7 = vpop.f32.mrf.mxu0 }
 0x394   :  { %v6301_v11 = vpop.f32.mrf.mxu0 }
 0x395   :  { %v6335_v53 = vpop.f32.mrf.mxu1  ;;  %v6302_v17 = vadd.f32 %v6301_v11, %v6300_v7 }
 0x397   :  { %v6336_v18 = vpop.f32.mrf.mxu1  ;;  %v4838_v54 = vadd.f32 %v6302_v17, %v4768_v60 }
 0x398   :  { %v6337_v55 = vadd.f32 %v6336_v18, %v6335_v53 }
 0x39a   :  { %v4908_v24 = vadd.f32 %v6337_v55, %v4838_v54 }
 0x3b4   :  { %v6370_v47 = vpop.f32.mrf.mxu0 }
 0x3b6   :  { %v6371_v20 = vpop.f32.mrf.mxu0 }
 0x3b7   :  { %v6405_v38 = vpop.f32.mrf.mxu1  ;;  %v6372_v22 = vadd.f32 %v6371_v20, %v6370_v47 }
 0x3b9   :  { %v6406_v23 = vpop.f32.mrf.mxu1  ;;  %v4978_v9 = vadd.f32 %v6372_v22, %v4908_v24 }
 0x3ba   :  { %v6407_v29 = vadd.f32 %v6406_v23, %v6405_v38 }
 0x3bc   :  { %v5048_v32 = vadd.f32 %v6407_v29, %v4978_v9 }
 0x3d6   :  { %v6440_v13 = vpop.f32.mrf.mxu0 }
 0x3d8   :  { %v6441_v31 = vpop.f32.mrf.mxu0  ;;  %v6475_v4 = vpop.f32.mrf.mxu1 }
 0x3d9   :  { %v6442_v33 = vadd.f32 %v6441_v31, %v6440_v13 }
 0x3da   :  { %v6476_v0 = vpop.f32.mrf.mxu1 }
 0x3db   :  { %v5118_v6 = vadd.f32 %v6442_v33, %v5048_v32  ;;  %v6477_v19 = vadd.f32 %v6476_v0, %v6475_v4 }
 0x3dd   :  { %v5188_v1 = vadd.f32 %v6477_v19, %v5118_v6 }
 0x3df   :  { %5279 = vst.msk [vmem:[%s10354_s7] sm:$0x3] %vm5278_vm5, %v5188_v1  ;;  %6486 = vmatmul.mubr.msk.f32.vlgmr.msra.gmra.mxu0 %vm5200_vm6, %v5188_v1 }
 0x49f   :  { %v5274_v10 = vpop.f32.mrf.mxu0 }
 0x4a0   :  { %v5275_v58 = vadd.f32 %v5355_v59, %v5274_v10 }
 0x4a1   :  { %v6487_v21 = vpop.f32.mrf.mxu0 }
 0x4a2   :  { %5281 = vrot.lane.b32.xlu0 %v5275_v58, %s6517_s9 }
 0x514   :  { %v5282_v40 = vpop.permute.xlu0 %5281 }
 0x515   :  { %5285 = vst.msk [vmem:[%s10354_s7] sm:$0x3] %vm5284_vm7, %v5282_v40 }

</bundles_post_ra>
